<compile_context>
chip_gen: v7x
topology: tpu7x:2x2x1
jax: 0.10.0
libtpu: 0.0.40
codegen_flags: <defaults>
</compile_context>

<pallas_src>
import functools
import math

import jax
import jax.numpy as jnp
from jax.experimental import pallas as pl
from jax.experimental.pallas import tpu as pltpu


def _cross_attention_kernel(x_ref, y_ref,
                            wq_ref, bq_ref,
                            wk_ref, bk_ref,
                            wv_ref, bv_ref,
                            wo_ref, bo_ref,
                            out_ref,
                            k_cache, v_cache,
                            *, n_heads: int, d_head: int, skv: int):
    """One (batch, Sq-tile) grid step.

    x_ref:   (Tq, d_embed)        bf16 VMEM (batch dim squeezed)
    y_ref:   (Skv_pad, d_cross)   bf16 VMEM (batch dim squeezed, zero-padded keys)
    w*_ref:  (in, out)            bf16 VMEM (pre-transposed vs torch Linear.weight)
    b*_ref:  (1, out)             f32  VMEM
    out_ref: (Tq, d_embed)        VMEM
    k_cache, v_cache: (n_heads, Skv_pad, d_head) bf16 VMEM scratch, carried across Sq tiles.
    """
    skv_pad = k_cache.shape[1]

    # ---- K/V projection + head relayout: once per batch, cached in VMEM ----
    @pl.when(pl.program_id(1) == 0)
    def _project_kv():
        y = y_ref[...]                                                  # (Skv_pad, d_cross)
        k = jnp.dot(y, wk_ref[...], preferred_element_type=jnp.float32) + bk_ref[...]
        v = jnp.dot(y, wv_ref[...], preferred_element_type=jnp.float32) + bv_ref[...]
        # (Skv_pad, d_embed) -> (n_heads, Skv_pad, d_head); relayout done on bf16.
        k_cache[...] = (k.astype(jnp.bfloat16)
                        .reshape(skv_pad, n_heads, d_head).transpose(1, 0, 2))
        v_cache[...] = (v.astype(jnp.bfloat16)
                        .reshape(skv_pad, n_heads, d_head).transpose(1, 0, 2))

    # ---- Q projection for this Sq tile (softmax scale already folded into wq/bq) ----
    x = x_ref[...]                                                      # (Tq, d_embed) bf16
    q = jnp.dot(x, wq_ref[...], preferred_element_type=jnp.float32) + bq_ref[...]
    tq = q.shape[0]
    qh = (q.astype(jnp.bfloat16)
          .reshape(tq, n_heads, d_head).transpose(1, 0, 2))             # (H, Tq, d_head)

    kh = k_cache[...]                                                   # (H, Skv_pad, d_head)
    vh = v_cache[...]

    # Attention scores, f32: (H, Tq, Skv_pad).
    s = jnp.einsum('hqd,hkd->hqk', qh, kh, preferred_element_type=jnp.float32)

    # Mask padded key columns (bias makes them nonzero) before the softmax max.
    if skv != skv_pad:
        col = jax.lax.broadcasted_iota(jnp.int32, s.shape, 2)
        s = jnp.where(col < skv, s, -1e30)

    # Numerically stable softmax over keys; exp on EUP; normalize via approx
    # reciprocal + multiply instead of a VALU divide.
    s = s - jnp.max(s, axis=-1, keepdims=True)
    p = jnp.exp(s)
    denom = jnp.sum(p, axis=-1, keepdims=True)
    p = p * pl.reciprocal(denom, approx=True)

    # (H, Tq, d_head) -> (Tq, d_embed); relayout on bf16, then output projection.
    o = jnp.einsum('hqk,hkd->hqd', p.astype(jnp.bfloat16), vh,
                   preferred_element_type=jnp.float32)
    attn = (o.astype(jnp.bfloat16)
            .transpose(1, 0, 2).reshape(tq, n_heads * d_head))

    out = jnp.dot(attn, wo_ref[...], preferred_element_type=jnp.float32) + bo_ref[...]
    out_ref[...] = out.astype(out_ref.dtype)


def _pick_sq_tile(sq: int, max_tile: int = 512) -> int:
    """Largest tile <= max_tile dividing Sq; prefer multiples of 128, then of 8."""
    if sq <= max_tile:
        return sq
    start128 = max_tile - (max_tile % 128)
    for t in range(start128, 0, -128):
        if sq % t == 0:
            return t
    start8 = max_tile - (max_tile % 8)
    for t in range(start8, 0, -8):
        if sq % t == 0:
            return t
    return sq   # no clean divisor: fall back to the full sequence


def cross_attention(x, y, params, *, n_heads: int, max_sq_tile: int = 512):
    """Pallas-backed CrossAttention forward.

    x: (B, Sq, d_embed), y: (B, Skv, d_cross); params use torch conventions:
        wq,wo: (d_embed, d_embed), wk,wv: (d_embed, d_cross), b*: (d_embed,)
    """
    B, Sq, d_embed = x.shape
    _, Skv, d_cross = y.shape
    d_head = d_embed // n_heads
    scale = 1.0 / math.sqrt(d_head)
    out_dtype = x.dtype

    # Glue: (in, out) weight layout; fold softmax scale into the q projection
    # in f32 BEFORE the bf16 cast; bf16 weights, f32 biases.
    wq = (params["wq"].astype(jnp.float32).T * scale).astype(jnp.bfloat16)
    wk = params["wk"].astype(jnp.float32).T.astype(jnp.bfloat16)
    wv = params["wv"].astype(jnp.float32).T.astype(jnp.bfloat16)
    wo = params["wo"].astype(jnp.float32).T.astype(jnp.bfloat16)
    bq = (params["bq"].astype(jnp.float32) * scale).reshape(1, d_embed)
    bk = params["bk"].astype(jnp.float32).reshape(1, d_embed)
    bv = params["bv"].astype(jnp.float32).reshape(1, d_embed)
    bo = params["bo"].astype(jnp.float32).reshape(1, d_embed)

    # bf16 activations at the call boundary (halves x/y DMA bytes); f32 accumulation inside.
    x_bf = x.astype(jnp.bfloat16)
    skv_pad = ((Skv + 127) // 128) * 128       # lane-dense key dimension
    y_bf = y.astype(jnp.bfloat16)
    if skv_pad != Skv:
        y_bf = jnp.pad(y_bf, ((0, 0), (0, skv_pad - Skv), (0, 0)))

    tile_sq = _pick_sq_tile(Sq, max_sq_tile)
    n_sq_tiles = Sq // tile_sq

    kernel = functools.partial(_cross_attention_kernel,
                               n_heads=n_heads, d_head=d_head, skv=Skv)

    def const_spec(shape):
        return pl.BlockSpec(shape, lambda b, s: (0,) * len(shape))

    # K/V projection counted once per batch (it is cached across Sq tiles).
    flops = 2 * B * (Sq * d_embed * d_embed                 # q projection
                     + 2 * skv_pad * d_cross * d_embed      # k, v projections (once/batch)
                     + 2 * n_heads * Sq * skv_pad * d_head  # QK^T + PV
                     + Sq * d_embed * d_embed)              # output projection
    transcendentals = B * n_heads * Sq * skv_pad            # softmax exp (padded keys)
    bytes_accessed = int(
        x_bf.size * x_bf.dtype.itemsize + y_bf.size * y_bf.dtype.itemsize
        + sum(int(a.size) * a.dtype.itemsize
              for a in (wq, wk, wv, wo, bq, bk, bv, bo))
        + B * Sq * d_embed * jnp.dtype(out_dtype).itemsize)

    return pl.pallas_call(
        kernel,
        out_shape=jax.ShapeDtypeStruct((B, Sq, d_embed), out_dtype),
        grid_spec=pltpu.PrefetchScalarGridSpec(
            num_scalar_prefetch=0,
            grid=(B, n_sq_tiles),
            in_specs=[
                pl.BlockSpec((None, tile_sq, d_embed), lambda b, s: (b, s, 0)),   # x
                pl.BlockSpec((None, skv_pad, d_cross), lambda b, s: (b, 0, 0)),   # y (padded)
                const_spec(wq.shape), const_spec(bq.shape),
                const_spec(wk.shape), const_spec(bk.shape),
                const_spec(wv.shape), const_spec(bv.shape),
                const_spec(wo.shape), const_spec(bo.shape),
            ],
            out_specs=pl.BlockSpec((None, tile_sq, d_embed), lambda b, s: (b, s, 0)),
            scratch_shapes=[
                pltpu.VMEM((n_heads, skv_pad, d_head), jnp.bfloat16),   # K cache
                pltpu.VMEM((n_heads, skv_pad, d_head), jnp.bfloat16),   # V cache
            ],
        ),
        compiler_params=pltpu.CompilerParams(
            # Sq axis must be "arbitrary": K/V scratch is carried across Sq tiles.
            dimension_semantics=("parallel", "arbitrary"),
            vmem_limit_bytes=48 * 1024 * 1024,
        ),
        cost_estimate=pl.CostEstimate(
            flops=flops,
            transcendentals=transcendentals,
            bytes_accessed=bytes_accessed,
        ),
    )(x_bf, y_bf, wq, bq, wk, bk, wv, bv, wo, bo)


def _reference(x, y, params, n_heads):
    """Plain-JAX f32 reference mirroring the PyTorch forward."""
    B, Sq, D = x.shape
    dh = D // n_heads
    q = x @ params["wq"].T + params["bq"]
    k = y @ params["wk"].T + params["bk"]
    v = y @ params["wv"].T + params["bv"]
    q = q.reshape(B, -1, n_heads, dh).transpose(0, 2, 1, 3)
    k = k.reshape(B, -1, n_heads, dh).transpose(0, 2, 1, 3)
    v = v.reshape(B, -1, n_heads, dh).transpose(0, 2, 1, 3)
    att = (q @ jnp.swapaxes(k, -1, -2)) / math.sqrt(dh)
    att = jax.nn.softmax(att, axis=-1)
    out = att @ v
    out = out.transpose(0, 2, 1, 3).reshape(B, Sq, D)
    return out @ params["wo"].T + params["bo"]


if __name__ == "__main__":
    # Small shapes consistent with the module's forward.
    B = 2          # batch
    Sq = 32        # x sequence length
    Skv = 8        # y (cross) sequence length -> padded to 128 in the wrapper
    d_embed = 32
    d_cross = 16
    n_heads = 4    # d_head = 8

    key = jax.random.PRNGKey(0)
    keys = jax.random.split(key, 10)

    x = jax.random.normal(keys[0], (B, Sq, d_embed), dtype=jnp.float32)
    y = jax.random.normal(keys[1], (B, Skv, d_cross), dtype=jnp.float32)

    # Deterministic parameter init (torch Linear convention: weight is (out, in)).
    s = 0.05
    params = {
        "wq": s * jax.random.normal(keys[2], (d_embed, d_embed), jnp.float32),
        "bq": s * jax.random.normal(keys[3], (d_embed,), jnp.float32),
        "wk": s * jax.random.normal(keys[4], (d_embed, d_cross), jnp.float32),
        "bk": s * jax.random.normal(keys[5], (d_embed,), jnp.float32),
        "wv": s * jax.random.normal(keys[6], (d_embed, d_cross), jnp.float32),
        "bv": s * jax.random.normal(keys[7], (d_embed,), jnp.float32),
        "wo": s * jax.random.normal(keys[8], (d_embed, d_embed), jnp.float32),
        "bo": s * jax.random.normal(keys[9], (d_embed,), jnp.float32),
    }

    ref = _reference(x, y, params, n_heads)

    # Config 1: single Sq tile per batch.
    out1 = jax.block_until_ready(cross_attention(x, y, params, n_heads=n_heads))
    assert out1.shape == (B, Sq, d_embed)
    err1 = jnp.max(jnp.abs(out1 - ref))
    assert jnp.allclose(out1, ref, atol=2e-2, rtol=2e-2), f"max abs err {err1}"

    # Config 2: force multiple Sq tiles to exercise the K/V scratch cache +
    # pl.when(first-tile) path and the Sq "arbitrary" carry.
    out2 = jax.block_until_ready(
        cross_attention(x, y, params, n_heads=n_heads, max_sq_tile=16))
    err2 = jnp.max(jnp.abs(out2 - ref))
    assert jnp.allclose(out2, ref, atol=2e-2, rtol=2e-2), f"max abs err {err2}"

    print("KERNEL_OK")
</pallas_src>

<mosaic_0001>
module attributes {stable_mosaic.version = 11 : i64} {
  func.func @_cross_attention_kernel(%arg0: i32, %arg1: i32, %arg2: memref<1x32x32xbf16, #tpu.memory_space<vmem>>, %arg3: memref<1x128x16xbf16, #tpu.memory_space<vmem>>, %arg4: memref<32x32xbf16, #tpu.memory_space<vmem>>, %arg5: memref<1x32xf32, #tpu.memory_space<vmem>>, %arg6: memref<16x32xbf16, #tpu.memory_space<vmem>>, %arg7: memref<1x32xf32, #tpu.memory_space<vmem>>, %arg8: memref<16x32xbf16, #tpu.memory_space<vmem>>, %arg9: memref<1x32xf32, #tpu.memory_space<vmem>>, %arg10: memref<32x32xbf16, #tpu.memory_space<vmem>>, %arg11: memref<1x32xf32, #tpu.memory_space<vmem>>, %arg12: memref<1x32x32xf32, #tpu.memory_space<vmem>>, %arg13: memref<4x128x8xbf16, #tpu.memory_space<vmem>>, %arg14: memref<4x128x8xbf16, #tpu.memory_space<vmem>>) attributes {dimension_semantics = [#tpu.dimension_semantics<parallel>, #tpu.dimension_semantics<arbitrary>], iteration_bounds = array<i64: 2, 1>, scalar_prefetch = 0 : i64, scratch_operands = 2 : i64, tpu.core_type = #tpu.core_type<tc>, window_params = [{transform_indices = @transform_0, window_bounds = array<i64: 1, 32, 32>}, {transform_indices = @transform_1, window_bounds = array<i64: 1, 128, 16>}, {pipeline_mode = #tpu.pipeline_mode<synchronous>, transform_indices = @transform_2, window_bounds = array<i64: 32, 32>}, {pipeline_mode = #tpu.pipeline_mode<synchronous>, transform_indices = @transform_3, window_bounds = array<i64: 1, 32>}, {pipeline_mode = #tpu.pipeline_mode<synchronous>, transform_indices = @transform_4, window_bounds = array<i64: 16, 32>}, {pipeline_mode = #tpu.pipeline_mode<synchronous>, transform_indices = @transform_5, window_bounds = array<i64: 1, 32>}, {pipeline_mode = #tpu.pipeline_mode<synchronous>, transform_indices = @transform_6, window_bounds = array<i64: 16, 32>}, {pipeline_mode = #tpu.pipeline_mode<synchronous>, transform_indices = @transform_7, window_bounds = array<i64: 1, 32>}, {pipeline_mode = #tpu.pipeline_mode<synchronous>, transform_indices = @transform_8, window_bounds = array<i64: 32, 32>}, {pipeline_mode = #tpu.pipeline_mode<synchronous>, transform_indices = @transform_9, window_bounds = array<i64: 1, 32>}, {transform_indices = @transform_10, window_bounds = array<i64: 1, 32, 32>}]} {
    %c0_i32 = arith.constant 0 : i32
    %0 = arith.cmpi eq, %arg1, %c0_i32 : i32
    %1 = arith.extui %0 : i1 to i32
    %c0_i32_0 = arith.constant 0 : i32
    %2 = arith.cmpi ne, %1, %c0_i32_0 : i32
    scf.if %2 {
      %c0_26 = arith.constant 0 : index
      %c0_27 = arith.constant 0 : index
      %c0_28 = arith.constant 0 : index
      %44 = vector.load %arg3[%c0_26, %c0_27, %c0_28] : memref<1x128x16xbf16, #tpu.memory_space<vmem>>, vector<1x128x16xbf16>
      %45 = vector.shape_cast %44 : vector<1x128x16xbf16> to vector<128x16xbf16>
      %c0_29 = arith.constant 0 : index
      %c0_30 = arith.constant 0 : index
      %46 = vector.load %arg6[%c0_29, %c0_30] : memref<16x32xbf16, #tpu.memory_space<vmem>>, vector<16x32xbf16>
      %cst_31 = arith.constant dense<0.000000e+00> : vector<128x32xf32>
      %47 = tpu.matmul %45, %46, %cst_31 {dimension_numbers = #tpu.dot_dimension_numbers<[1], [0], [0], [1], [0, 0, 1, 1], [], []>} : vector<128x16xbf16>, vector<16x32xbf16>, vector<128x32xf32> -> vector<128x32xf32>
      %c0_32 = arith.constant 0 : index
      %c0_33 = arith.constant 0 : index
      %48 = vector.load %arg7[%c0_32, %c0_33] : memref<1x32xf32, #tpu.memory_space<vmem>>, vector<1x32xf32>
      %49 = vector.broadcast %48 : vector<1x32xf32> to vector<128x32xf32>
      %50 = arith.addf %47, %49 : vector<128x32xf32>
      %c0_34 = arith.constant 0 : index
      %c0_35 = arith.constant 0 : index
      %51 = vector.load %arg8[%c0_34, %c0_35] : memref<16x32xbf16, #tpu.memory_space<vmem>>, vector<16x32xbf16>
      %cst_36 = arith.constant dense<0.000000e+00> : vector<128x32xf32>
      %52 = tpu.matmul %45, %51, %cst_36 {dimension_numbers = #tpu.dot_dimension_numbers<[1], [0], [0], [1], [0, 0, 1, 1], [], []>} : vector<128x16xbf16>, vector<16x32xbf16>, vector<128x32xf32> -> vector<128x32xf32>
      %c0_37 = arith.constant 0 : index
      %c0_38 = arith.constant 0 : index
      %53 = vector.load %arg9[%c0_37, %c0_38] : memref<1x32xf32, #tpu.memory_space<vmem>>, vector<1x32xf32>
      %54 = vector.broadcast %53 : vector<1x32xf32> to vector<128x32xf32>
      %55 = arith.addf %52, %54 : vector<128x32xf32>
      %56 = arith.truncf %50 : vector<128x32xf32> to vector<128x32xbf16>
      %57 = vector.shape_cast %56 : vector<128x32xbf16> to vector<128x4x8xbf16>
      %58 = tpu.transpose %57, [1, 0, 2] : vector<128x4x8xbf16> -> vector<4x128x8xbf16>
      %c0_39 = arith.constant 0 : index
      %c0_40 = arith.constant 0 : index
      %c0_41 = arith.constant 0 : index
      %59 = vector.load %arg13[%c0_39, %c0_40, %c0_41] : memref<4x128x8xbf16, #tpu.memory_space<vmem>>, vector<4x128x8xbf16>
      tpu.vector_store %arg13[%c0_39, %c0_40, %c0_41], %58 {strides = array<i32>} : memref<4x128x8xbf16, #tpu.memory_space<vmem>>, vector<4x128x8xbf16>,
      %60 = arith.truncf %55 : vector<128x32xf32> to vector<128x32xbf16>
      %61 = vector.shape_cast %60 : vector<128x32xbf16> to vector<128x4x8xbf16>
      %62 = tpu.transpose %61, [1, 0, 2] : vector<128x4x8xbf16> -> vector<4x128x8xbf16>
      %c0_42 = arith.constant 0 : index
      %c0_43 = arith.constant 0 : index
      %c0_44 = arith.constant 0 : index
      %63 = vector.load %arg14[%c0_42, %c0_43, %c0_44] : memref<4x128x8xbf16, #tpu.memory_space<vmem>>, vector<4x128x8xbf16>
      tpu.vector_store %arg14[%c0_42, %c0_43, %c0_44], %62 {strides = array<i32>} : memref<4x128x8xbf16, #tpu.memory_space<vmem>>, vector<4x128x8xbf16>,
    } else {
    }
    %c0 = arith.constant 0 : index
    %c0_1 = arith.constant 0 : index
    %c0_2 = arith.constant 0 : index
    %3 = vector.load %arg2[%c0, %c0_1, %c0_2] : memref<1x32x32xbf16, #tpu.memory_space<vmem>>, vector<1x32x32xbf16>
    %4 = vector.shape_cast %3 : vector<1x32x32xbf16> to vector<32x32xbf16>
    %c0_3 = arith.constant 0 : index
    %c0_4 = arith.constant 0 : index
    %5 = vector.load %arg4[%c0_3, %c0_4] : memref<32x32xbf16, #tpu.memory_space<vmem>>, vector<32x32xbf16>
    %cst = arith.constant dense<0.000000e+00> : vector<32x32xf32>
    %6 = tpu.matmul %4, %5, %cst {dimension_numbers = #tpu.dot_dimension_numbers<[1], [0], [0], [1], [0, 0, 1, 1], [], []>} : vector<32x32xbf16>, vector<32x32xbf16>, vector<32x32xf32> -> vector<32x32xf32>
    %c0_5 = arith.constant 0 : index
    %c0_6 = arith.constant 0 : index
    %7 = vector.load %arg5[%c0_5, %c0_6] : memref<1x32xf32, #tpu.memory_space<vmem>>, vector<1x32xf32>
    %8 = vector.broadcast %7 : vector<1x32xf32> to vector<32x32xf32>
    %9 = arith.addf %6, %8 : vector<32x32xf32>
    %10 = arith.truncf %9 : vector<32x32xf32> to vector<32x32xbf16>
    %11 = vector.shape_cast %10 : vector<32x32xbf16> to vector<32x4x8xbf16>
    %12 = tpu.transpose %11, [1, 0, 2] : vector<32x4x8xbf16> -> vector<4x32x8xbf16>
    %c0_7 = arith.constant 0 : index
    %c0_8 = arith.constant 0 : index
    %c0_9 = arith.constant 0 : index
    %13 = vector.load %arg13[%c0_7, %c0_8, %c0_9] : memref<4x128x8xbf16, #tpu.memory_space<vmem>>, vector<4x128x8xbf16>
    %c0_10 = arith.constant 0 : index
    %c0_11 = arith.constant 0 : index
    %c0_12 = arith.constant 0 : index
    %14 = vector.load %arg14[%c0_10, %c0_11, %c0_12] : memref<4x128x8xbf16, #tpu.memory_space<vmem>>, vector<4x128x8xbf16>
    "tpu.trace_start"() <{level = 10 : i32, message = "hqd,hkd->hqk"}> : () -> ()
    %cst_13 = arith.constant dense<0.000000e+00> : vector<4x32x128xf32>
    %15 = tpu.matmul %12, %13, %cst_13 {dimension_numbers = #tpu.dot_dimension_numbers<[2], [2], [1], [1], [0, 0, 0, 1, 1, 1], [0], [0]>} : vector<4x32x8xbf16>, vector<4x128x8xbf16>, vector<4x32x128xf32> -> vector<4x32x128xf32>
    "tpu.trace_stop"() : () -> ()
    %16 = tpu.iota {dimensions = array<i32: 2>} : vector<4x32x128xi32>
    %c8_i32 = arith.constant 8 : i32
    %17 = vector.broadcast %c8_i32 : i32 to vector<4x32x128xi32>
    %18 = arith.cmpi slt, %16, %17 : vector<4x32x128xi32>
    %cst_14 = arith.constant -1.000000e+30 : f32
    %19 = vector.broadcast %cst_14 : f32 to vector<4x32x128xf32>
    %20 = arith.select %18, %15, %19 : vector<4x32x128xi1>, vector<4x32x128xf32>
    %cst_15 = arith.constant dense<0xFF800000> : vector<4x32xf32>
    %21 = vector.multi_reduction <maximumf>, %20, %cst_15 [2] : vector<4x32x128xf32> to vector<4x32xf32>
    %22 = vector.shape_cast %21 : vector<4x32xf32> to vector<4x32x1xf32>
    %23 = vector.broadcast %22 : vector<4x32x1xf32> to vector<4x32x128xf32>
    %24 = arith.subf %20, %23 : vector<4x32x128xf32>
    %25 = math.exp %24 : vector<4x32x128xf32>
    %cst_16 = arith.constant dense<0.000000e+00> : vector<4x32xf32>
    %26 = vector.multi_reduction <add>, %25, %cst_16 [2] : vector<4x32x128xf32> to vector<4x32xf32>
    %27 = vector.shape_cast %26 : vector<4x32xf32> to vector<4x32x1xf32>
    %28 = tpu.reciprocal %27 {approx = true} : vector<4x32x1xf32> -> vector<4x32x1xf32>
    %29 = vector.broadcast %28 : vector<4x32x1xf32> to vector<4x32x128xf32>
    %30 = arith.mulf %25, %29 : vector<4x32x128xf32>
    %31 = arith.truncf %30 : vector<4x32x128xf32> to vector<4x32x128xbf16>
    "tpu.trace_start"() <{level = 10 : i32, message = "hqk,hkd->hqd"}> : () -> ()
    %cst_17 = arith.constant dense<0.000000e+00> : vector<4x32x8xf32>
    %32 = tpu.matmul %31, %14, %cst_17 {dimension_numbers = #tpu.dot_dimension_numbers<[2], [1], [1], [2], [0, 0, 0, 1, 1, 2], [0], [0]>} : vector<4x32x128xbf16>, vector<4x128x8xbf16>, vector<4x32x8xf32> -> vector<4x32x8xf32>
    "tpu.trace_stop"() : () -> ()
    %33 = arith.truncf %32 : vector<4x32x8xf32> to vector<4x32x8xbf16>
    %34 = tpu.transpose %33, [1, 0, 2] : vector<4x32x8xbf16> -> vector<32x4x8xbf16>
    %35 = vector.shape_cast %34 : vector<32x4x8xbf16> to vector<32x32xbf16>
    %c0_18 = arith.constant 0 : index
    %c0_19 = arith.constant 0 : index
    %36 = vector.load %arg10[%c0_18, %c0_19] : memref<32x32xbf16, #tpu.memory_space<vmem>>, vector<32x32xbf16>
    %cst_20 = arith.constant dense<0.000000e+00> : vector<32x32xf32>
    %37 = tpu.matmul %35, %36, %cst_20 {dimension_numbers = #tpu.dot_dimension_numbers<[1], [0], [0], [1], [0, 0, 1, 1], [], []>} : vector<32x32xbf16>, vector<32x32xbf16>, vector<32x32xf32> -> vector<32x32xf32>
    %c0_21 = arith.constant 0 : index
    %c0_22 = arith.constant 0 : index
    %38 = vector.load %arg11[%c0_21, %c0_22] : memref<1x32xf32, #tpu.memory_space<vmem>>, vector<1x32xf32>
    %39 = vector.broadcast %38 : vector<1x32xf32> to vector<32x32xf32>
    %40 = arith.addf %37, %39 : vector<32x32xf32>
    %c0_23 = arith.constant 0 : index
    %c0_24 = arith.constant 0 : index
    %c0_25 = arith.constant 0 : index
    %41 = vector.load %arg12[%c0_23, %c0_24, %c0_25] : memref<1x32x32xf32, #tpu.memory_space<vmem>>, vector<1x32x32xf32>
    %42 = vector.shape_cast %41 : vector<1x32x32xf32> to vector<32x32xf32>
    %43 = vector.shape_cast %40 : vector<32x32xf32> to vector<1x32x32xf32>
    tpu.vector_store %arg12[%c0_23, %c0_24, %c0_25], %43 {strides = array<i32>} : memref<1x32x32xf32, #tpu.memory_space<vmem>>, vector<1x32x32xf32>,
    return
  }
  func.func @transform_0(%arg0: i32, %arg1: i32) -> (i32, i32, i32) {
    %c0_i32 = arith.constant 0 : i32
    %c0_i32_0 = arith.constant 0 : i32
    return %arg0, %arg1, %c0_i32 : i32, i32, i32
  }
  func.func @transform_1(%arg0: i32, %arg1: i32) -> (i32, i32, i32) {
    %c0_i32 = arith.constant 0 : i32
    %c0_i32_0 = arith.constant 0 : i32
    %c0_i32_1 = arith.constant 0 : i32
    return %arg0, %c0_i32, %c0_i32_0 : i32, i32, i32
  }
  func.func @transform_2(%arg0: i32, %arg1: i32) -> (i32, i32) {
    %c0_i32 = arith.constant 0 : i32
    %c0_i32_0 = arith.constant 0 : i32
    %c0_i32_1 = arith.constant 0 : i32
    return %c0_i32, %c0_i32_0 : i32, i32
  }
  func.func @transform_3(%arg0: i32, %arg1: i32) -> (i32, i32) {
    %c0_i32 = arith.constant 0 : i32
    %c0_i32_0 = arith.constant 0 : i32
    %c0_i32_1 = arith.constant 0 : i32
    return %c0_i32, %c0_i32_0 : i32, i32
  }
  func.func @transform_4(%arg0: i32, %arg1: i32) -> (i32, i32) {
    %c0_i32 = arith.constant 0 : i32
    %c0_i32_0 = arith.constant 0 : i32
    %c0_i32_1 = arith.constant 0 : i32
    return %c0_i32, %c0_i32_0 : i32, i32
  }
  func.func @transform_5(%arg0: i32, %arg1: i32) -> (i32, i32) {
    %c0_i32 = arith.constant 0 : i32
    %c0_i32_0 = arith.constant 0 : i32
    %c0_i32_1 = arith.constant 0 : i32
    return %c0_i32, %c0_i32_0 : i32, i32
  }
  func.func @transform_6(%arg0: i32, %arg1: i32) -> (i32, i32) {
    %c0_i32 = arith.constant 0 : i32
    %c0_i32_0 = arith.constant 0 : i32
    %c0_i32_1 = arith.constant 0 : i32
    return %c0_i32, %c0_i32_0 : i32, i32
  }
  func.func @transform_7(%arg0: i32, %arg1: i32) -> (i32, i32) {
    %c0_i32 = arith.constant 0 : i32
    %c0_i32_0 = arith.constant 0 : i32
    %c0_i32_1 = arith.constant 0 : i32
    return %c0_i32, %c0_i32_0 : i32, i32
  }
  func.func @transform_8(%arg0: i32, %arg1: i32) -> (i32, i32) {
    %c0_i32 = arith.constant 0 : i32
    %c0_i32_0 = arith.constant 0 : i32
    %c0_i32_1 = arith.constant 0 : i32
    return %c0_i32, %c0_i32_0 : i32, i32
  }
  func.func @transform_9(%arg0: i32, %arg1: i32) -> (i32, i32) {
    %c0_i32 = arith.constant 0 : i32
    %c0_i32_0 = arith.constant 0 : i32
    %c0_i32_1 = arith.constant 0 : i32
    return %c0_i32, %c0_i32_0 : i32, i32
  }
  func.func @transform_10(%arg0: i32, %arg1: i32) -> (i32, i32, i32) {
    %c0_i32 = arith.constant 0 : i32
    %c0_i32_0 = arith.constant 0 : i32
    return %arg0, %arg1, %c0_i32 : i32, i32, i32
  }
}

</mosaic_0001>

<bundles_post_ra>
// kernel: tpu_custom_call.1
= control target key start
LH: loop header
LB: loop body
LE: loop exit
PB: predicated region body
PF: predicated region fallthrough
CT: control target
= control target key end

     0   :  { %s9618_s0 = inlined_call_operand.vmem [shape: bf16[2,32,32], index: 0, kind: input, shape index: {}]   ;;  %s9619_s1 = inlined_call_operand.vmem [shape: bf16[2,128,16], index: 1, kind: input, shape index: {}]   ;;  %s9620_s2 = inlined_call_operand.vmem [shape: bf16[32,32], index: 2, kind: input, shape index: {}]   ;;  %s9621_s3 = inlined_call_operand.vmem [shape: f32[1,32], index: 3, kind: input, shape index: {}]   ;;  %s9622_s4 = inlined_call_operand.vmem [shape: bf16[16,32], index: 4, kind: input, shape index: {}]   ;;  %s9623_s5 = inlined_call_operand.vmem [shape: f32[1,32], index: 5, kind: input, shape index: {}]   ;;  %s9624_s6 = inlined_call_operand.vmem [shape: bf16[16,32], index: 6, kind: input, shape index: {}]   ;;  %s9625_s7 = inlined_call_operand.vmem [shape: f32[1,32], index: 7, kind: input, shape index: {}]   ;;  %s9626_s8 = inlined_call_operand.vmem [shape: bf16[32,32], index: 8, kind: input, shape index: {}]   ;;  %s9627_s9 = inlined_call_operand.vmem [shape: f32[1,32], index: 9, kind: input, shape index: {}]   ;;  %s9628_s10 = inlined_call_operand.hbm [shape: f32[2,32,32], index: 10, kind: output, shape index: {}]  }
   0x1   :  { %9630 = sst [smem:[#allocation7_spill]] %s9618_s0 }
   0x2   :  { %15 = vsyncpa [#allocation5], 0 }
   0x3   :  { %17 = vsyncpa [#allocation5 + $0x1], 0  ;;  %s8057_s13 = smov 0   ;;  %s8059_s14 = smov 0  }
   0x4   :  { %s8061_s15 = smov 0   ;;  %s8063_s16 = smov 0  }
   0x5   :  { %s8065_s17 = smov 0   ;;  %s8067_s18 = smov 0  }
   0x6 LB: > { %s7268_s19 = sadd.s32 4294967295, %s7989_s18   ;;  %s7269_s20 = sadd.s32 4294967294, %s7989_s18   ;;  %s7989_s18 = sphi %s8067_s18, %s23_s18   ;;  %s7985_s17 = sphi %s8065_s17, %s9639_s17   ;;  %s7981_s16 = sphi %s8063_s16, %s9638_s16   ;;  %s7977_s15 = sphi %s8061_s15, %s9637_s15   ;;  %s7973_s14 = sphi %s8059_s14, %s9636_s14   ;;  %s7969_s13 = sphi %s8057_s13, %s9635_s13  }
   0x7   : > { %s35_s21 = sadd.s32 1, %s7985_s17  ;;  %s266_s22 = sadd.s32 1, %s7977_s15 }
   0x8   : > { %p37_p0 = scmp.ge.s32.totalorder %s35_s21, 2  ;;  %p276_p1 = scmp.ne.s32.totalorder %s7977_s15, %s7973_s14 }
   0x9   : > { %p277_p2 = scmp.eq.s32.totalorder %s7268_s19, 1  ;;  %p282_p3 = scmp.ne.s32.totalorder %s7973_s14, %s7969_s13 }
   0xa   : > { %s9641_s21 = smov (%p37_p0, %s35_s21), 0  ;;  %p283_p5 = scmp.eq.s32.totalorder %s7269_s20, 1 }
   0xb   : > { %p8097_p4 = por %p277_p2, %p276_p1  ;;  %s261_s24 = ssub.s32 %s7985_s17, %s9641_s21 }
   0xc   : > { %p7272_p6 = scmp.ge.s32.totalorder %s7989_s18, 1  ;;  %p264_p7 = scmp.eq.s32.totalorder %s261_s24, 0 }
   0xd   : > { %p8104_p8 = por %p283_p5, %p282_p3  ;;  %p346_p9 = scmp.lt.s32.totalorder %s7989_s18, 3 }
   0xe   : > { %s8110_s26 = scalar_select %p264_p7, %s7977_s15, %s266_s22  }
   0xf   : > { %p347_p10 = pnand %p7272_p6, %p346_p9 }
  0x10   : > { %v7831_v0 = vld [vmem:[%s9622_s4] sm:$0xff] (!%p347_p10)   ;;  %p394_p11 = scmp.lt.s32.totalorder (!%p347_p10), %s7981_s16, 1  ;;  %vm485_vm0 = vcmask (!%p347_p10), 130048   ;;  %v7841_v2 = vld [vmem:[%s9620_s2 + $0x8] sm:$0xff] (!%p347_p10)   ;;  %s9633_s0 = sld [smem:[#allocation7_spill]] (!%p347_p10)  ;;  %vm5179_vm1 = vcmask (!%p347_p10), 261120  }
  0x11   : > { %350 = sbr.rel (%p347_p10) target bundleno = 1784 (0x6f8), region = 60  ;;  %v7840_v1 = vld [vmem:[%s9620_s2] sm:$0xff] (!%p347_p10)   ;;  %7520 = vmatprep.subr.bf16.mxu0 (!%p347_p10), %v7831_v0  ;;  %7732 = vmatprep.subr.bf16.mxu1 (!%p347_p10), %v7831_v0  ;;  %s7991_s24 = smov (!%p347_p10), 104   ;;  %vm2901_vm2 = vcmask (!%p347_p10), 64512   ;;  %vm7076_vm4 = vcmask (!%p347_p10), 195584  }
  0x12   : > { %7521 = vmatpush3.bf16.msra.mxu0 (!%p347_p10), %v7831_v0  ;;  %7733 = vmatpush3.bf16.msra.mxu1 (!%p347_p10), %v7831_v0  ;;  %v7844_v13 = vld [vmem:[%s9624_s6] sm:$0xff] (!%p347_p10)   ;;  %s7992_s27 = smov (!%p347_p10), 120   ;;  %s7999_s29 = smov (!%p347_p10), 24  }
  0x13   : > { %7556 = vmatprep.subr.bf16.mxu0 (!%p347_p10), %v7840_v1  ;;  %7538 = vmatprep.subr.bf16.mxu1 (!%p347_p10), %v7844_v13  ;;  %v7278_v15 = vld [vmem:[%s9623_s5] ss:$0 sm:$0xff] (!%p347_p10)  ;;  %s390_s30 = sand.u32 (!%p347_p10), 1, %s7973_s14   ;;  %s8000_s19 = smov (!%p347_p10), [#allocation4]  }
  0x14   : > { %v7370_v55 = vld [vmem:[%s9621_s3] ss:$0 sm:$0xff] (!%p347_p10) }
  0x18   : > { %s395_s11 = scalar_select %p394_p11, %s7981_s16, 1 }
  0x1a   : > { %s7412_s12 = sshll.u32 %s395_s11, 6  ;;  %s7411_s28 = sshll.u32 %s395_s11, 4 }
  0x1b   : > { %s407_s22 = scalar_lea.vmem %s9619_s1, %s7412_s12  ;;  %s401_s12 = scalar_lea.vmem %s9633_s0, %s7411_s28 }
  0x1c   : > { %v7832_v3 = vld [vmem:[%s407_s22] sm:$0xff]   ;;  %v7833_v4 = vld [vmem:[%s407_s22 + $0x8] sm:$0xff]   ;;  %v7834_v5 = vld [vmem:[%s407_s22 + $0x10] sm:$0xff]   ;;  %s7993_s28 = smov 112  }
  0x1d   : > { %7522 = vmatprep.mubr.msk.bf16.mxu0 %vm485_vm0, %v7832_v3  ;;  %v7835_v6 = vld [vmem:[%s407_s22 + $0x18] sm:$0xff]   ;;  %v7836_v7 = vld [vmem:[%s407_s22 + $0x20] sm:$0xff]   ;;  %v7838_v8 = vld [vmem:[%s407_s22 + $0x30] sm:$0xff]  }
  0x1e   : > { %7523 = vmatmul.mubr.msk.bf16.vlgmr.msra.gmra.mrb[0].mxu0 %vm485_vm0, %v7833_v4  ;;  %v7839_v9 = vld [vmem:[%s407_s22 + $0x38] sm:$0xff]   ;;  %7534 = vmatprep.mubr.msk.bf16.mxu1 %vm485_vm0, %v7838_v8  ;;  %v7837_v10 = vld [vmem:[%s407_s22 + $0x28] sm:$0xff]   ;;  %v7842_v11 = vld [vmem:[%s401_s12] sm:$0xff]  }
  0x1f   : > { %7526 = vmatprep.mubr.msk.bf16.mxu0 %vm485_vm0, %v7834_v5  ;;  %7557 = vmatpush3.bf16.msra.mxu0 %v7840_v1  ;;  %v7843_v12 = vld [vmem:[%s401_s12 + $0x8] sm:$0xff]   ;;  %s7273_s12 = sshll.u32 %s390_s30, 5 }
  0x20   : > { %7558 = vmatprep.subr.bf16.mxu0 %v7841_v2  ;;  %7535 = vmatmul.mubr.msk.bf16.vlgmr.msra.gmra.mrb[0].mxu1 %vm485_vm0, %v7839_v9  ;;  %s392_s20 = scalar_lea.vmem [#allocation4], %s7273_s12 }
  0x21   : > { %7540 = vmatprep.mubr.msk.bf16.mxu1 %vm485_vm0, %v7832_v3  ;;  %7539 = vmatpush3.bf16.msra.mxu1 %v7844_v13  ;;  %s7177_s22 = sshll.u32 %s392_s20, 4  ;;  %s9561_s22 = int_to_ptr.vmem [resolvable:$true] %s7177_s22 }
  0x22   : > { %s7911_s11 = scalar_lea.vmem %s9561_s22, 512 }
  0x23   : > { %7559 = vmatpush3.bf16.msra.mxu0 %v7841_v2  ;;  %v7994_v2 = vmov 1983009808   ;;  %p7912_p12 = scmp.ne.s32.totalorder %s9561_s22, %s7911_s11 }
  0x24   : > { %v919_v3 = vunpack.c.l.s4 %v7994_v2 }
  0x25   : > { %p7913_p13 = pnand %p7912_p12, %p8097_p4 }
  0x26   : > { %7527 = vmatmul.mubr.msk.bf16.gmra.mrb[4].mxu0 %vm485_vm0, %v7835_v6 }
  0x27   : > { %7530 = vmatprep.mubr.msk.bf16.mxu0 %vm485_vm0, %v7836_v7  ;;  %p7914_p0 = pneg %p7913_p13 }
  0x28   : > { %7541 = vmatmul.mubr.msk.bf16.vlgmr.msra.gmra.mrb[4].mxu1 %vm485_vm0, %v7833_v4  ;;  %v921_v4 = vlaneseq }
  0x29   : > { %7544 = vmatprep.mubr.msk.bf16.mxu1 %vm485_vm0, %v7834_v5  ;;  %v7995_v5 = vmov 1934713408  }
  0x2e   : > { %7531 = vmatmul.mubr.msk.bf16.gmra.mrb[8].mxu0 %vm485_vm0, %v7837_v10 }
  0x2f   : > { %7560 = vmatprep.mubr.msk.bf16.mxu0 %vm5179_vm1, %v7842_v11 }
  0x30   : > { %7545 = vmatmul.mubr.msk.bf16.gmra.mrb[8].mxu1 %vm485_vm0, %v7835_v6  ;;  %v950_v6 = vunpack.c.l.s4 %v7995_v5 }
  0x31   : > { %7548 = vmatprep.mubr.msk.bf16.mxu1 %vm485_vm0, %v7836_v7  ;;  %v920_v7 = vunpack.c.0.s8 %v919_v3 }
  0x36   : > { %7561 = vmatmul.mubr.msk.bf16.vlgmr.msra.gmra.mrb[12].mxu0 %vm5179_vm1, %v7843_v12 }
  0x38   : > { %7549 = vmatmul.mubr.msk.bf16.gmra.mrb[12].mxu1 %vm485_vm0, %v7837_v10  ;;  %v7996_v10 = vmov 0  }
  0x39   : > { %7552 = vmatprep.mubr.msk.bf16.mxu1 %vm485_vm0, %v7838_v8  ;;  %v922_v8 = vshrl.u32 %v921_v4, 7  ;;  %v8237_v11 = vpack.i.b16 %v7996_v10, %v7996_v10 }
  0x40   : > { %7553 = vmatmul.mubr.msk.bf16.gmra.mrb[16].mxu1 %vm485_vm0, %v7839_v9  ;;  %v951_v9 = vunpack.c.0.s8 %v950_v6 }
  0xf1   : > { %v7524_v14 = vpop.f32.mrb[0].mxu0 }
  0xf2   : > { %v544_v16 = vpop.f32.mrb[1].mxu0  ;;  %v553_v18 = vadd.f32 %v7524_v14, %v7278_v15  ;;  %v8239_v14 = vsub.s32 %v920_v7, %v922_v8 }
  0xf3   : > { %v7525_v17 = vpop.f32.mrb[2].mxu0  ;;  %v545_v21 = vadd.f32 %v7278_v15, %v544_v16  ;;  %v7536_v25 = vpop.f32.mrb[0].mxu1 }
  0xf4   : > { %v556_v19 = vadd.f32 %v7525_v17, %v7278_v15  ;;  %v547_v20 = vpop.f32.mrb[3].mxu0  ;;  %v601_v26 = vadd.f32 %v7536_v25, %v7278_v15  ;;  %v592_v27 = vpop.f32.mrb[1].mxu1 }
  0xf5   : > { %v548_v22 = vadd.f32 %v7278_v15, %v547_v20  ;;  %v593_v29 = vadd.f32 %v7278_v15, %v592_v27  ;;  %v7537_v30 = vpop.f32.mrb[2].mxu1 }
  0xf6   : > { %v8153_v23 = vpack.c.bf16 %v556_v19, %v553_v18  ;;  %v604_v33 = vadd.f32 %v7537_v30, %v7278_v15  ;;  %v595_v34 = vpop.f32.mrb[3].mxu1  ;;  %v8243_v18 = vsub.s32 %v951_v9, %v922_v8 }
  0xf7   : > { %v8155_v24 = vpack.c.bf16 %v548_v22, %v545_v21  ;;  %v596_v37 = vadd.f32 %v7278_v15, %v595_v34 }
  0xf8   : > { %v8161_v40 = vpack.c.bf16 %v604_v33, %v601_v26  ;;  %v809_v21 = vshrl.u32 %v8153_v23, 16 }
  0xf9   : > { %767 = vrot.lane.b32.xlu1 %v8155_v24, %s7991_s24  ;;  %735 = vrot.lane.b32.xlu0 %v8155_v24, %s7992_s27  ;;  %v7528_v28 = vpop.f32.mrb[4].mxu0  ;;  %v8167_v42 = vpack.c.bf16 %v596_v37, %v593_v29  ;;  %v787_v16 = vshrl.u32 %v8155_v24, 16 }
  0xfa   : > { %v569_v31 = vadd.f32 %v7528_v28, %v7278_v15  ;;  %v560_v32 = vpop.f32.mrb[5].mxu0  ;;  %v905_v22 = vshrl.u32 %v8161_v40, 16 }
  0xfb   : > { %v561_v35 = vadd.f32 %v7278_v15, %v560_v32  ;;  %v7529_v36 = vpop.f32.mrb[6].mxu0 }
  0xfc   : > { %v572_v38 = vadd.f32 %v7529_v36, %v7278_v15  ;;  %v563_v39 = vpop.f32.mrb[7].mxu0 }
  0xfd   : > { %737 = vrot.lane.b32.xlu1 %v8153_v23, %s7992_s27  ;;  %751 = vrot.lane.b32.xlu0 %v8155_v24, %s7993_s28  ;;  %v564_v41 = vadd.f32 %v7278_v15, %v563_v39 }
  0xfe   : > { %v8169_v43 = vpack.c.bf16 %v572_v38, %v569_v31 }
  0xff   : > { %v8171_v44 = vpack.c.bf16 %v564_v41, %v561_v35 }
 0x100   : > { %v841_v28 = vshrl.u32 %v8169_v43, 16 }
 0x101   : > { %769 = vrot.lane.b32.xlu1 %v8153_v23, %s7991_s24  ;;  %753 = vrot.lane.b32.xlu0 %v8153_v23, %s7993_s28  ;;  %v7532_v45 = vpop.f32.mrb[8].mxu0  ;;  %v825_v27 = vshrl.u32 %v8171_v44, 16 }
 0x102   : > { %v585_v46 = vadd.f32 %v7532_v45, %v7278_v15  ;;  %v576_v47 = vpop.f32.mrb[9].mxu0 }
 0x103   : > { %v577_v48 = vadd.f32 %v7278_v15, %v576_v47  ;;  %v7533_v49 = vpop.f32.mrb[10].mxu0 }
 0x104   : > { %v588_v50 = vadd.f32 %v7533_v49, %v7278_v15  ;;  %v579_v51 = vpop.f32.mrb[11].mxu0 }
 0x105   : > { %755 = vrot.lane.b32.xlu1 %v8171_v44, %s7993_s28  ;;  %739 = vrot.lane.b32.xlu0 %v8171_v44, %s7992_s27  ;;  %v580_v52 = vadd.f32 %v7278_v15, %v579_v51 }
 0x106   : > { %v8181_v53 = vpack.c.bf16 %v588_v50, %v585_v46 }
 0x107   : > { %v8183_v54 = vpack.c.bf16 %v580_v52, %v577_v48 }
 0x108   : > { %v873_v29 = vshrl.u32 %v8181_v53, 16 }
 0x109   : > { %741 = vrot.lane.b32.xlu1 %v8169_v43, %s7992_s27  ;;  %771 = vrot.lane.b32.xlu0 %v8171_v44, %s7991_s24  ;;  %v7562_v56 = vpop.f32.mrb[12].mxu0 }
 0x10a   : > { %v5229_v57 = vadd.f32 %v7562_v56, %v7370_v55  ;;  %v5220_v58 = vpop.f32.mrb[13].mxu0 }
 0x10b   : > { %v5221_v59 = vadd.f32 %v7370_v55, %v5220_v58  ;;  %v7563_v60 = vpop.f32.mrb[14].mxu0 }
 0x10c   : > { %v5232_v61 = vadd.f32 %v7563_v60, %v7370_v55  ;;  %v5223_v62 = vpop.f32.mrb[15].mxu0 }
 0x10d   : > { %773 = vrot.lane.b32.xlu1 %v8169_v43, %s7991_s24  ;;  %757 = vrot.lane.b32.xlu0 %v8169_v43, %s7993_s28  ;;  %v5224_v63 = vadd.f32 %v7370_v55, %v5223_v62 }
 0x10e   : > { %v8196_v0 = vpack.c.bf16 %v5232_v61, %v5229_v57 }
 0x10f   : > { %v8198_v1 = vpack.c.bf16 %v5224_v63, %v5221_v59 }
 0x111   : > { %759 = vrot.lane.b32.xlu1 %v8183_v54, %s7993_s28  ;;  %743 = vrot.lane.b32.xlu0 %v8183_v54, %s7992_s27 }
 0x115   : > { %745 = vrot.lane.b32.xlu1 %v8181_v53, %s7992_s27  ;;  %775 = vrot.lane.b32.xlu0 %v8183_v54, %s7991_s24 }
 0x119   : > { %777 = vrot.lane.b32.xlu1 %v8181_v53, %s7991_s24  ;;  %761 = vrot.lane.b32.xlu0 %v8181_v53, %s7993_s28 }
 0x11d   : > { %763 = vrot.lane.b32.xlu1 %v8167_v42, %s7993_s28  ;;  %747 = vrot.lane.b32.xlu0 %v8167_v42, %s7992_s27 }
 0x121   : > { %749 = vrot.lane.b32.xlu1 %v8161_v40, %s7992_s27  ;;  %779 = vrot.lane.b32.xlu0 %v8167_v42, %s7991_s24 }
 0x125   : > { %781 = vrot.lane.b32.xlu1 %v8161_v40, %s7991_s24  ;;  %765 = vrot.lane.b32.xlu0 %v8161_v40, %s7993_s28 }
 0x129   : > { %5241 = vrot.lane.b32.xlu1 %v8196_v0, %s7992_s27  ;;  %5239 = vrot.lane.b32.xlu0 %v8198_v1, %s7992_s27 }
 0x12d   : > { %5243 = vrot.lane.b32.xlu1 %v8198_v1, %s7993_s28  ;;  %5247 = vrot.lane.b32.xlu0 %v8198_v1, %s7991_s24 }
 0x131   : > { %5249 = vrot.lane.b32.xlu1 %v8196_v0, %s7991_s24  ;;  %5245 = vrot.lane.b32.xlu0 %v8196_v0, %s7993_s28 }
 0x16b   : > { %v768_v12 = vpop.permute.xlu1 %767  ;;  %v736_v13 = vpop.permute.xlu0 %735 }
 0x16c   : > { %v785_v15 = vpack.i.b16 %v736_v13, %v8155_v24  ;;  %v788_v17 = vshrl.u32 %v736_v13, 16  ;;  %v889_v24 = vshrl.u32 %v8167_v42, 16  ;;  %v796_v30 = vshrl.u32 %v768_v12, 16 }
 0x16e   : > { %v789_v19 = vpack.i.b16 %v788_v17, %v787_v16  ;;  %v917_v20 = vcombine.high %v785_v15, %v8237_v11  ;;  %v924_v31 = vrot.slane %v785_v15, %v8239_v14 }
 0x16f   : > { %v738_v25 = vpop.permute.xlu1 %737  ;;  %v752_v26 = vpop.permute.xlu0 %751 }
 0x170   : > { %v983_v32 = vcombine.high %v789_v19, %v8237_v11  ;;  %v807_v33 = vpack.i.b16 %v738_v25, %v8153_v23  ;;  %v931_v34 = vrot.slane %v917_v20, %v8239_v14  ;;  %v810_v35 = vshrl.u32 %v738_v25, 16 }
 0x171   : > { %v793_v36 = vpack.i.b16 %v768_v12, %v752_v26  ;;  %v795_v37 = vshrl.u32 %v752_v26, 16  ;;  %v990_v38 = vrot.slane %v789_v19, %v8239_v14 }
 0x172   : > { %v997_v39 = vrot.slane %v983_v32, %v8239_v14  ;;  %v1049_v41 = vcombine.high %v807_v33, %v8237_v11  ;;  %v8260_v45 = vrot.slane %v807_v33, %v8239_v14  ;;  %v811_v46 = vpack.i.b16 %v810_v35, %v809_v21 }
 0x173   : > { %v797_v47 = vpack.i.b16 %v796_v30, %v795_v37  ;;  %v932_v48 = vcombine.high %v793_v36, %v8237_v11  ;;  %v939_v23 = vrot.slane %v793_v36, %v8239_v14  ;;  %v770_v49 = vpop.permute.xlu1 %769  ;;  %v754_v50 = vpop.permute.xlu0 %753 }
 0x174   : > { %v8265_v51 = vrot.slane %v1049_v41, %v8239_v14  ;;  %v818_v52 = vshrl.u32 %v770_v49, 16  ;;  %v815_v55 = vpack.i.b16 %v770_v49, %v754_v50  ;;  %v817_v56 = vshrl.u32 %v754_v50, 16 }
 0x175   : > { %v1115_v57 = vcombine.high %v811_v46, %v8237_v11  ;;  %v8269_v58 = vrot.slane %v811_v46, %v8239_v14  ;;  %v946_v59 = vrot.slane %v932_v48, %v8239_v14  ;;  %v947_v60 = vcombine.low %v924_v31, %v939_v23 }
 0x176   : > { %v948_v61 = vcombine.high %v924_v31, %v939_v23  ;;  %v998_v62 = vcombine.high %v797_v47, %v8237_v11  ;;  %v1005_v63 = vrot.slane %v797_v47, %v8239_v14  ;;  %v819_v2 = vpack.i.b16 %v818_v52, %v817_v56 }
 0x177   : > { %v8275_v3 = vrot.slane %v1115_v57, %v8239_v14  ;;  %v955_v5 = vrot.slane %v947_v60, %v8243_v18  ;;  %v963_v6 = vcombine.low %v931_v34, %v946_v59  ;;  %v964_v7 = vcombine.high %v931_v34, %v946_v59 }
 0x178   : > { %v962_v8 = vrot.slane %v948_v61, %v8243_v18  ;;  %v1012_v9 = vrot.slane %v998_v62, %v8239_v14  ;;  %v1013_v10 = vcombine.low %v990_v38, %v1005_v63  ;;  %v1014_v12 = vcombine.high %v990_v38, %v1005_v63 }
 0x179   : > { %v971_v13 = vrot.slane %v963_v6, %v8243_v18  ;;  %v978_v15 = vrot.slane %v964_v7, %v8243_v18  ;;  %v1064_v16 = vcombine.high %v815_v55, %v8237_v11  ;;  %v1071_v17 = vrot.slane %v815_v55, %v8239_v14 }
 0x17a   : > { %v1021_v19 = vrot.slane %v1013_v10, %v8243_v18  ;;  %v1028_v20 = vrot.slane %v1014_v12, %v8243_v18  ;;  %v1029_v21 = vcombine.low %v997_v39, %v1012_v9  ;;  %v1030_v25 = vcombine.high %v997_v39, %v1012_v9 }
 0x17b   : > { %v1973_v26 = vcombine.low %v955_v5, %v962_v8  ;;  %v7306_v30 = vcombine.high %v955_v5, %v962_v8  ;;  %v1989_v31 = vcombine.low %v971_v13, %v978_v15  ;;  %v7307_v32 = vcombine.high %v971_v13, %v978_v15 }
 0x17c   : > { %v1037_v33 = vrot.slane %v1029_v21, %v8243_v18  ;;  %v1044_v34 = vrot.slane %v1030_v25, %v8243_v18  ;;  %v2023_v35 = vcombine.low %v1021_v19, %v1028_v20  ;;  %v7308_v36 = vcombine.high %v1021_v19, %v1028_v20 }
 0x17d   : > { %v1980_v37 = vrot.slane %v1973_v26, %v8239_v14  ;;  %v1988_v38 = vrot.slane %v7306_v30, %v8239_v14  ;;  %v1996_v41 = vrot.slane %v1989_v31, %v8239_v14  ;;  %v2004_v46 = vrot.slane %v7307_v32, %v8239_v14 }
 0x17e   : > { %v2030_v39 = vrot.slane %v2023_v35, %v8239_v14  ;;  %v2038_v47 = vrot.slane %v7308_v36, %v8239_v14  ;;  %v2039_v48 = vcombine.low %v1037_v33, %v1044_v34  ;;  %v7309_v23 = vcombine.high %v1037_v33, %v1044_v34  ;;  %v8314_v33 = vpop.permute.xlu1 %755  ;;  %v740_v34 = vpop.permute.xlu0 %739 }
 0x17f   : > { %v2005_v49 = vcombine.low %v1980_v37, %v1988_v38  ;;  %v2013_v50 = vcombine.low %v1996_v41, %v2004_v46  ;;  %v1078_v52 = vrot.slane %v1064_v16, %v8239_v14  ;;  %v1079_v55 = vcombine.low %v8260_v45, %v1071_v17 }
 0x180   : > { %v2046_v56 = vrot.slane %v2039_v48, %v8239_v14  ;;  %v2054_v57 = vrot.slane %v7309_v23, %v8239_v14  ;;  %v2055_v59 = vcombine.low %v2030_v39, %v2038_v47  ;;  %v1080_v60 = vcombine.high %v8260_v45, %v1071_v17 }
 0x181   : > { %v2012_v61 = vrot.slane %v2005_v49, %v8243_v18  ;;  %v2020_v62 = vrot.slane %v2013_v50, %v8243_v18  ;;  %v1087_v63 = vrot.slane %v1079_v55, %v8243_v18  ;;  %v1095_v5 = vcombine.low %v8265_v51, %v1078_v52 }
 0x182   : > { %v2062_v6 = vrot.slane %v2055_v59, %v8243_v18  ;;  %v2063_v7 = vcombine.low %v2046_v56, %v2054_v57  ;;  %v1094_v8 = vrot.slane %v1080_v60, %v8243_v18  ;;  %v1096_v9 = vcombine.high %v8265_v51, %v1078_v52 }
 0x183   : > { %v2021_v10 = vcombine.low %v2012_v61, %v2020_v62  ;;  %v2022_v12 = vcombine.high %v2012_v61, %v2020_v62  ;;  %v1103_v13 = vrot.slane %v1095_v5, %v8243_v18  ;;  %v1130_v45 = vcombine.high %v819_v2, %v8237_v11  ;;  %v742_v5 = vpop.permute.xlu1 %741 }
 0x184   : > { %v2070_v15 = vrot.slane %v2063_v7, %v8243_v18  ;;  %v1110_v16 = vrot.slane %v1096_v9, %v8243_v18  ;;  %v1137_v17 = vrot.slane %v819_v2, %v8239_v14  ;;  %v2073_v19 = vcombine.low %v1087_v63, %v1094_v8 }
 0x185   : > { %v2777_v20 = vshrl.u32 %v2021_v10, 16  ;;  %v2785_v21 = vshrl.u32 %v2022_v12, 16  ;;  %v1144_v25 = vrot.slane %v1130_v45, %v8239_v14  ;;  %v7310_v26 = vcombine.high %v1087_v63, %v1094_v8 }
 0x186   : > { %v2071_v30 = vcombine.low %v2062_v6, %v2070_v15  ;;  %v2072_v51 = vcombine.high %v2062_v6, %v2070_v15  ;;  %v1145_v31 = vcombine.low %v8269_v58, %v1137_v17  ;;  %v1146_v32 = vcombine.high %v8269_v58, %v1137_v17  ;;  %v772_v6 = vpop.permute.xlu0 %771 }
 0x187   : > { %v1161_v35 = vcombine.low %v8275_v3, %v1144_v25  ;;  %v1162_v36 = vcombine.high %v8275_v3, %v1144_v25  ;;  %v2080_v2 = vrot.slane %v2073_v19, %v8239_v14  ;;  %v2088_v37 = vrot.slane %v7310_v26, %v8239_v14 }
 0x188   : > { %v2775_v38 = vpack.i.b16 %v2071_v30, %v2021_v10  ;;  %v2778_v41 = vshrl.u32 %v2071_v30, 16  ;;  %v2783_v46 = vpack.i.b16 %v2072_v51, %v2022_v12  ;;  %v2786_v39 = vshrl.u32 %v2072_v51, 16 }
 0x189   : > { %v1153_v47 = vrot.slane %v1145_v31, %v8243_v18  ;;  %v1160_v48 = vrot.slane %v1146_v32, %v8243_v18  ;;  %v1169_v58 = vrot.slane %v1161_v35, %v8243_v18  ;;  %v1176_v23 = vrot.slane %v1162_v36, %v8243_v18 }
 0x18a   : > { %v2779_v49 = vpack.i.b16 %v2778_v41, %v2777_v20  ;;  %v2787_v50 = vpack.i.b16 %v2786_v39, %v2785_v21  ;;  %2902 = vst.msk [vmem:[#allocation2] sm:$0xff] %vm2901_vm2, %v2775_v38  ;;  %2918 = vst.msk [vmem:[#allocation2 + $0x80] sm:$0xff] %vm2901_vm2, %v2783_v46  ;;  %v2089_v3 = vcombine.low %v1103_v13, %v1110_v16  ;;  %v833_v63 = vshrl.u32 %v8314_v33, 16 }
 0x18b   : > { %v7311_v52 = vcombine.high %v1103_v13, %v1110_v16  ;;  %v2105_v55 = vcombine.low %v2080_v2, %v2088_v37  ;;  %v2123_v56 = vcombine.low %v1153_v47, %v1160_v48  ;;  %v7312_v57 = vcombine.high %v1153_v47, %v1160_v48 }
 0x18c   : > { %v2139_v59 = vcombine.low %v1169_v58, %v1176_v23  ;;  %2910 = vst.msk [vmem:[#allocation2 + $0x40] sm:$0xff] %vm2901_vm2, %v2779_v49  ;;  %2926 = vst.msk [vmem:[#allocation2 + $0xc0] sm:$0xff] %vm2901_vm2, %v2787_v50  ;;  %v2096_v60 = vrot.slane %v2089_v3, %v8239_v14  ;;  %v7313_v62 = vcombine.high %v1169_v58, %v1176_v23  ;;  %v826_v15 = vshrl.u32 %v740_v34, 16  ;;  %v774_v50 = vpop.permute.xlu1 %773  ;;  %v758_v3 = vpop.permute.xlu0 %757 }
 0x18d   : > { %v2104_v61 = vrot.slane %v7311_v52, %v8239_v14  ;;  %v2112_v7 = vrot.slane %v2105_v55, %v8243_v18  ;;  %v2130_v8 = vrot.slane %v2123_v56, %v8239_v14  ;;  %v2138_v9 = vrot.slane %v7312_v57, %v8239_v14 }
 0x18e   : > { %v2146_v10 = vrot.slane %v2139_v59, %v8239_v14  ;;  %v2154_v13 = vrot.slane %v7313_v62, %v8239_v14  ;;  %v823_v45 = vpack.i.b16 %v740_v34, %v8171_v44  ;;  %v839_v17 = vpack.i.b16 %v742_v5, %v8169_v43 }
 0x18f   : > { %v2113_v12 = vcombine.low %v2096_v60, %v2104_v61  ;;  %v2155_v16 = vcombine.low %v2130_v8, %v2138_v9  ;;  %v842_v19 = vshrl.u32 %v742_v5, 16  ;;  %v831_v20 = vpack.i.b16 %v772_v6, %v8314_v33 }
 0x190   : > { %v2163_v25 = vcombine.low %v2146_v10, %v2154_v13  ;;  %v827_v26 = vpack.i.b16 %v826_v15, %v825_v27  ;;  %v1181_v30 = vcombine.high %v823_v45, %v8237_v11  ;;  %v1188_v31 = vrot.slane %v823_v45, %v8239_v14 }
 0x191   : > { %v2120_v21 = vrot.slane %v2113_v12, %v8243_v18  ;;  %v2162_v51 = vrot.slane %v2155_v16, %v8243_v18  ;;  %v843_v32 = vpack.i.b16 %v842_v19, %v841_v28  ;;  %v1313_v34 = vcombine.high %v839_v17, %v8237_v11  ;;  %v8348_v35 = vld [vmem:[#allocation2] sm:$0xff] }
 0x192   : > { %v2170_v2 = vrot.slane %v2163_v25, %v8243_v18  ;;  %v1195_v44 = vrot.slane %v1181_v30, %v8239_v14  ;;  %7734 = vmatprep.subr.msk.bf16.mxu1 %vm2901_vm2, %v8348_v35  ;;  %v1247_v27 = vcombine.high %v827_v26, %v8237_v11  ;;  %v1254_v37 = vrot.slane %v827_v26, %v8239_v14 }
 0x193   : > { %v2121_v33 = vcombine.low %v2112_v7, %v2120_v21  ;;  %v2122_v36 = vcombine.high %v2112_v7, %v2120_v21  ;;  %v8357_v43 = vrot.slane %v839_v17, %v8239_v14  ;;  %v8360_v28 = vrot.slane %v1313_v34, %v8239_v14  ;;  %v8362_v38 = vld [vmem:[#allocation2 + $0x40] sm:$0xff] }
 0x194   : > { %v2171_v41 = vcombine.low %v2162_v51, %v2170_v2  ;;  %v2172_v46 = vcombine.high %v2162_v51, %v2170_v2  ;;  %7742 = vmatprep.subr.msk.bf16.mxu0 %vm2901_vm2, %v8362_v38  ;;  %v1261_v48 = vrot.slane %v1247_v27, %v8239_v14  ;;  %v1379_v58 = vcombine.high %v843_v32, %v8237_v11 }
 0x195   : > { %v2793_v39 = vshrl.u32 %v2121_v33, 16  ;;  %v2801_v47 = vshrl.u32 %v2122_v36, 16  ;;  %v8369_v23 = vrot.slane %v843_v32, %v8239_v14  ;;  %v834_v49 = vshrl.u32 %v772_v6, 16 }
 0x196   : > { %v2791_v52 = vpack.i.b16 %v2171_v41, %v2121_v33  ;;  %v2794_v55 = vshrl.u32 %v2171_v41, 16  ;;  %v2799_v56 = vpack.i.b16 %v2172_v46, %v2122_v36  ;;  %v2802_v57 = vshrl.u32 %v2172_v46, 16 }
 0x197   : > { %v8372_v59 = vrot.slane %v1379_v58, %v8239_v14  ;;  %v835_v60 = vpack.i.b16 %v834_v49, %v833_v63  ;;  %v1196_v61 = vcombine.high %v831_v20, %v8237_v11  ;;  %v1203_v62 = vrot.slane %v831_v20, %v8239_v14 }
 0x198   : > { %v2795_v5 = vpack.i.b16 %v2794_v55, %v2793_v39  ;;  %v2803_v7 = vpack.i.b16 %v2802_v57, %v2801_v47  ;;  %2903 = vst.msk [vmem:[#allocation2 + $0x8] sm:$0xff] %vm2901_vm2, %v2791_v52  ;;  %2919 = vst.msk [vmem:[#allocation2 + $0x88] sm:$0xff] %vm2901_vm2, %v2799_v56  ;;  %v850_v6 = vshrl.u32 %v774_v50, 16  ;;  %v847_v8 = vpack.i.b16 %v774_v50, %v758_v3 }
 0x199   : > { %v1210_v9 = vrot.slane %v1196_v61, %v8239_v14  ;;  %v1211_v10 = vcombine.low %v1188_v31, %v1203_v62  ;;  %v1212_v12 = vcombine.high %v1188_v31, %v1203_v62  ;;  %v1262_v13 = vcombine.high %v835_v60, %v8237_v11 }
 0x19a   : > { %2911 = vst.msk [vmem:[#allocation2 + $0x48] sm:$0xff] %vm2901_vm2, %v2795_v5  ;;  %2927 = vst.msk [vmem:[#allocation2 + $0xc8] sm:$0xff] %vm2901_vm2, %v2803_v7  ;;  %v1269_v63 = vrot.slane %v835_v60, %v8239_v14  ;;  %v849_v45 = vshrl.u32 %v758_v3, 16  ;;  %v1328_v15 = vcombine.high %v847_v8, %v8237_v11  ;;  %v1335_v16 = vrot.slane %v847_v8, %v8239_v14 }
 0x19b   : > { %v1219_v17 = vrot.slane %v1211_v10, %v8243_v18  ;;  %v1226_v19 = vrot.slane %v1212_v12, %v8243_v18  ;;  %v1227_v20 = vcombine.low %v1195_v44, %v1210_v9  ;;  %v1228_v21 = vcombine.high %v1195_v44, %v1210_v9 }
 0x19c   : > { %v1276_v25 = vrot.slane %v1262_v13, %v8239_v14  ;;  %v1277_v26 = vcombine.low %v1254_v37, %v1269_v63  ;;  %v1278_v30 = vcombine.high %v1254_v37, %v1269_v63  ;;  %v851_v51 = vpack.i.b16 %v850_v6, %v849_v45 }
 0x19d   : > { %v1235_v31 = vrot.slane %v1227_v20, %v8243_v18  ;;  %v1242_v32 = vrot.slane %v1228_v21, %v8243_v18  ;;  %v2173_v34 = vcombine.low %v1219_v17, %v1226_v19  ;;  %v7314_v33 = vcombine.high %v1219_v17, %v1226_v19 }
 0x19e   : > { %v1285_v36 = vrot.slane %v1277_v26, %v8243_v18  ;;  %v1292_v2 = vrot.slane %v1278_v30, %v8243_v18  ;;  %v1293_v27 = vcombine.low %v1261_v48, %v1276_v25  ;;  %v1294_v41 = vcombine.high %v1261_v48, %v1276_v25 }
 0x19f   : > { %v2180_v46 = vrot.slane %v2173_v34, %v8239_v14  ;;  %v2188_v44 = vrot.slane %v7314_v33, %v8239_v14  ;;  %v2189_v39 = vcombine.low %v1235_v31, %v1242_v32  ;;  %v7315_v47 = vcombine.high %v1235_v31, %v1242_v32 }
 0x1a0   : > { %v1301_v37 = vrot.slane %v1293_v27, %v8243_v18  ;;  %v1308_v58 = vrot.slane %v1294_v41, %v8243_v18  ;;  %v2223_v49 = vcombine.low %v1285_v36, %v1292_v2  ;;  %v7316_v50 = vcombine.high %v1285_v36, %v1292_v2  ;;  %v8420_v27 = vpop.permute.xlu1 %759 }
 0x1a1   : > { %v2196_v3 = vrot.slane %v2189_v39, %v8239_v14  ;;  %v2204_v52 = vrot.slane %v7315_v47, %v8239_v14  ;;  %v2205_v55 = vcombine.low %v2180_v46, %v2188_v44  ;;  %v1342_v56 = vrot.slane %v1328_v15, %v8239_v14 }
 0x1a2   : > { %v2230_v48 = vrot.slane %v2223_v49, %v8239_v14  ;;  %v2238_v57 = vrot.slane %v7316_v50, %v8239_v14  ;;  %v2239_v60 = vcombine.low %v1301_v37, %v1308_v58  ;;  %v7317_v61 = vcombine.high %v1301_v37, %v1308_v58 }
 0x1a3   : > { %v2212_v62 = vrot.slane %v2205_v55, %v8243_v18  ;;  %v2213_v5 = vcombine.low %v2196_v3, %v2204_v52  ;;  %v1343_v7 = vcombine.low %v8357_v43, %v1335_v16  ;;  %v1344_v6 = vcombine.high %v8357_v43, %v1335_v16  ;;  %v744_v52 = vpop.permute.xlu0 %743 }
 0x1a4   : > { %v2246_v8 = vrot.slane %v2239_v60, %v8239_v14  ;;  %v2254_v9 = vrot.slane %v7317_v61, %v8239_v14  ;;  %v2255_v10 = vcombine.low %v2230_v48, %v2238_v57  ;;  %v1359_v12 = vcombine.low %v8360_v28, %v1342_v56 }
 0x1a5   : > { %v2220_v13 = vrot.slane %v2213_v5, %v8243_v18  ;;  %v1351_v63 = vrot.slane %v1343_v7, %v8243_v18  ;;  %v1358_v45 = vrot.slane %v1344_v6, %v8243_v18  ;;  %v1360_v15 = vcombine.high %v8360_v28, %v1342_v56 }
 0x1a6   : > { %v2262_v17 = vrot.slane %v2255_v10, %v8243_v18  ;;  %v2263_v19 = vcombine.low %v2246_v8, %v2254_v9  ;;  %v1367_v43 = vrot.slane %v1359_v12, %v8243_v18  ;;  %v1394_v16 = vcombine.high %v851_v51, %v8237_v11  ;;  %v746_v9 = vpop.permute.xlu1 %745 }
 0x1a7   : > { %v2221_v20 = vcombine.low %v2212_v62, %v2220_v13  ;;  %v2222_v21 = vcombine.high %v2212_v62, %v2220_v13  ;;  %v1374_v25 = vrot.slane %v1360_v15, %v8243_v18  ;;  %v1401_v26 = vrot.slane %v851_v51, %v8239_v14 }
 0x1a8   : > { %v2270_v30 = vrot.slane %v2263_v19, %v8243_v18  ;;  %v1408_v31 = vrot.slane %v1394_v16, %v8239_v14  ;;  %v2273_v32 = vcombine.low %v1351_v63, %v1358_v45  ;;  %v7318_v34 = vcombine.high %v1351_v63, %v1358_v45 }
 0x1a9   : > { %v2809_v28 = vshrl.u32 %v2221_v20, 16  ;;  %v2817_v33 = vshrl.u32 %v2222_v21, 16  ;;  %v1409_v36 = vcombine.low %v8369_v23, %v1401_v26  ;;  %v1410_v2 = vcombine.high %v8369_v23, %v1401_v26 }
 0x1aa   : > { %v2271_v41 = vcombine.low %v2262_v17, %v2270_v30  ;;  %v2272_v46 = vcombine.high %v2262_v17, %v2270_v30  ;;  %v1425_v44 = vcombine.low %v8372_v59, %v1408_v31  ;;  %v1426_v51 = vcombine.high %v8372_v59, %v1408_v31 }
 0x1ab   : > { %v1417_v39 = vrot.slane %v1409_v36, %v8243_v18  ;;  %v1424_v47 = vrot.slane %v1410_v2, %v8243_v18  ;;  %v2280_v37 = vrot.slane %v2273_v32, %v8239_v14  ;;  %v2288_v58 = vrot.slane %v7318_v34, %v8239_v14 }
 0x1ac   : > { %v2807_v49 = vpack.i.b16 %v2271_v41, %v2221_v20  ;;  %v2810_v50 = vshrl.u32 %v2271_v41, 16  ;;  %v2815_v3 = vpack.i.b16 %v2272_v46, %v2222_v21  ;;  %v2818_v23 = vshrl.u32 %v2272_v46, 16 }
 0x1ad   : > { %v1433_v55 = vrot.slane %v1425_v44, %v8243_v18  ;;  %v1440_v56 = vrot.slane %v1426_v51, %v8243_v18  ;;  %v2289_v48 = vcombine.low %v1367_v43, %v1374_v25  ;;  %v7319_v57 = vcombine.high %v1367_v43, %v1374_v25  ;;  %v776_v25 = vpop.permute.xlu0 %775  ;;  %v8452_v44 = vpop.f32.mrb[4].mxu1 }
 0x1ae   : > { %v2811_v59 = vpack.i.b16 %v2810_v50, %v2809_v28  ;;  %v2819_v60 = vpack.i.b16 %v2818_v23, %v2817_v33  ;;  %2904 = vst.msk [vmem:[#allocation2 + $0x10] sm:$0xff] %vm2901_vm2, %v2807_v49  ;;  %2920 = vst.msk [vmem:[#allocation2 + $0x90] sm:$0xff] %vm2901_vm2, %v2815_v3  ;;  %v2305_v61 = vcombine.low %v2280_v37, %v2288_v58  ;;  %v857_v63 = vshrl.u32 %v8183_v54, 16 }
 0x1af   : > { %v2323_v62 = vcombine.low %v1417_v39, %v1424_v47  ;;  %v2296_v5 = vrot.slane %v2289_v48, %v8239_v14  ;;  %v2304_v7 = vrot.slane %v7319_v57, %v8239_v14  ;;  %v7320_v6 = vcombine.high %v1417_v39, %v1424_v47 }
 0x1b0   : > { %v2339_v8 = vcombine.low %v1433_v55, %v1440_v56  ;;  %2912 = vst.msk [vmem:[#allocation2 + $0x50] sm:$0xff] %vm2901_vm2, %v2811_v59  ;;  %2928 = vst.msk [vmem:[#allocation2 + $0xd0] sm:$0xff] %vm2901_vm2, %v2819_v60  ;;  %v2312_v10 = vrot.slane %v2305_v61, %v8243_v18  ;;  %v7321_v13 = vcombine.high %v1433_v55, %v1440_v56  ;;  %v858_v16 = vshrl.u32 %v744_v52, 16 }
 0x1b1   : > { %v2330_v12 = vrot.slane %v2323_v62, %v8239_v14  ;;  %v2313_v45 = vcombine.low %v2296_v5, %v2304_v7  ;;  %v2338_v15 = vrot.slane %v7320_v6, %v8239_v14  ;;  %v855_v19 = vpack.i.b16 %v744_v52, %v8183_v54  ;;  %v762_v57 = vpop.permute.xlu0 %761 }
 0x1b2   : > { %v2346_v17 = vrot.slane %v2339_v8, %v8239_v14  ;;  %v2354_v43 = vrot.slane %v7321_v13, %v8239_v14  ;;  %v871_v20 = vpack.i.b16 %v746_v9, %v8181_v53  ;;  %v874_v21 = vshrl.u32 %v746_v9, 16  ;;  %v778_v53 = vpop.permute.xlu1 %777 }
 0x1b3   : > { %v2320_v26 = vrot.slane %v2313_v45, %v8243_v18  ;;  %v2355_v30 = vcombine.low %v2330_v12, %v2338_v15  ;;  %v865_v31 = vshrl.u32 %v8420_v27, 16  ;;  %v1445_v32 = vcombine.high %v855_v19, %v8237_v11 }
 0x1b4   : > { %v2363_v34 = vcombine.low %v2346_v17, %v2354_v43  ;;  %v859_v28 = vpack.i.b16 %v858_v16, %v857_v63  ;;  %v875_v33 = vpack.i.b16 %v874_v21, %v873_v29  ;;  %v1577_v54 = vcombine.high %v871_v20, %v8237_v11  ;;  %v8458_v29 = vpop.f32.mrb[5].mxu1 }
 0x1b5   : > { %v2321_v36 = vcombine.low %v2312_v10, %v2320_v26  ;;  %v2322_v2 = vcombine.high %v2312_v10, %v2320_v26  ;;  %v2362_v41 = vrot.slane %v2355_v30, %v8243_v18  ;;  %v1452_v46 = vrot.slane %v855_v19, %v8239_v14  ;;  %v8466_v23 = vpop.f32.mrb[6].mxu1 }
 0x1b6   : > { %v2370_v51 = vrot.slane %v2363_v34, %v8243_v18  ;;  %v1459_v39 = vrot.slane %v1445_v32, %v8239_v14  ;;  %v1511_v47 = vcombine.high %v859_v28, %v8237_v11  ;;  %v1518_v37 = vrot.slane %v859_v28, %v8239_v14  ;;  %v8470_v59 = vpop.f32.mrb[7].mxu1 }
 0x1b7   : > { %v2825_v58 = vshrl.u32 %v2321_v36, 16  ;;  %v2833_v49 = vshrl.u32 %v2322_v2, 16  ;;  %v8461_v50 = vrot.slane %v871_v20, %v8239_v14  ;;  %v8464_v3 = vrot.slane %v1577_v54, %v8239_v14 }
 0x1b8   : > { %v2371_v52 = vcombine.low %v2362_v41, %v2370_v51  ;;  %v2372_v55 = vcombine.high %v2362_v41, %v2370_v51  ;;  %v1525_v56 = vrot.slane %v1511_v47, %v8239_v14  ;;  %v1643_v48 = vcombine.high %v875_v33, %v8237_v11 }
 0x1b9   : > { %v8473_v60 = vrot.slane %v875_v33, %v8239_v14  ;;  %v863_v61 = vpack.i.b16 %v776_v25, %v8420_v27  ;;  %v866_v62 = vshrl.u32 %v776_v25, 16  ;;  %v882_v5 = vshrl.u32 %v778_v53, 16 }
 0x1ba   : > { %v2823_v7 = vpack.i.b16 %v2371_v52, %v2321_v36  ;;  %v2826_v6 = vshrl.u32 %v2371_v52, 16  ;;  %v2831_v8 = vpack.i.b16 %v2372_v55, %v2322_v2  ;;  %v2834_v9 = vshrl.u32 %v2372_v55, 16 }
 0x1bb   : > { %v867_v10 = vpack.i.b16 %v866_v62, %v865_v31  ;;  %v1460_v12 = vcombine.high %v863_v61, %v8237_v11  ;;  %v1467_v13 = vrot.slane %v863_v61, %v8239_v14  ;;  %v879_v63 = vpack.i.b16 %v778_v53, %v762_v57  ;;  %v8496_v53 = vpop.f32.mrb[8].mxu1 }
 0x1bc   : > { %v2827_v45 = vpack.i.b16 %v2826_v6, %v2825_v58  ;;  %v2835_v15 = vpack.i.b16 %v2834_v9, %v2833_v49  ;;  %2905 = vst.msk [vmem:[#allocation2 + $0x18] sm:$0xff] %vm2901_vm2, %v2823_v7  ;;  %2921 = vst.msk [vmem:[#allocation2 + $0x98] sm:$0xff] %vm2901_vm2, %v2831_v8  ;;  %v8481_v27 = vrot.slane %v1643_v48, %v8239_v14  ;;  %v881_v17 = vshrl.u32 %v762_v57, 16 }
 0x1bd   : > { %v1474_v19 = vrot.slane %v1460_v12, %v8239_v14  ;;  %v1475_v43 = vcombine.low %v1452_v46, %v1467_v13  ;;  %v1476_v16 = vcombine.high %v1452_v46, %v1467_v13  ;;  %v1526_v20 = vcombine.high %v867_v10, %v8237_v11 }
 0x1be   : > { %2913 = vst.msk [vmem:[#allocation2 + $0x58] sm:$0xff] %vm2901_vm2, %v2827_v45  ;;  %2929 = vst.msk [vmem:[#allocation2 + $0xd8] sm:$0xff] %vm2901_vm2, %v2835_v15  ;;  %v1533_v21 = vrot.slane %v867_v10, %v8239_v14  ;;  %v883_v25 = vpack.i.b16 %v882_v5, %v881_v17  ;;  %v1592_v26 = vcombine.high %v879_v63, %v8237_v11  ;;  %v8509_v45 = vpop.f32.mrb[9].mxu1 }
 0x1bf   : > { %v1599_v30 = vrot.slane %v879_v63, %v8239_v14  ;;  %v1483_v31 = vrot.slane %v1475_v43, %v8243_v18  ;;  %v1490_v32 = vrot.slane %v1476_v16, %v8243_v18  ;;  %v1491_v34 = vcombine.low %v1459_v39, %v1474_v19  ;;  %v8514_v16 = vpop.f32.mrb[10].mxu1 }
 0x1c0   : > { %v1492_v28 = vcombine.high %v1459_v39, %v1474_v19  ;;  %v1540_v33 = vrot.slane %v1526_v20, %v8239_v14  ;;  %v1541_v54 = vcombine.low %v1518_v37, %v1533_v21  ;;  %v1542_v36 = vcombine.high %v1518_v37, %v1533_v21 }
 0x1c1   : > { %v1606_v2 = vrot.slane %v1592_v26, %v8239_v14  ;;  %v1499_v41 = vrot.slane %v1491_v34, %v8243_v18  ;;  %v2373_v51 = vcombine.low %v1483_v31, %v1490_v32  ;;  %v7322_v47 = vcombine.high %v1483_v31, %v1490_v32  ;;  %v8519_v32 = vpop.f32.mrb[11].mxu1 }
 0x1c2   : > { %v1506_v46 = vrot.slane %v1492_v28, %v8243_v18  ;;  %v1549_v58 = vrot.slane %v1541_v54, %v8243_v18  ;;  %v1556_v49 = vrot.slane %v1542_v36, %v8243_v18  ;;  %v1557_v52 = vcombine.low %v1525_v56, %v1540_v33 }
 0x1c3   : > { %v1558_v39 = vcombine.high %v1525_v56, %v1540_v33  ;;  %v2380_v55 = vrot.slane %v2373_v51, %v8239_v14  ;;  %v2388_v37 = vrot.slane %v7322_v47, %v8239_v14  ;;  %v1607_v10 = vcombine.low %v8461_v50, %v1599_v30 }
 0x1c4   : > { %v2389_v48 = vcombine.low %v1499_v41, %v1506_v46  ;;  %v7323_v57 = vcombine.high %v1499_v41, %v1506_v46  ;;  %v1565_v61 = vrot.slane %v1557_v52, %v8243_v18  ;;  %v2423_v5 = vcombine.low %v1549_v58, %v1556_v49 }
 0x1c5   : > { %v1572_v62 = vrot.slane %v1558_v39, %v8243_v18  ;;  %v7324_v7 = vcombine.high %v1549_v58, %v1556_v49  ;;  %v2405_v9 = vcombine.low %v2380_v55, %v2388_v37  ;;  %v1608_v19 = vcombine.high %v8461_v50, %v1599_v30 }
 0x1c6   : > { %v2396_v6 = vrot.slane %v2389_v48, %v8239_v14  ;;  %v2404_v8 = vrot.slane %v7323_v57, %v8239_v14  ;;  %v2430_v56 = vrot.slane %v2423_v5, %v8239_v14  ;;  %v1615_v43 = vrot.slane %v1607_v10, %v8243_v18  ;;  %v8537_v5 = vpop.permute.xlu1 %763 }
 0x1c7   : > { %v2438_v12 = vrot.slane %v7324_v7, %v8239_v14  ;;  %v2439_v13 = vcombine.low %v1565_v61, %v1572_v62  ;;  %v7325_v63 = vcombine.high %v1565_v61, %v1572_v62  ;;  %v2412_v15 = vrot.slane %v2405_v9, %v8243_v18 }
 0x1c8   : > { %v2413_v17 = vcombine.low %v2396_v6, %v2404_v8  ;;  %v1623_v31 = vcombine.low %v8464_v3, %v1606_v2  ;;  %v1622_v28 = vrot.slane %v1608_v19, %v8243_v18  ;;  %v1624_v33 = vcombine.high %v8464_v3, %v1606_v2  ;;  %v8543_v19 = vpop.f32.mrb[12].mxu1 }
 0x1c9   : > { %v2446_v20 = vrot.slane %v2439_v13, %v8239_v14  ;;  %v2454_v21 = vrot.slane %v7325_v63, %v8239_v14  ;;  %v2455_v26 = vcombine.low %v2430_v56, %v2438_v12  ;;  %v1658_v50 = vcombine.high %v883_v25, %v8237_v11 }
 0x1ca   : > { %v2420_v34 = vrot.slane %v2413_v17, %v8243_v18  ;;  %v1631_v36 = vrot.slane %v1623_v31, %v8243_v18  ;;  %v1665_v41 = vrot.slane %v883_v25, %v8239_v14  ;;  %v1638_v47 = vrot.slane %v1624_v33, %v8243_v18  ;;  %v8547_v31 = vpop.f32.mrb[13].mxu1 }
 0x1cb   : > { %v2462_v30 = vrot.slane %v2455_v26, %v8243_v18  ;;  %v2463_v54 = vcombine.low %v2446_v20, %v2454_v21  ;;  %v1672_v58 = vrot.slane %v1658_v50, %v8239_v14  ;;  %v2473_v2 = vcombine.low %v1615_v43, %v1622_v28 }
 0x1cc   : > { %v2421_v46 = vcombine.low %v2412_v15, %v2420_v34  ;;  %v2422_v51 = vcombine.high %v2412_v15, %v2420_v34  ;;  %v1673_v52 = vcombine.low %v8473_v60, %v1665_v41  ;;  %v1674_v3 = vcombine.high %v8473_v60, %v1665_v41 }
 0x1cd   : > { %v2470_v49 = vrot.slane %v2463_v54, %v8243_v18  ;;  %v1689_v37 = vcombine.low %v8481_v27, %v1672_v58  ;;  %v1690_v48 = vcombine.high %v8481_v27, %v1672_v58  ;;  %v2480_v60 = vrot.slane %v2473_v2, %v8239_v14  ;;  %v748_v27 = vpop.permute.xlu0 %747 }
 0x1ce   : > { %v2841_v39 = vshrl.u32 %v2421_v46, 16  ;;  %v2849_v55 = vshrl.u32 %v2422_v51, 16  ;;  %v1681_v61 = vrot.slane %v1673_v52, %v8243_v18  ;;  %v1688_v62 = vrot.slane %v1674_v3, %v8243_v18 }
 0x1cf   : > { %v2471_v25 = vcombine.low %v2462_v30, %v2470_v49  ;;  %v2472_v57 = vcombine.high %v2462_v30, %v2470_v49  ;;  %v1697_v7 = vrot.slane %v1689_v37, %v8243_v18  ;;  %v1704_v6 = vrot.slane %v1690_v48, %v8243_v18  ;;  %v8552_v30 = vpop.f32.mrb[14].mxu1 }
 0x1d0   : > { %v7326_v8 = vcombine.high %v1615_v43, %v1622_v28  ;;  %v2489_v63 = vcombine.low %v1631_v36, %v1638_v47  ;;  %v7327_v15 = vcombine.high %v1631_v36, %v1638_v47  ;;  %v2523_v17 = vcombine.low %v1681_v61, %v1688_v62  ;;  %v8559_v47 = vld [vmem:[#allocation2 + $0x8] sm:$0xff] }
 0x1d1   : > { %v2839_v9 = vpack.i.b16 %v2471_v25, %v2421_v46  ;;  %v2842_v10 = vshrl.u32 %v2471_v25, 16  ;;  %v2847_v56 = vpack.i.b16 %v2472_v57, %v2422_v51  ;;  %v2850_v12 = vshrl.u32 %v2472_v57, 16  ;;  %v750_v51 = vpop.permute.xlu1 %749  ;;  %v780_v48 = vpop.permute.xlu0 %779 }
 0x1d2   : > { %v2488_v13 = vrot.slane %v7326_v8, %v8239_v14  ;;  %v7328_v26 = vcombine.high %v1681_v61, %v1688_v62  ;;  %v2539_v43 = vcombine.low %v1697_v7, %v1704_v6  ;;  %v2496_v34 = vrot.slane %v2489_v63, %v8239_v14  ;;  %v8576_v8 = vpop.f32.mrb[15].mxu1 }
 0x1d3   : > { %v2843_v20 = vpack.i.b16 %v2842_v10, %v2841_v39  ;;  %v2851_v21 = vpack.i.b16 %v2850_v12, %v2849_v55  ;;  %2906 = vst.msk [vmem:[#allocation2 + $0x20] sm:$0xff] %vm2901_vm2, %v2839_v9  ;;  %2922 = vst.msk [vmem:[#allocation2 + $0xa0] sm:$0xff] %vm2901_vm2, %v2847_v56  ;;  %v2504_v28 = vrot.slane %v7327_v15, %v8239_v14  ;;  %v897_v49 = vshrl.u32 %v8537_v5, 16 }
 0x1d4   : > { %v2505_v33 = vcombine.low %v2480_v60, %v2488_v13  ;;  %v2530_v50 = vrot.slane %v2523_v17, %v8239_v14  ;;  %v2538_v54 = vrot.slane %v7328_v26, %v8239_v14  ;;  %v2546_v36 = vrot.slane %v2539_v43, %v8239_v14 }
 0x1d5   : > { %2914 = vst.msk [vmem:[#allocation2 + $0x60] sm:$0xff] %vm2901_vm2, %v2843_v20  ;;  %2930 = vst.msk [vmem:[#allocation2 + $0xe0] sm:$0xff] %vm2901_vm2, %v2851_v21  ;;  %v7329_v41 = vcombine.high %v1697_v7, %v1704_v6  ;;  %v887_v46 = vpack.i.b16 %v748_v27, %v8167_v42  ;;  %v2513_v58 = vcombine.low %v2496_v34, %v2504_v28  ;;  %v890_v52 = vshrl.u32 %v748_v27, 16 }
 0x1d6   : > { %v5849_v3 = vsel %vm2901_vm2, %v8348_v35, 0  ;;  %v2512_v2 = vrot.slane %v2505_v33, %v8243_v18  ;;  %v2555_v55 = vcombine.low %v2530_v50, %v2538_v54  ;;  %v903_v61 = vpack.i.b16 %v750_v51, %v8161_v40 }
 0x1d7   : > { %v2554_v39 = vrot.slane %v7329_v41, %v8239_v14  ;;  %v1709_v37 = vcombine.high %v887_v46, %v8237_v11  ;;  %7565 = vmatpush3.bf16.xpose.msra.mxu1 %v5849_v3  ;;  %v2520_v25 = vrot.slane %v2513_v58, %v8243_v18  ;;  %v891_v57 = vpack.i.b16 %v890_v52, %v889_v24 }
 0x1d8   : > { %v906_v62 = vshrl.u32 %v750_v51, 16  ;;  %7735 = vmatprep.subr.msk.bf16.mxu1 %vm2901_vm2, %v8559_v47  ;;  %v2562_v35 = vrot.slane %v2555_v55, %v8243_v18  ;;  %v1716_v6 = vrot.slane %v887_v46, %v8239_v14  ;;  %v895_v24 = vpack.i.b16 %v780_v48, %v8537_v5 }
 0x1d9   : > { %v2563_v7 = vcombine.low %v2546_v36, %v2554_v39  ;;  %v1723_v60 = vrot.slane %v1709_v37, %v8239_v14  ;;  %v2521_v9 = vcombine.low %v2512_v2, %v2520_v25  ;;  %v2522_v10 = vcombine.high %v2512_v2, %v2520_v25  ;;  %v5786_v25 = vld [vmem:[#allocation2 + $0x48] sm:$0xff] }
 0x1da   : > { %v1775_v42 = vcombine.high %v891_v57, %v8237_v11  ;;  %v1782_v12 = vrot.slane %v891_v57, %v8239_v14  ;;  %v8584_v27 = vpack.i.b16 %v906_v62, %v905_v22  ;;  %v1841_v13 = vcombine.high %v903_v61, %v8237_v11 }
 0x1db   : > { %v2570_v56 = vrot.slane %v2563_v7, %v8243_v18  ;;  %v2857_v63 = vshrl.u32 %v2521_v9, 16  ;;  %v2865_v15 = vshrl.u32 %v2522_v10, 16  ;;  %v8588_v17 = vrot.slane %v903_v61, %v8239_v14 }
 0x1dc   : > { %v898_v20 = vshrl.u32 %v780_v48, 16  ;;  %v1789_v5 = vrot.slane %v1775_v42, %v8239_v14  ;;  %v8592_v43 = vrot.slane %v1841_v13, %v8239_v14  ;;  %v1907_v40 = vcombine.high %v8584_v27, %v8237_v11  ;;  %v782_v13 = vpop.permute.xlu1 %781 }
 0x1dd   : > { %v2571_v21 = vcombine.low %v2562_v35, %v2570_v56  ;;  %v2572_v26 = vcombine.high %v2562_v35, %v2570_v56  ;;  %v1724_v34 = vcombine.high %v895_v24, %v8237_v11  ;;  %v1731_v28 = vrot.slane %v895_v24, %v8239_v14 }
 0x1de   : > { %v899_v22 = vpack.i.b16 %v898_v20, %v897_v49  ;;  %v8600_v41 = vrot.slane %v8584_v27, %v8239_v14  ;;  %v5928_v35 = vsel %vm2901_vm2, %v8362_v38, 0 }
 0x1df   : > { %v2855_v33 = vpack.i.b16 %v2571_v21, %v2521_v9  ;;  %v2858_v50 = vshrl.u32 %v2571_v21, 16  ;;  %v2863_v54 = vpack.i.b16 %v2572_v26, %v2522_v10  ;;  %v2866_v36 = vshrl.u32 %v2572_v26, 16  ;;  %7585 = vmatpush3.bf16.xpose.msra.mxu0 %v5928_v35 }
 0x1e0   : > { %v1738_v46 = vrot.slane %v1724_v34, %v8239_v14  ;;  %v1739_v51 = vcombine.low %v1716_v6, %v1731_v28  ;;  %v1740_v58 = vcombine.high %v1716_v6, %v1731_v28  ;;  %v1790_v49 = vcombine.high %v899_v22, %v8237_v11  ;;  %7743 = vmatprep.subr.msk.bf16.mxu0 %vm2901_vm2, %v5786_v25  ;;  %v766_v34 = vpop.permute.xlu0 %765 }
 0x1e1   : > { %v2859_v52 = vpack.i.b16 %v2858_v50, %v2857_v63  ;;  %v2867_v3 = vpack.i.b16 %v2866_v36, %v2865_v15  ;;  %2907 = vst.msk [vmem:[#allocation2 + $0x28] sm:$0xff] %vm2901_vm2, %v2855_v33  ;;  %2923 = vst.msk [vmem:[#allocation2 + $0xa8] sm:$0xff] %vm2901_vm2, %v2863_v54  ;;  %v1797_v2 = vrot.slane %v899_v22, %v8239_v14  ;;  %v914_v50 = vshrl.u32 %v782_v13, 16 }
 0x1e2   : > { %v1747_v39 = vrot.slane %v1739_v51, %v8243_v18  ;;  %v1754_v55 = vrot.slane %v1740_v58, %v8243_v18  ;;  %v1755_v37 = vcombine.low %v1723_v60, %v1738_v46  ;;  %v1756_v48 = vcombine.high %v1723_v60, %v1738_v46 }
 0x1e3   : > { %2915 = vst.msk [vmem:[#allocation2 + $0x68] sm:$0xff] %vm2901_vm2, %v2859_v52  ;;  %2931 = vst.msk [vmem:[#allocation2 + $0xe8] sm:$0xff] %vm2901_vm2, %v2867_v3  ;;  %v1804_v57 = vrot.slane %v1790_v49, %v8239_v14  ;;  %v1805_v61 = vcombine.low %v1782_v12, %v1797_v2  ;;  %v1806_v62 = vcombine.high %v1782_v12, %v1797_v2  ;;  %v913_v49 = vshrl.u32 %v766_v34, 16  ;;  %v8628_v2 = vld [vmem:[#allocation2 + $0x10] sm:$0xff] }
 0x1e4   : > { %v1763_v7 = vrot.slane %v1755_v37, %v8243_v18  ;;  %v1770_v6 = vrot.slane %v1756_v48, %v8243_v18  ;;  %v2573_v9 = vcombine.low %v1747_v39, %v1754_v55  ;;  %v7330_v10 = vcombine.high %v1747_v39, %v1754_v55  ;;  %v8630_v39 = vpop.f32.mrb[16].mxu1 }
 0x1e5   : > { %v1813_v60 = vrot.slane %v1805_v61, %v8243_v18  ;;  %v1820_v42 = vrot.slane %v1806_v62, %v8243_v18  ;;  %v1821_v24 = vcombine.low %v1789_v5, %v1804_v57  ;;  %v1822_v56 = vcombine.high %v1789_v5, %v1804_v57 }
 0x1e6   : > { %v2580_v12 = vrot.slane %v2573_v9, %v8239_v14  ;;  %v2588_v38 = vrot.slane %v7330_v10, %v8239_v14  ;;  %v2589_v63 = vcombine.low %v1763_v7, %v1770_v6  ;;  %v7331_v15 = vcombine.high %v1763_v7, %v1770_v6  ;;  %v8639_v6 = vld [vmem:[#allocation2 + $0x50] sm:$0xff] }
 0x1e7   : > { %v1829_v20 = vrot.slane %v1821_v24, %v8243_v18  ;;  %v1836_v21 = vrot.slane %v1822_v56, %v8243_v18  ;;  %v2623_v26 = vcombine.low %v1813_v60, %v1820_v42  ;;  %v7332_v22 = vcombine.high %v1813_v60, %v1820_v42 }
 0x1e8   : > { %v2596_v28 = vrot.slane %v2589_v63, %v8239_v14  ;;  %v2604_v5 = vrot.slane %v7331_v15, %v8239_v14  ;;  %v2605_v33 = vcombine.low %v2580_v12, %v2588_v38  ;;  %v911_v3 = vpack.i.b16 %v782_v13, %v766_v34 }
 0x1e9   : > { %v2630_v54 = vrot.slane %v2623_v26, %v8239_v14  ;;  %v2638_v36 = vrot.slane %v7332_v22, %v8239_v14  ;;  %v2639_v46 = vcombine.low %v1829_v20, %v1836_v21  ;;  %v7333_v51 = vcombine.high %v1829_v20, %v1836_v21 }
 0x1ea   : > { %v2612_v58 = vrot.slane %v2605_v33, %v8243_v18  ;;  %v2613_v52 = vcombine.low %v2596_v28, %v2604_v5  ;;  %v5852_v57 = vsel %vm2901_vm2, %v8559_v47, 0  ;;  %v915_v62 = vpack.i.b16 %v914_v50, %v913_v49 }
 0x1eb   : > { %v2646_v55 = vrot.slane %v2639_v46, %v8239_v14  ;;  %v2654_v37 = vrot.slane %v7333_v51, %v8239_v14  ;;  %v2655_v48 = vcombine.low %v2630_v54, %v2638_v36  ;;  %v1856_v35 = vcombine.high %v911_v3, %v8237_v11  ;;  %7567 = vmatpush3.bf16.xpose.msra.mxu1 %v5852_v57 }
 0x1ec   : > { %v2620_v61 = vrot.slane %v2613_v52, %v8243_v18  ;;  %v1863_v7 = vrot.slane %v911_v3, %v8239_v14  ;;  %v1921_v9 = vrot.slane %v1907_v40, %v8239_v14  ;;  %v5931_v47 = vsel %vm2901_vm2, %v5786_v25, 0  ;;  %7736 = vmatprep.subr.msk.bf16.mxu1 %vm2901_vm2, %v8628_v2  ;;  %v8657_v25 = vpop.f32.mrb[17].mxu1 }
 0x1ed   : > { %v2662_v10 = vrot.slane %v2655_v48, %v8243_v18  ;;  %v2663_v60 = vcombine.low %v2646_v55, %v2654_v37  ;;  %v1870_v56 = vrot.slane %v1856_v35, %v8239_v14  ;;  %7587 = vmatpush3.bf16.xpose.msra.mxu0 %v5931_v47  ;;  %v1922_v40 = vcombine.high %v915_v62, %v8237_v11  ;;  %v8661_v26 = vpop.f32.mrb[18].mxu1 }
 0x1ee   : > { %v2621_v42 = vcombine.low %v2612_v58, %v2620_v61  ;;  %v2622_v24 = vcombine.high %v2612_v58, %v2620_v61  ;;  %v1871_v13 = vcombine.low %v8588_v17, %v1863_v7  ;;  %v1872_v27 = vcombine.high %v8588_v17, %v1863_v7  ;;  %7744 = vmatprep.subr.msk.bf16.mxu0 %vm2901_vm2, %v8639_v6  ;;  %v8665_v5 = vpop.f32.mrb[19].mxu1 }
 0x1ef   : > { %v2670_v12 = vrot.slane %v2663_v60, %v8243_v18  ;;  %v1929_v38 = vrot.slane %v915_v62, %v8239_v14  ;;  %v1887_v21 = vcombine.low %v8592_v43, %v1870_v56  ;;  %v1888_v28 = vcombine.high %v8592_v43, %v1870_v56  ;;  %v5240_v56 = vpop.permute.xlu0 %5239 }
 0x1f0   : > { %v2873_v63 = vshrl.u32 %v2621_v42, 16  ;;  %v2881_v15 = vshrl.u32 %v2622_v24, 16  ;;  %v1879_v20 = vrot.slane %v1871_v13, %v8243_v18  ;;  %v1886_v17 = vrot.slane %v1872_v27, %v8243_v18 }
 0x1f1   : > { %v2671_v22 = vcombine.low %v2662_v10, %v2670_v12  ;;  %v2672_v34 = vcombine.high %v2662_v10, %v2670_v12  ;;  %v1895_v33 = vrot.slane %v1887_v21, %v8243_v18  ;;  %v1936_v50 = vrot.slane %v1922_v40, %v8239_v14 }
 0x1f2   : > { %v1937_v54 = vcombine.low %v8600_v41, %v1929_v38  ;;  %v1938_v36 = vcombine.high %v8600_v41, %v1929_v38  ;;  %v1902_v3 = vrot.slane %v1888_v28, %v8243_v18  ;;  %v2673_v61 = vcombine.low %v1879_v20, %v1886_v17 }
 0x1f3   : > { %v2871_v46 = vpack.i.b16 %v2671_v22, %v2621_v42  ;;  %v2874_v51 = vshrl.u32 %v2671_v22, 16  ;;  %v2879_v58 = vpack.i.b16 %v2672_v34, %v2622_v24  ;;  %v2882_v52 = vshrl.u32 %v2672_v34, 16  ;;  %v8681_v24 = vpop.permute.xlu1 %5241 }
 0x1f4   : > { %v1945_v49 = vrot.slane %v1937_v54, %v8243_v18  ;;  %v1952_v43 = vrot.slane %v1938_v36, %v8243_v18  ;;  %v1953_v55 = vcombine.low %v1921_v9, %v1936_v50  ;;  %v1954_v57 = vcombine.high %v1921_v9, %v1936_v50  ;;  %v5248_v36 = vpop.permute.xlu0 %5247 }
 0x1f5   : > { %v2875_v37 = vpack.i.b16 %v2874_v51, %v2873_v63  ;;  %v2883_v48 = vpack.i.b16 %v2882_v52, %v2881_v15  ;;  %2908 = vst.msk [vmem:[#allocation2 + $0x30] sm:$0xff] %vm2901_vm2, %v2871_v46  ;;  %2924 = vst.msk [vmem:[#allocation2 + $0xb0] sm:$0xff] %vm2901_vm2, %v2879_v58  ;;  %v7334_v62 = vcombine.high %v1879_v20, %v1886_v17  ;;  %v5255_v58 = vshrl.u32 %v8198_v1, 16 }
 0x1f6   : > { %v1961_v41 = vrot.slane %v1953_v55, %v8243_v18  ;;  %v2689_v35 = vcombine.low %v1895_v33, %v1902_v3  ;;  %v7335_v7 = vcombine.high %v1895_v33, %v1902_v3  ;;  %v1968_v10 = vrot.slane %v1954_v57, %v8243_v18 }
 0x1f7   : > { %2916 = vst.msk [vmem:[#allocation2 + $0x70] sm:$0xff] %vm2901_vm2, %v2875_v37  ;;  %2932 = vst.msk [vmem:[#allocation2 + $0xf0] sm:$0xff] %vm2901_vm2, %v2883_v48  ;;  %v2680_v60 = vrot.slane %v2673_v61, %v8239_v14  ;;  %v2723_v47 = vcombine.low %v1945_v49, %v1952_v43  ;;  %v7336_v42 = vcombine.high %v1945_v49, %v1952_v43  ;;  %v5244_v54 = vpop.permute.xlu1 %5243  ;;  %v5256_v52 = vshrl.u32 %v5240_v56, 16 }
 0x1f8   : > { %v2688_v9 = vrot.slane %v7334_v62, %v8239_v14  ;;  %v2696_v13 = vrot.slane %v2689_v35, %v8239_v14  ;;  %v2704_v12 = vrot.slane %v7335_v7, %v8239_v14  ;;  %v2739_v38 = vcombine.low %v1961_v41, %v1968_v10 }
 0x1f9   : > { %v2730_v27 = vrot.slane %v2723_v47, %v8239_v14  ;;  %v2738_v40 = vrot.slane %v7336_v42, %v8239_v14  ;;  %v7337_v63 = vcombine.high %v1961_v41, %v1968_v10  ;;  %v5253_v50 = vpack.i.b16 %v5240_v56, %v8198_v1 }
 0x1fa   : > { %v2705_v15 = vcombine.low %v2680_v60, %v2688_v9  ;;  %v2713_v20 = vcombine.low %v2696_v13, %v2704_v12  ;;  %v2746_v21 = vrot.slane %v2739_v38, %v8239_v14  ;;  %v5275_v43 = vpack.i.b16 %v8681_v24, %v8196_v0 }
 0x1fb   : > { %v2754_v22 = vrot.slane %v7337_v63, %v8239_v14  ;;  %v2755_v34 = vcombine.low %v2730_v27, %v2738_v40  ;;  %v5278_v55 = vshrl.u32 %v8681_v24, 16  ;;  %v5289_v37 = vcombine.high %v5253_v50, %v8237_v11 }
 0x1fc   : > { %v2712_v17 = vrot.slane %v2705_v15, %v8243_v18  ;;  %v2720_v28 = vrot.slane %v2713_v20, %v8243_v18  ;;  %v5296_v48 = vrot.slane %v5253_v50, %v8239_v14  ;;  %v5263_v57 = vshrl.u32 %v5244_v54, 16  ;;  %v5246_v50 = vpop.permute.xlu0 %5245 }
 0x1fd   : > { %v2763_v33 = vcombine.low %v2746_v21, %v2754_v22  ;;  %v2762_v3 = vrot.slane %v2755_v34, %v8243_v18  ;;  %v5261_v61 = vpack.i.b16 %v5248_v36, %v5244_v54  ;;  %v5264_v1 = vshrl.u32 %v5248_v36, 16 }
 0x1fe   : > { %v2721_v46 = vcombine.low %v2712_v17, %v2720_v28  ;;  %v2722_v51 = vcombine.high %v2712_v17, %v2720_v28  ;;  %v5257_v10 = vpack.i.b16 %v5256_v52, %v5255_v58  ;;  %v5303_v13 = vrot.slane %v5289_v37, %v8239_v14  ;;  %v5780_v28 = vld [vmem:[#allocation2 + $0x18] sm:$0xff] }
 0x1ff   : > { %v2770_v49 = vrot.slane %v2763_v33, %v8243_v18  ;;  %v5304_v60 = vcombine.high %v5261_v61, %v8237_v11  ;;  %v5311_v47 = vrot.slane %v5261_v61, %v8239_v14  ;;  %v5265_v12 = vpack.i.b16 %v5264_v1, %v5263_v57  ;;  %v5250_v33 = vpop.permute.xlu1 %5249  ;;  %v5788_v52 = vld [vmem:[#allocation2 + $0x58] sm:$0xff] }
 0x200   : > { %v2889_v35 = vshrl.u32 %v2721_v46, 16  ;;  %v2897_v7 = vshrl.u32 %v2722_v51, 16  ;;  %v5855_v20 = vsel %vm2901_vm2, %v8628_v2, 0  ;;  %v5355_v21 = vcombine.high %v5257_v10, %v8237_v11 }
 0x201   : > { %v2771_v41 = vcombine.low %v2762_v3, %v2770_v49  ;;  %v2772_v62 = vcombine.high %v2762_v3, %v2770_v49  ;;  %v5318_v27 = vrot.slane %v5304_v60, %v8239_v14  ;;  %v5319_v40 = vcombine.low %v5296_v48, %v5311_v47  ;;  %7569 = vmatpush3.bf16.xpose.msra.mxu1 %v5855_v20 }
 0x202   : > { %v5320_v15 = vcombine.high %v5296_v48, %v5311_v47  ;;  %v5370_v17 = vcombine.high %v5265_v12, %v8237_v11  ;;  %v5277_v54 = vshrl.u32 %v8196_v0, 16  ;;  %v5377_v36 = vrot.slane %v5265_v12, %v8239_v14  ;;  %7737 = vmatprep.subr.msk.bf16.mxu1 %vm2901_vm2, %v5780_v28 }
 0x203   : > { %v2887_v42 = vpack.i.b16 %v2771_v41, %v2721_v46  ;;  %v2890_v56 = vshrl.u32 %v2771_v41, 16  ;;  %v2895_v9 = vpack.i.b16 %v2772_v62, %v2722_v51  ;;  %v2898_v24 = vshrl.u32 %v2772_v62, 16 }
 0x204   : > { %v5335_v22 = vcombine.low %v5303_v13, %v5318_v27  ;;  %v5336_v34 = vcombine.high %v5303_v13, %v5318_v27  ;;  %v5934_v2 = vsel %vm2901_vm2, %v8639_v6, 0  ;;  %v5421_v46 = vcombine.high %v5275_v43, %v8237_v11 }
 0x205   : > { %v2891_v38 = vpack.i.b16 %v2890_v56, %v2889_v35  ;;  %v2899_v63 = vpack.i.b16 %v2898_v24, %v2897_v7  ;;  %2909 = vst.msk [vmem:[#allocation2 + $0x38] sm:$0xff] %vm2901_vm2, %v2887_v42  ;;  %2925 = vst.msk [vmem:[#allocation2 + $0xb8] sm:$0xff] %vm2901_vm2, %v2895_v9  ;;  %v5362_v51 = vrot.slane %v5257_v10, %v8239_v14  ;;  %7589 = vmatpush3.bf16.xpose.msra.mxu0 %v5934_v2 }
 0x206   : > { %v5384_v58 = vrot.slane %v5370_v17, %v8239_v14  ;;  %v5279_v3 = vpack.i.b16 %v5278_v55, %v5277_v54  ;;  %v5327_v49 = vrot.slane %v5319_v40, %v8243_v18  ;;  %v5334_v0 = vrot.slane %v5320_v15, %v8243_v18  ;;  %7745 = vmatprep.subr.msk.bf16.mxu0 %vm2901_vm2, %v5788_v52 }
 0x207   : > { %2917 = vst.msk [vmem:[#allocation2 + $0x78] sm:$0xff] %vm2901_vm2, %v2891_v38  ;;  %2933 = vst.msk [vmem:[#allocation2 + $0xf8] sm:$0xff] %vm2901_vm2, %v2899_v63  ;;  %v5283_v37 = vpack.i.b16 %v5250_v33, %v5246_v50  ;;  %v5369_v48 = vrot.slane %v5355_v21, %v8239_v14  ;;  %v5343_v6 = vrot.slane %v5335_v22, %v8243_v18  ;;  %v5286_v62 = vshrl.u32 %v5250_v33, 16  ;;  %v5781_v38 = vld [vmem:[#allocation2 + $0x20] sm:$0xff] }
 0x208   : > { %v5350_v57 = vrot.slane %v5336_v34, %v8243_v18  ;;  %v5385_v61 = vcombine.low %v5362_v51, %v5377_v36  ;;  %v5386_v41 = vcombine.high %v5362_v51, %v5377_v36  ;;  %v5428_v35 = vrot.slane %v5275_v43, %v8239_v14  ;;  %v5789_v33 = vld [vmem:[#allocation2 + $0x60] sm:$0xff] }
 0x209   : > { %v5435_v55 = vrot.slane %v5421_v46, %v8239_v14  ;;  %v5401_v1 = vcombine.low %v5369_v48, %v5384_v58  ;;  %v5402_v7 = vcombine.high %v5369_v48, %v5384_v58  ;;  %v5487_v10 = vcombine.high %v5279_v3, %v8237_v11 }
 0x20a   : > { %v5553_v60 = vcombine.low %v5327_v49, %v5334_v0  ;;  %v5285_v47 = vshrl.u32 %v5246_v50, 16  ;;  %v5436_v42 = vcombine.high %v5283_v37, %v8237_v11  ;;  %v5393_v56 = vrot.slane %v5385_v61, %v8243_v18 }
 0x20b   : > { %v5569_v9 = vcombine.low %v5343_v6, %v5350_v57  ;;  %v7378_v24 = vcombine.high %v5343_v6, %v5350_v57  ;;  %v5858_v13 = vsel %vm2901_vm2, %v5780_v28, 0  ;;  %v5400_v12 = vrot.slane %v5386_v41, %v8243_v18 }
 0x20c   : > { %v5287_v27 = vpack.i.b16 %v5286_v62, %v5285_v47  ;;  %v5443_v43 = vrot.slane %v5283_v37, %v8239_v14  ;;  %v5450_v40 = vrot.slane %v5436_v42, %v8239_v14  ;;  %7571 = vmatpush3.bf16.xpose.msra.mxu1 %v5858_v13  ;;  %v5409_v63 = vrot.slane %v5401_v1, %v8243_v18 }
 0x20d   : > { %v5416_v15 = vrot.slane %v5402_v7, %v8243_v18  ;;  %v7377_v20 = vcombine.high %v5327_v49, %v5334_v0  ;;  %7738 = vmatprep.subr.msk.bf16.mxu1 %vm2901_vm2, %v5781_v38  ;;  %v5937_v21 = vsel %vm2901_vm2, %v5788_v52, 0  ;;  %v5494_v22 = vrot.slane %v5279_v3, %v8239_v14 }
 0x20e   : > { %v5467_v34 = vcombine.low %v5435_v55, %v5450_v40  ;;  %v5468_v17 = vcombine.high %v5435_v55, %v5450_v40  ;;  %v5502_v28 = vcombine.high %v5287_v27, %v8237_v11  ;;  %7591 = vmatpush3.bf16.xpose.msra.mxu0 %v5937_v21  ;;  %v5501_v50 = vrot.slane %v5487_v10, %v8239_v14 }
 0x20f   : > { %v5576_v54 = vrot.slane %v5569_v9, %v8239_v14  ;;  %v5584_v36 = vrot.slane %v7378_v24, %v8239_v14  ;;  %v5509_v2 = vrot.slane %v5287_v27, %v8239_v14  ;;  %7746 = vmatprep.subr.msk.bf16.mxu0 %vm2901_vm2, %v5789_v33  ;;  %v5603_v46 = vcombine.low %v5393_v56, %v5400_v12  ;;  %v5790_v27 = vld [vmem:[#allocation2 + $0x68] sm:$0xff] }
 0x210   : > { %v5451_v51 = vcombine.low %v5428_v35, %v5443_v43  ;;  %v5452_v58 = vcombine.high %v5428_v35, %v5443_v43  ;;  %v5516_v52 = vrot.slane %v5502_v28, %v8239_v14  ;;  %v5560_v3 = vrot.slane %v5553_v60, %v8239_v14  ;;  %v5782_v60 = vld [vmem:[#allocation2 + $0x28] sm:$0xff] }
 0x211   : > { %v5568_v49 = vrot.slane %v7377_v20, %v8239_v14  ;;  %v7379_v0 = vcombine.high %v5393_v56, %v5400_v12  ;;  %v5619_v37 = vcombine.low %v5409_v63, %v5416_v15  ;;  %v5475_v48 = vrot.slane %v5467_v34, %v8243_v18 }
 0x212   : > { %v5482_v6 = vrot.slane %v5468_v17, %v8243_v18  ;;  %v5533_v57 = vcombine.low %v5501_v50, %v5516_v52  ;;  %v5534_v61 = vcombine.high %v5501_v50, %v5516_v52  ;;  %v7380_v41 = vcombine.high %v5409_v63, %v5416_v15 }
 0x213   : > { %v5517_v62 = vcombine.low %v5494_v22, %v5509_v2  ;;  %v5518_v55 = vcombine.high %v5494_v22, %v5509_v2  ;;  %v5861_v1 = vsel %vm2901_vm2, %v5781_v38, 0  ;;  %v5610_v35 = vrot.slane %v5603_v46, %v8239_v14 }
 0x214   : > { %v5459_v7 = vrot.slane %v5451_v51, %v8243_v18  ;;  %v5466_v10 = vrot.slane %v5452_v58, %v8243_v18  ;;  %7573 = vmatpush3.bf16.xpose.msra.mxu1 %v5861_v1  ;;  %v5593_v47 = vcombine.low %v5576_v54, %v5584_v36  ;;  %v5618_v42 = vrot.slane %v7379_v0, %v8239_v14  ;;  %v7296_v0 = vld [vmem:[%s9625_s7] ss:$0 sm:$0xff]  ;;  %v5791_v1 = vld [vmem:[#allocation2 + $0x70] sm:$0xff] }
 0x215   : > { %v5541_v56 = vrot.slane %v5533_v57, %v8243_v18  ;;  %v5548_v9 = vrot.slane %v5534_v61, %v8243_v18  ;;  %7739 = vmatprep.subr.msk.bf16.mxu1 %vm2901_vm2, %v5782_v60  ;;  %v5940_v24 = vsel %vm2901_vm2, %v5789_v33, 0  ;;  %v5669_v13 = vcombine.low %v5475_v48, %v5482_v6 }
 0x216   : > { %v7382_v12 = vcombine.high %v5475_v48, %v5482_v6  ;;  %7593 = vmatpush3.bf16.xpose.msra.mxu0 %v5940_v24  ;;  %v5585_v43 = vcombine.low %v5560_v3, %v5568_v49  ;;  %v5626_v40 = vrot.slane %v5619_v37, %v8239_v14  ;;  %v5525_v38 = vrot.slane %v5517_v62, %v8243_v18  ;;  %v5783_v49 = vld [vmem:[#allocation2 + $0x30] sm:$0xff] }
 0x217   : > { %v5532_v63 = vrot.slane %v5518_v55, %v8243_v18  ;;  %7747 = vmatprep.subr.msk.bf16.mxu0 %vm2901_vm2, %v5790_v27  ;;  %v5653_v15 = vcombine.low %v5459_v7, %v5466_v10  ;;  %v8766_v20 = vrot.slane %v5593_v47, %v8243_v18  ;;  %v5634_v21 = vrot.slane %v7380_v41, %v8239_v14 }
 0x218   : > { %v7381_v22 = vcombine.high %v5459_v7, %v5466_v10  ;;  %v5719_v34 = vcombine.low %v5541_v56, %v5548_v9  ;;  %v7384_v17 = vcombine.high %v5541_v56, %v5548_v9  ;;  %v5635_v28 = vcombine.low %v5610_v35, %v5618_v42 }
 0x219   : > { %v5676_v33 = vrot.slane %v5669_v13, %v8239_v14  ;;  %v5684_v50 = vrot.slane %v7382_v12, %v8239_v14  ;;  %v8772_v54 = vrot.slane %v5585_v43, %v8243_v18  ;;  %v5643_v36 = vcombine.low %v5626_v40, %v5634_v21 }
 0x21a   : > { %v5703_v2 = vcombine.low %v5525_v38, %v5532_v63  ;;  %v7383_v46 = vcombine.high %v5525_v38, %v5532_v63  ;;  %v5864_v51 = vsel %vm2901_vm2, %v5782_v60, 0  ;;  %v8778_v52 = vrot.slane %v5635_v28, %v8243_v18  ;;  %v5784_v38 = vld [vmem:[#allocation2 + $0x38] sm:$0xff] }
 0x21b   : > { %v5601_v58 = vcombine.low %v8772_v54, %v8766_v20  ;;  %v8781_v3 = vrot.slane %v5643_v36, %v8243_v18  ;;  %v5726_v37 = vrot.slane %v5719_v34, %v8239_v14  ;;  %v5734_v48 = vrot.slane %v7384_v17, %v8239_v14  ;;  %v5792_v17 = vld [vmem:[#allocation2 + $0x78] sm:$0xff] }
 0x21c   : > { %7575 = vmatpush3.bf16.xpose.msra.mxu1 %v5864_v51  ;;  %v5943_v6 = vsel %vm2901_vm2, %v5790_v27, 0  ;;  %v665_v57 = vadd.f32 %v8452_v44, %v7296_v0  ;;  %v5660_v61 = vrot.slane %v5653_v15, %v8239_v14  ;;  %v5668_v41 = vrot.slane %v7381_v22, %v8239_v14 }
 0x21d   : > { %7740 = vmatprep.subr.msk.bf16.mxu1 %vm2901_vm2, %v5783_v49  ;;  %v5693_v62 = vcombine.low %v5676_v33, %v5684_v50  ;;  %v5651_v55 = vcombine.low %v8778_v52, %v8781_v3  ;;  %v5710_v35 = vrot.slane %v5703_v2, %v8239_v14  ;;  %v5718_v7 = vrot.slane %v7383_v46, %v8239_v14 }
 0x21e   : > { %7595 = vmatpush3.bf16.xpose.msra.mxu0 %v5943_v6  ;;  %v657_v10 = vadd.f32 %v7296_v0, %v8458_v29  ;;  %v668_v44 = vadd.f32 %v8466_v23, %v7296_v0  ;;  %v5756_v47 = vshrl.u32 %v5601_v58, 16  ;;  %v5743_v56 = vcombine.low %v5726_v37, %v5734_v48 }
 0x21f   : > { %7748 = vmatprep.subr.msk.bf16.mxu0 %vm2901_vm2, %v5791_v1  ;;  %v5755_v60 = vpack.i.b16 %v5651_v55, %v5601_v58  ;;  %v5757_v42 = vshrl.u32 %v5651_v55, 16  ;;  %v660_v24 = vadd.f32 %v7296_v0, %v8470_v59  ;;  %v5685_v13 = vcombine.low %v5660_v61, %v5668_v41 }
 0x220   : > { %v8800_v9 = vpack.c.bf16 %v668_v44, %v665_v57  ;;  %v681_v27 = vadd.f32 %v8496_v53, %v7296_v0  ;;  %v5700_v43 = vrot.slane %v5693_v62, %v8243_v18  ;;  %v5735_v40 = vcombine.low %v5710_v35, %v5718_v7 }
 0x221   : > { %7580 = vmatprep.mubr.msk.bf16.mxu1 %vm2901_vm2, %v5755_v60  ;;  %v5758_v12 = vpack.i.b16 %v5757_v42, %v5756_v47  ;;  %v5867_v29 = vsel %vm2901_vm2, %v5783_v49, 0  ;;  %v8807_v23 = vpack.c.bf16 %v660_v24, %v657_v10  ;;  %v673_v63 = vadd.f32 %v7296_v0, %v8509_v45  ;;  %v5794_v10 = vld [vmem:[#allocation2 + $0x88] sm:$0xff] }
 0x222   : > { %v684_v59 = vadd.f32 %v8514_v16, %v7296_v0  ;;  %v676_v15 = vadd.f32 %v7296_v0, %v8519_v32  ;;  %v5750_v21 = vrot.slane %v5743_v56, %v8243_v18  ;;  %v5946_v53 = vsel %vm2901_vm2, %v5791_v1, 0  ;;  %v5802_v47 = vld [vmem:[#allocation2 + $0xc8] sm:$0xff]  ;;  %v5795_v56 = vld [vmem:[#allocation2 + $0x90] sm:$0xff] }
 0x223   : > { %7600 = vmatprep.mubr.msk.bf16.mxu0 %vm2901_vm2, %v5758_v12  ;;  %2950 = vrot.lane.b32.xlu1 %v8807_v23, %s7992_s27  ;;  %v697_v22 = vadd.f32 %v8543_v19, %v7296_v0  ;;  %v689_v34 = vadd.f32 %v7296_v0, %v8547_v31  ;;  %v700_v32 = vadd.f32 %v8552_v30, %v7296_v0  ;;  %v5949_v57 = vsel %vm2901_vm2, %v5792_v17, 0 }
 0x224   : > { %7577 = vmatpush3.bf16.xpose.msra.mxu1 %v5867_v29  ;;  %2966 = vrot.lane.b32.xlu0 %v8807_v23, %s7993_s28  ;;  %v8822_v45 = vpack.c.bf16 %v684_v59, %v681_v27  ;;  %v8824_v16 = vpack.c.bf16 %v676_v15, %v673_v63  ;;  %v692_v28 = vadd.f32 %v7296_v0, %v8576_v8  ;;  %v6010_v42 = vsel %vm2901_vm2, %v5794_v10, 0  ;;  %v5796_v27 = vld [vmem:[#allocation2 + $0x98] sm:$0xff]  ;;  %v5805_v59 = vld [vmem:[#allocation2 + $0xe0] sm:$0xff] }
 0x225   : > { %7741 = vmatprep.subr.msk.bf16.mxu1 %vm2901_vm2, %v5784_v38  ;;  %v5692_v33 = vrot.slane %v5685_v13, %v8243_v18  ;;  %v5742_v19 = vrot.slane %v5735_v40, %v8243_v18  ;;  %v8831_v31 = vpack.c.bf16 %v700_v32, %v697_v22  ;;  %v713_v50 = vadd.f32 %v8630_v39, %v7296_v0  ;;  %v5803_v13 = vld [vmem:[#allocation2 + $0xd0] sm:$0xff]  ;;  %v5804_v40 = vld [vmem:[#allocation2 + $0xd8] sm:$0xff]  ;;  %v5806_v22 = vld [vmem:[#allocation2 + $0xe8] sm:$0xff] }
 0x226   : > { %7597 = vmatpush3.bf16.xpose.msra.mxu0 %v5946_v53  ;;  %v8836_v36 = vpack.c.bf16 %v692_v28, %v689_v34  ;;  %v705_v2 = vadd.f32 %v7296_v0, %v8657_v25  ;;  %v716_v30 = vadd.f32 %v8661_v26, %v7296_v0  ;;  %v708_v8 = vadd.f32 %v7296_v0, %v8665_v5  ;;  %v5793_v25 = vld [vmem:[#allocation2 + $0x80] sm:$0xff]  ;;  %v5807_v28 = vld [vmem:[#allocation2 + $0xf0] sm:$0xff] }
 0x227   : > { %7749 = vmatprep.subr.msk.bf16.mxu0 %vm2901_vm2, %v5792_v17  ;;  %2982 = vrot.lane.b32.xlu1 %v8807_v23, %s7991_s24  ;;  %v8843_v46 = vcombine.high %v5692_v33, %v5700_v43  ;;  %v8845_v51 = vcombine.high %v5742_v19, %v5750_v21  ;;  %v5870_v39 = vsel %vm2901_vm2, %v5784_v38, 0  ;;  %v5751_v58 = vcombine.low %v5742_v19, %v5750_v21  ;;  %v5797_v38 = vld [vmem:[#allocation2 + $0xa0] sm:$0xff]  ;;  %v5798_v21 = vld [vmem:[#allocation2 + $0xa8] sm:$0xff]  ;;  %v5799_v17 = vld [vmem:[#allocation2 + $0xb0] sm:$0xff] }
 0x228   : > { %2968 = vrot.lane.b32.xlu0 %v8800_v9, %s7993_s28  ;;  %v5652_v49 = vcombine.high %v8778_v52, %v8781_v3  ;;  %v8850_v37 = vpack.c.bf16 %v716_v30, %v713_v50  ;;  %v8852_v26 = vpack.c.bf16 %v708_v8, %v705_v2  ;;  %v5701_v6 = vcombine.low %v5692_v33, %v5700_v43  ;;  %v5801_v52 = vld [vmem:[#allocation2 + $0xc0] sm:$0xff]  ;;  %v5800_v19 = vld [vmem:[#allocation2 + $0xb8] sm:$0xff] }
 0x229   : > { %v5773_v48 = vpack.i.b16 %v8845_v51, %v8843_v46  ;;  %v5774_v5 = vshrl.u32 %v8843_v46, 16  ;;  %v5775_v0 = vshrl.u32 %v8845_v51, 16  ;;  %v5602_v3 = vcombine.high %v8772_v54, %v8766_v20  ;;  %v5808_v2 = vld [vmem:[#allocation2 + $0xf8] sm:$0xff] }
 0x22a   : > { %v5769_v41 = vshrl.u32 %v5751_v58, 16  ;;  %v5763_v62 = vshrl.u32 %v5652_v49, 16  ;;  %v5767_v55 = vpack.i.b16 %v5751_v58, %v5701_v6  ;;  %v5768_v1 = vshrl.u32 %v5701_v6, 16 }
 0x22b   : > { %2952 = vrot.lane.b32.xlu1 %v8800_v9, %s7992_s27  ;;  %v8866_v61 = vpack.i.b16 %v5775_v0, %v5774_v5  ;;  %v5761_v35 = vpack.i.b16 %v5652_v49, %v5602_v3  ;;  %v5762_v7 = vshrl.u32 %v5602_v3, 16  ;;  %v6007_v20 = vsel %vm2901_vm2, %v5793_v25, 0 }
 0x22c   : > { %7579 = vmatpush3.bf16.xpose.msra.mxu1 %v5870_v39  ;;  %2954 = vrot.lane.b32.xlu0 %v8824_v16, %s7992_s27  ;;  %v5770_v54 = vpack.i.b16 %v5769_v41, %v5768_v1  ;;  %v6086_v60 = vsel %vm2901_vm2, %v5801_v52, 0  ;;  %v6089_v24 = vsel %vm2901_vm2, %v5802_v47, 0  ;;  %v6013_v12 = vsel %vm2901_vm2, %v5795_v56, 0 }
 0x22d   : > { %7750 = vmatprep.subr.msk.bf16.mxu1 %vm2901_vm2, %v5793_v25  ;;  %v5764_v44 = vpack.i.b16 %v5763_v62, %v5762_v7  ;;  %v6092_v43 = vsel %vm2901_vm2, %v5803_v13, 0  ;;  %v6016_v29 = vsel %vm2901_vm2, %v5796_v27, 0  ;;  %v6095_v63 = vsel %vm2901_vm2, %v5804_v40, 0 }
 0x22e   : > { %7599 = vmatpush3.bf16.xpose.msra.mxu0 %v5949_v57  ;;  %v6019_v15 = vsel %vm2901_vm2, %v5797_v38, 0  ;;  %v6098_v53 = vsel %vm2901_vm2, %v5805_v59, 0  ;;  %v6022_v34 = vsel %vm2901_vm2, %v5798_v21, 0  ;;  %v6101_v32 = vsel %vm2901_vm2, %v5806_v22, 0 }
 0x22f   : > { %7758 = vmatprep.subr.msk.bf16.mxu0 %vm2901_vm2, %v5801_v52  ;;  %2984 = vrot.lane.b32.xlu1 %v8800_v9, %s7991_s24  ;;  %v6025_v33 = vsel %vm2901_vm2, %v5799_v17, 0  ;;  %v6104_v50 = vsel %vm2901_vm2, %v5807_v28, 0  ;;  %v6028_v30 = vsel %vm2901_vm2, %v5800_v19, 0  ;;  %v6107_v8 = vsel %vm2901_vm2, %v5808_v2, 0 }
 0x230   : > { %2986 = vrot.lane.b32.xlu0 %v8824_v16, %s7991_s24  ;;  %v3002_v39 = vshrl.u32 %v8807_v23, 16  ;;  %v3018_v51 = vshrl.u32 %v8800_v9, 16  ;;  %v3034_v62 = vshrl.u32 %v8824_v16, 16  ;;  %v3082_v7 = vshrl.u32 %v8831_v31, 16 }
 0x233   : > { %7581 = vmatmul.mubr.msk.bf16.vlgmr.msra.gmra.mrb[20].mxu1 %vm2901_vm2, %v5767_v55  ;;  %2970 = vrot.lane.b32.xlu1 %v8824_v16, %s7993_s28 }
 0x234   : > { %7605 = vmatpush3.bf16.xpose.msra.mxu1 %v6007_v20  ;;  %7620 = vmatprep.mubr.msk.bf16.mxu1 %vm2901_vm2, %v5761_v35 }
 0x235   : > { %7601 = vmatmul.mubr.msk.bf16.vlgmr.msra.gmra.mrb[16].mxu0 %vm2901_vm2, %v5770_v54  ;;  %7751 = vmatprep.subr.msk.bf16.mxu1 %vm2901_vm2, %v5794_v10 }
 0x236   : > { %7625 = vmatpush3.bf16.xpose.msra.mxu0 %v6086_v60  ;;  %7640 = vmatprep.mubr.msk.bf16.mxu0 %vm2901_vm2, %v5764_v44 }
 0x237   : > { %7759 = vmatprep.subr.msk.bf16.mxu0 %vm2901_vm2, %v5802_v47  ;;  %2972 = vrot.lane.b32.xlu0 %v8822_v45, %s7993_s28 }
 0x238   : > { %2956 = vrot.lane.b32.xlu1 %v8822_v45, %s7992_s27 }
 0x23b   : > { %2976 = vrot.lane.b32.xlu0 %v8831_v31, %s7993_s28 }
 0x23c   : > { %7607 = vmatpush3.bf16.xpose.msra.mxu1 %v6010_v42  ;;  %2988 = vrot.lane.b32.xlu1 %v8822_v45, %s7991_s24 }
 0x23d   : > { %7752 = vmatprep.subr.msk.bf16.mxu1 %vm2901_vm2, %v5795_v56 }
 0x23e   : > { %7627 = vmatpush3.bf16.xpose.msra.mxu0 %v6089_v24 }
 0x23f   : > { %7760 = vmatprep.subr.msk.bf16.mxu0 %vm2901_vm2, %v5803_v13  ;;  %2958 = vrot.lane.b32.xlu0 %v8836_v36, %s7992_s27 }
 0x240   : > { %2960 = vrot.lane.b32.xlu1 %v8831_v31, %s7992_s27 }
 0x243   : > { %2990 = vrot.lane.b32.xlu0 %v8836_v36, %s7991_s24 }
 0x244   : > { %7609 = vmatpush3.bf16.xpose.msra.mxu1 %v6013_v12  ;;  %2992 = vrot.lane.b32.xlu1 %v8831_v31, %s7991_s24 }
 0x245   : > { %7753 = vmatprep.subr.msk.bf16.mxu1 %vm2901_vm2, %v5796_v27 }
 0x246   : > { %7629 = vmatpush3.bf16.xpose.msra.mxu0 %v6092_v43 }
 0x247   : > { %7761 = vmatprep.subr.msk.bf16.mxu0 %vm2901_vm2, %v5804_v40  ;;  %2962 = vrot.lane.b32.xlu0 %v8852_v26, %s7992_s27 }
 0x248   : > { %2974 = vrot.lane.b32.xlu1 %v8836_v36, %s7993_s28 }
 0x24c   : > { %7611 = vmatpush3.bf16.xpose.msra.mxu1 %v6016_v29  ;;  %2978 = vrot.lane.b32.xlu1 %v8852_v26, %s7993_s28 }
 0x24d   : > { %7754 = vmatprep.subr.msk.bf16.mxu1 %vm2901_vm2, %v5797_v38 }
 0x24e   : > { %7631 = vmatpush3.bf16.xpose.msra.mxu0 %v6095_v63 }
 0x24f   : > { %7762 = vmatprep.subr.msk.bf16.mxu0 %vm2901_vm2, %v5805_v59 }
 0x254   : > { %7613 = vmatpush3.bf16.xpose.msra.mxu1 %v6019_v15 }
 0x255   : > { %7755 = vmatprep.subr.msk.bf16.mxu1 %vm2901_vm2, %v5798_v21 }
 0x256   : > { %7633 = vmatpush3.bf16.xpose.msra.mxu0 %v6098_v53 }
 0x257   : > { %7763 = vmatprep.subr.msk.bf16.mxu0 %vm2901_vm2, %v5806_v22 }
 0x25c   : > { %7615 = vmatpush3.bf16.xpose.msra.mxu1 %v6022_v34 }
 0x25d   : > { %7756 = vmatprep.subr.msk.bf16.mxu1 %vm2901_vm2, %v5799_v17 }
 0x25e   : > { %7635 = vmatpush3.bf16.xpose.msra.mxu0 %v6101_v32 }
 0x25f   : > { %7764 = vmatprep.subr.msk.bf16.mxu0 %vm2901_vm2, %v5807_v28 }
 0x264   : > { %7617 = vmatpush3.bf16.xpose.msra.mxu1 %v6025_v33 }
 0x265   : > { %7757 = vmatprep.subr.msk.bf16.mxu1 %vm2901_vm2, %v5800_v19 }
 0x266   : > { %7637 = vmatpush3.bf16.xpose.msra.mxu0 %v6104_v50 }
 0x267   : > { %7765 = vmatprep.subr.msk.bf16.mxu0 %vm2901_vm2, %v5808_v2 }
 0x26c   : > { %7619 = vmatpush3.bf16.xpose.msra.mxu1 %v6028_v30 }
 0x26e   : > { %7639 = vmatpush3.bf16.xpose.msra.mxu0 %v6107_v8 }
 0x273   : > { %7621 = vmatmul.mubr.msk.bf16.vlgmr.msra.gmra.mrb[24].mxu1 %vm2901_vm2, %v5773_v48 }
 0x275   : > { %7641 = vmatmul.mubr.msk.bf16.vlgmr.msra.gmra.mrb[20].mxu0 %vm2901_vm2, %v8866_v61 }
 0x295   : > { %v2951_v58 = vpop.permute.xlu1 %2950 }
 0x296   : > { %v3000_v49 = vpack.i.b16 %v2951_v58, %v8807_v23  ;;  %v3003_v25 = vshrl.u32 %v2951_v58, 16  ;;  %v2967_v5 = vpop.permute.xlu0 %2966  ;;  %v3050_v23 = vshrl.u32 %v8822_v45, 16 }
 0x297   : > { %v3010_v57 = vshrl.u32 %v2967_v5, 16 }
 0x298   : > { %v3004_v0 = vpack.i.b16 %v3003_v25, %v3002_v39  ;;  %v3126_v6 = vcombine.high %v3000_v49, %v8237_v11  ;;  %v3133_v61 = vrot.slane %v3000_v49, %v8239_v14 }
 0x299   : > { %v2983_v52 = vpop.permute.xlu1 %2982 }
 0x29a   : > { %v3192_v3 = vcombine.high %v3004_v0, %v8237_v11  ;;  %v3011_v46 = vshrl.u32 %v2983_v52, 16  ;;  %v8942_v48 = vpop.permute.xlu0 %2968  ;;  %v3008_v41 = vpack.i.b16 %v2983_v52, %v2967_v5  ;;  %v3140_v55 = vrot.slane %v3126_v6, %v8239_v14 }
 0x29b   : > { %v3199_v1 = vrot.slane %v3004_v0, %v8239_v14  ;;  %v3026_v60 = vshrl.u32 %v8942_v48, 16 }
 0x29c   : > { %v3012_v35 = vpack.i.b16 %v3011_v46, %v3010_v57  ;;  %v3206_v20 = vrot.slane %v3192_v3, %v8239_v14  ;;  %v3141_v10 = vcombine.high %v3008_v41, %v8237_v11  ;;  %v3148_v44 = vrot.slane %v3008_v41, %v8239_v14 }
 0x29d   : > { %v2953_v54 = vpop.permute.xlu1 %2952 }
 0x29e   : > { %v3016_v47 = vpack.i.b16 %v2953_v54, %v8800_v9  ;;  %v3019_v42 = vshrl.u32 %v2953_v54, 16  ;;  %v3207_v56 = vcombine.high %v3012_v35, %v8237_v11  ;;  %v3214_v24 = vrot.slane %v3012_v35, %v8239_v14  ;;  %v8957_v13 = vpop.permute.xlu0 %2954 }
 0x29f   : > { %v3155_v12 = vrot.slane %v3141_v10, %v8239_v14  ;;  %v3156_v27 = vcombine.low %v3133_v61, %v3148_v44  ;;  %v3157_v43 = vcombine.high %v3133_v61, %v3148_v44  ;;  %v8962_v40 = vpack.i.b16 %v8957_v13, %v8824_v16 }
 0x2a0   : > { %v3020_v29 = vpack.i.b16 %v3019_v42, %v3018_v51  ;;  %v3258_v38 = vcombine.high %v3016_v47, %v8237_v11  ;;  %v3265_v9 = vrot.slane %v3016_v47, %v8239_v14  ;;  %v3221_v63 = vrot.slane %v3207_v56, %v8239_v14 }
 0x2a1   : > { %v3164_v59 = vrot.slane %v3156_v27, %v8243_v18  ;;  %v3171_v15 = vrot.slane %v3157_v43, %v8243_v18  ;;  %v3172_v21 = vcombine.low %v3140_v55, %v3155_v12  ;;  %v3173_v53 = vcombine.high %v3140_v55, %v3155_v12  ;;  %v2985_v0 = vpop.permute.xlu1 %2984 }
 0x2a2   : > { %v8970_v22 = vrot.slane %v3258_v38, %v8239_v14  ;;  %v3324_v34 = vcombine.high %v3020_v29, %v8237_v11  ;;  %v8974_v17 = vrot.slane %v3020_v29, %v8239_v14  ;;  %v3222_v32 = vcombine.low %v3199_v1, %v3214_v24 }
 0x2a3   : > { %v3180_v28 = vrot.slane %v3172_v21, %v8243_v18  ;;  %v3187_v33 = vrot.slane %v3173_v53, %v8243_v18  ;;  %v3223_v19 = vcombine.high %v3199_v1, %v3214_v24  ;;  %v3238_v50 = vcombine.low %v3206_v20, %v3221_v63 }
 0x2a4   : > { %v8979_v2 = vrot.slane %v3324_v34, %v8239_v14  ;;  %v3230_v30 = vrot.slane %v3222_v32, %v8243_v18  ;;  %v3239_v8 = vcombine.high %v3206_v20, %v3221_v63  ;;  %v4182_v39 = vcombine.low %v3164_v59, %v3171_v15 }
 0x2a5   : > { %v3237_v58 = vrot.slane %v3223_v19, %v8243_v18  ;;  %v3246_v49 = vrot.slane %v3238_v50, %v8243_v18  ;;  %v7338_v25 = vcombine.high %v3164_v59, %v3171_v15  ;;  %v4198_v5 = vcombine.low %v3180_v28, %v3187_v33 }
 0x2a6   : > { %v3253_v6 = vrot.slane %v3239_v8, %v8243_v18  ;;  %v4189_v57 = vrot.slane %v4182_v39, %v8239_v14  ;;  %v7339_v52 = vcombine.high %v3180_v28, %v3187_v33  ;;  %v3027_v3 = vshrl.u32 %v2985_v0, 16 }
 0x2a7   : > { %v4197_v46 = vrot.slane %v7338_v25, %v8239_v14  ;;  %v4205_v51 = vrot.slane %v4198_v5, %v8239_v14  ;;  %v4232_v61 = vcombine.low %v3230_v30, %v3237_v58  ;;  %v7340_v41 = vcombine.high %v3230_v30, %v3237_v58 }
 0x2a8   : > { %v4213_v55 = vrot.slane %v7339_v52, %v8239_v14  ;;  %v4248_v1 = vcombine.low %v3246_v49, %v3253_v6  ;;  %v7341_v35 = vcombine.high %v3246_v49, %v3253_v6  ;;  %v3024_v20 = vpack.i.b16 %v2985_v0, %v8942_v48 }
 0x2a9   : > { %v4214_v54 = vcombine.low %v4189_v57, %v4197_v46  ;;  %v4239_v10 = vrot.slane %v4232_v61, %v8239_v14  ;;  %v4247_v44 = vrot.slane %v7340_v41, %v8239_v14  ;;  %v3028_v47 = vpack.i.b16 %v3027_v3, %v3026_v60 }
 0x2aa   : > { %v4222_v42 = vcombine.low %v4205_v51, %v4213_v55  ;;  %v4255_v56 = vrot.slane %v4248_v1, %v8239_v14  ;;  %v4263_v24 = vrot.slane %v7341_v35, %v8239_v14  ;;  %v3273_v12 = vcombine.high %v3024_v20, %v8237_v11 }
 0x2ab   : > { %v4221_v27 = vrot.slane %v4214_v54, %v8243_v18  ;;  %v4264_v43 = vcombine.low %v4239_v10, %v4247_v44  ;;  %v3280_v29 = vrot.slane %v3024_v20, %v8239_v14  ;;  %v3339_v48 = vcombine.high %v3028_v47, %v8237_v11  ;;  %v9018_v54 = vpop.permute.xlu1 %2970 }
 0x2ac   : > { %v4229_v38 = vrot.slane %v4222_v42, %v8243_v18  ;;  %v4272_v63 = vcombine.low %v4255_v56, %v4263_v24  ;;  %v3287_v59 = vrot.slane %v3273_v12, %v8239_v14  ;;  %v3346_v60 = vrot.slane %v3028_v47, %v8239_v14 }
 0x2ad   : > { %v4271_v15 = vrot.slane %v4264_v43, %v8243_v18  ;;  %v3288_v21 = vcombine.low %v3265_v9, %v3280_v29  ;;  %v3289_v53 = vcombine.high %v3265_v9, %v3280_v29  ;;  %v3353_v34 = vrot.slane %v3339_v48, %v8239_v14 }
 0x2ae   : > { %v4230_v32 = vcombine.low %v4221_v27, %v4229_v38  ;;  %v4231_v28 = vcombine.high %v4221_v27, %v4229_v38  ;;  %v4279_v33 = vrot.slane %v4272_v63, %v8243_v18  ;;  %v3304_v19 = vcombine.low %v8970_v22, %v3287_v59 }
 0x2af   : > { %v3296_v50 = vrot.slane %v3288_v21, %v8243_v18  ;;  %v3303_v30 = vrot.slane %v3289_v53, %v8243_v18  ;;  %v3305_v8 = vcombine.high %v8970_v22, %v3287_v59  ;;  %v3354_v39 = vcombine.low %v8974_v17, %v3346_v60 }
 0x2b0   : > { %v4280_v58 = vcombine.low %v4271_v15, %v4279_v33  ;;  %v4281_v49 = vcombine.high %v4271_v15, %v4279_v33  ;;  %v4986_v25 = vshrl.u32 %v4230_v32, 16  ;;  %v4994_v9 = vshrl.u32 %v4231_v28, 16 }
 0x2b1   : > { %v3312_v5 = vrot.slane %v3304_v19, %v8243_v18  ;;  %v3319_v0 = vrot.slane %v3305_v8, %v8243_v18  ;;  %v3355_v6 = vcombine.high %v8974_v17, %v3346_v60  ;;  %v3362_v57 = vrot.slane %v3354_v39, %v8243_v18 }
 0x2b2   : > { %v4984_v52 = vpack.i.b16 %v4280_v58, %v4230_v32  ;;  %v4987_v3 = vshrl.u32 %v4280_v58, 16  ;;  %v4992_v46 = vpack.i.b16 %v4281_v49, %v4231_v28  ;;  %v4995_v51 = vshrl.u32 %v4281_v49, 16 }
 0x2b3   : > { %v3369_v22 = vrot.slane %v3355_v6, %v8243_v18  ;;  %v3370_v61 = vcombine.low %v8979_v2, %v3353_v34  ;;  %v3371_v41 = vcombine.high %v8979_v2, %v3353_v34  ;;  %v4282_v55 = vcombine.low %v3296_v50, %v3303_v30 }
 0x2b4   : > { %v4988_v1 = vpack.i.b16 %v4987_v3, %v4986_v25  ;;  %v4996_v35 = vpack.i.b16 %v4995_v51, %v4994_v9  ;;  %5110 = vst.msk [vmem:[#allocation3] sm:$0xff] %vm2901_vm2, %v4984_v52  ;;  %5126 = vst.msk [vmem:[#allocation3 + $0x80] sm:$0xff] %vm2901_vm2, %v4992_v46  ;;  %v7342_v17 = vcombine.high %v3296_v50, %v3303_v30  ;;  %v3042_v48 = vshrl.u32 %v9018_v54, 16  ;;  %v2957_v50 = vpop.permute.xlu1 %2956  ;;  %v2987_v9 = vpop.permute.xlu0 %2986 }
 0x2b5   : > { %v4298_v20 = vcombine.low %v3312_v5, %v3319_v0  ;;  %v3378_v10 = vrot.slane %v3370_v61, %v8243_v18  ;;  %v3385_v44 = vrot.slane %v3371_v41, %v8243_v18  ;;  %v4289_v47 = vrot.slane %v4282_v55, %v8239_v14 }
 0x2b6   : > { %v7343_v42 = vcombine.high %v3312_v5, %v3319_v0  ;;  %5118 = vst.msk [vmem:[#allocation3 + $0x40] sm:$0xff] %vm2901_vm2, %v4988_v1  ;;  %5134 = vst.msk [vmem:[#allocation3 + $0xc0] sm:$0xff] %vm2901_vm2, %v4996_v35  ;;  %v4297_v2 = vrot.slane %v7342_v17, %v8239_v14  ;;  %v4332_v24 = vcombine.low %v3362_v57, %v3369_v22  ;;  %v3035_v60 = vshrl.u32 %v8957_v13, 16 }
 0x2b7   : > { %v4305_v56 = vrot.slane %v4298_v20, %v8239_v14  ;;  %v7344_v12 = vcombine.high %v3362_v57, %v3369_v22  ;;  %v4348_v43 = vcombine.low %v3378_v10, %v3385_v44  ;;  %v7345_v29 = vcombine.high %v3378_v10, %v3385_v44 }
 0x2b8   : > { %v4313_v27 = vrot.slane %v7343_v42, %v8239_v14  ;;  %v4314_v38 = vcombine.low %v4289_v47, %v4297_v2  ;;  %v4339_v63 = vrot.slane %v4332_v24, %v8239_v14  ;;  %v3390_v34 = vcombine.high %v8962_v40, %v8237_v11  ;;  %v2973_v24 = vpop.permute.xlu0 %2972 }
 0x2b9   : > { %v4347_v59 = vrot.slane %v7344_v12, %v8239_v14  ;;  %v4355_v21 = vrot.slane %v4348_v43, %v8239_v14  ;;  %v4363_v53 = vrot.slane %v7345_v29, %v8239_v14  ;;  %v3036_v33 = vpack.i.b16 %v3035_v60, %v3034_v62 }
 0x2ba   : > { %v4322_v15 = vcombine.low %v4305_v56, %v4313_v27  ;;  %v4321_v32 = vrot.slane %v4314_v38, %v8243_v18  ;;  %v3397_v19 = vrot.slane %v8962_v40, %v8239_v14  ;;  %v9043_v8 = vrot.slane %v3390_v34, %v8239_v14  ;;  %v2989_v56 = vpop.permute.xlu1 %2988 }
 0x2bb   : > { %v4364_v28 = vcombine.low %v4339_v63, %v4347_v59  ;;  %v4372_v30 = vcombine.low %v4355_v21, %v4363_v53  ;;  %v3048_v39 = vpack.i.b16 %v2957_v50, %v8822_v45  ;;  %v5809_v58 = vld [vmem:[#allocation3] sm:$0xff]  ;;  %v3456_v25 = vcombine.high %v3036_v33, %v8237_v11 }
 0x2bc   : > { %v4329_v13 = vrot.slane %v4322_v15, %v8243_v18  ;;  %v9049_v16 = vrot.slane %v3036_v33, %v8239_v14  ;;  %v3051_v62 = vshrl.u32 %v2957_v50, 16  ;;  %7644 = vmatprep.subr.bf16.mxu1 %v5809_v58  ;;  %v3040_v51 = vpack.i.b16 %v2987_v9, %v9018_v54 }
 0x2bd   : > { %v4371_v49 = vrot.slane %v4364_v28, %v8243_v18  ;;  %v4379_v0 = vrot.slane %v4372_v30, %v8243_v18  ;;  %v3522_v6 = vcombine.high %v3048_v39, %v8237_v11  ;;  %7645 = vmatpush3.bf16.msra.mxu1 %v5809_v58  ;;  %v5817_v57 = vld [vmem:[#allocation3 + $0x40] sm:$0xff]  ;;  %v9054_v52 = vrot.slane %v3456_v25, %v8239_v14 }
 0x2be   : > { %v4330_v40 = vcombine.low %v4321_v32, %v4329_v13  ;;  %v4331_v5 = vcombine.high %v4321_v32, %v4329_v13  ;;  %v3052_v3 = vpack.i.b16 %v3051_v62, %v3050_v23  ;;  %v9059_v46 = vrot.slane %v3048_v39, %v8239_v14  ;;  %7664 = vmatprep.subr.bf16.mxu0 %v5817_v57 }
 0x2bf   : > { %v4380_v22 = vcombine.low %v4371_v49, %v4379_v0  ;;  %v4381_v61 = vcombine.high %v4371_v49, %v4379_v0  ;;  %7665 = vmatpush3.bf16.msra.mxu0 %v5817_v57  ;;  %v9063_v1 = vrot.slane %v3522_v6, %v8239_v14  ;;  %v3043_v45 = vshrl.u32 %v2987_v9, 16 }
 0x2c0   : > { %v5002_v41 = vshrl.u32 %v4330_v40, 16  ;;  %v5010_v55 = vshrl.u32 %v4331_v5, 16  ;;  %v3588_v35 = vcombine.high %v3052_v3, %v8237_v11  ;;  %v9067_v17 = vrot.slane %v3052_v3, %v8239_v14 }
 0x2c1   : > { %v5000_v23 = vpack.i.b16 %v4380_v22, %v4330_v40  ;;  %v5003_v20 = vshrl.u32 %v4380_v22, 16  ;;  %v5008_v10 = vpack.i.b16 %v4381_v61, %v4331_v5  ;;  %v5011_v44 = vshrl.u32 %v4381_v61, 16 }
 0x2c2   : > { %v9070_v54 = vrot.slane %v3588_v35, %v8239_v14  ;;  %v3044_v47 = vpack.i.b16 %v3043_v45, %v3042_v48  ;;  %v3405_v42 = vcombine.high %v3040_v51, %v8237_v11  ;;  %v3412_v2 = vrot.slane %v3040_v51, %v8239_v14 }
 0x2c3   : > { %v5004_v12 = vpack.i.b16 %v5003_v20, %v5002_v41  ;;  %v5012_v27 = vpack.i.b16 %v5011_v44, %v5010_v55  ;;  %5111 = vst.msk [vmem:[#allocation3 + $0x8] sm:$0xff] %vm2901_vm2, %v5000_v23  ;;  %5127 = vst.msk [vmem:[#allocation3 + $0x88] sm:$0xff] %vm2901_vm2, %v5008_v10  ;;  %v3059_v43 = vshrl.u32 %v2989_v56, 16  ;;  %v3056_v29 = vpack.i.b16 %v2989_v56, %v2973_v24 }
 0x2c4   : > { %v3419_v38 = vrot.slane %v3405_v42, %v8239_v14  ;;  %v3420_v63 = vcombine.low %v3397_v19, %v3412_v2  ;;  %v3421_v59 = vcombine.high %v3397_v19, %v3412_v2  ;;  %v3471_v48 = vcombine.high %v3044_v47, %v8237_v11 }
 0x2c5   : > { %5119 = vst.msk [vmem:[#allocation3 + $0x48] sm:$0xff] %vm2901_vm2, %v5004_v12  ;;  %5135 = vst.msk [vmem:[#allocation3 + $0xc8] sm:$0xff] %vm2901_vm2, %v5012_v27  ;;  %v3478_v60 = vrot.slane %v3044_v47, %v8239_v14  ;;  %v3058_v15 = vshrl.u32 %v2973_v24, 16  ;;  %v3537_v21 = vcombine.high %v3056_v29, %v8237_v11  ;;  %v3544_v53 = vrot.slane %v3056_v29, %v8239_v14 }
 0x2c6   : > { %v3428_v34 = vrot.slane %v3420_v63, %v8243_v18  ;;  %v3435_v32 = vrot.slane %v3421_v59, %v8243_v18  ;;  %v3436_v28 = vcombine.low %v9043_v8, %v3419_v38  ;;  %v3437_v33 = vcombine.high %v9043_v8, %v3419_v38 }
 0x2c7   : > { %v3485_v19 = vrot.slane %v3471_v48, %v8239_v14  ;;  %v3486_v50 = vcombine.low %v9049_v16, %v3478_v60  ;;  %v3487_v13 = vcombine.high %v9049_v16, %v3478_v60  ;;  %v3060_v30 = vpack.i.b16 %v3059_v43, %v3058_v15 }
 0x2c8   : > { %v3444_v39 = vrot.slane %v3436_v28, %v8243_v18  ;;  %v3451_v58 = vrot.slane %v3437_v33, %v8243_v18  ;;  %v4382_v49 = vcombine.low %v3428_v34, %v3435_v32  ;;  %v7346_v25 = vcombine.high %v3428_v34, %v3435_v32 }
 0x2c9   : > { %v3494_v62 = vrot.slane %v3486_v50, %v8243_v18  ;;  %v3501_v9 = vrot.slane %v3487_v13, %v8243_v18  ;;  %v3502_v40 = vcombine.low %v9054_v52, %v3485_v19  ;;  %v3503_v8 = vcombine.high %v9054_v52, %v3485_v19 }
 0x2ca   : > { %v4389_v5 = vrot.slane %v4382_v49, %v8239_v14  ;;  %v4397_v0 = vrot.slane %v7346_v25, %v8239_v14  ;;  %v4398_v16 = vcombine.low %v3444_v39, %v3451_v58  ;;  %v7347_v6 = vcombine.high %v3444_v39, %v3451_v58  ;;  %v5810_v57 = vld [vmem:[#allocation3 + $0x8] sm:$0xff] }
 0x2cb   : > { %v3510_v3 = vrot.slane %v3502_v40, %v8243_v18  ;;  %v3517_v51 = vrot.slane %v3503_v8, %v8243_v18  ;;  %v4432_v22 = vcombine.low %v3494_v62, %v3501_v9  ;;  %v7348_v61 = vcombine.high %v3494_v62, %v3501_v9  ;;  %7646 = vmatprep.subr.bf16.mxu1 %v5810_v57 }
 0x2cc   : > { %v4405_v41 = vrot.slane %v4398_v16, %v8239_v14  ;;  %v4413_v55 = vrot.slane %v7347_v6, %v8239_v14  ;;  %v4414_v35 = vcombine.low %v4389_v5, %v4397_v0  ;;  %v3551_v52 = vrot.slane %v3537_v21, %v8239_v14  ;;  %7647 = vmatpush3.bf16.msra.mxu1 %v5810_v57  ;;  %v5818_v45 = vld [vmem:[#allocation3 + $0x48] sm:$0xff] }
 0x2cd   : > { %v4439_v23 = vrot.slane %v4432_v22, %v8239_v14  ;;  %v4447_v20 = vrot.slane %v7348_v61, %v8239_v14  ;;  %v4448_v10 = vcombine.low %v3510_v3, %v3517_v51  ;;  %v7349_v44 = vcombine.high %v3510_v3, %v3517_v51  ;;  %7666 = vmatprep.subr.bf16.mxu0 %v5818_v45  ;;  %v2961_v3 = vpop.permute.xlu1 %2960 }
 0x2ce   : > { %v4421_v47 = vrot.slane %v4414_v35, %v8243_v18  ;;  %v4422_v42 = vcombine.low %v4405_v41, %v4413_v55  ;;  %v3552_v2 = vcombine.low %v9059_v46, %v3544_v53  ;;  %v3553_v56 = vcombine.high %v9059_v46, %v3544_v53  ;;  %7667 = vmatpush3.bf16.msra.mxu0 %v5818_v45 }
 0x2cf   : > { %v4455_v24 = vrot.slane %v4448_v10, %v8239_v14  ;;  %v4463_v12 = vrot.slane %v7349_v44, %v8239_v14  ;;  %v4464_v27 = vcombine.low %v4439_v23, %v4447_v20  ;;  %v3568_v43 = vcombine.low %v9063_v1, %v3551_v52 }
 0x2d0   : > { %v4429_v29 = vrot.slane %v4422_v42, %v8243_v18  ;;  %v3560_v38 = vrot.slane %v3552_v2, %v8243_v18  ;;  %v3567_v63 = vrot.slane %v3553_v56, %v8243_v18  ;;  %v3569_v59 = vcombine.high %v9063_v1, %v3551_v52 }
 0x2d1   : > { %v4471_v48 = vrot.slane %v4464_v27, %v8243_v18  ;;  %v4472_v60 = vcombine.low %v4455_v24, %v4463_v12  ;;  %v3576_v46 = vrot.slane %v3568_v43, %v8243_v18  ;;  %v3603_v15 = vcombine.high %v3060_v30, %v8237_v11  ;;  %v2977_v27 = vpop.permute.xlu0 %2976 }
 0x2d2   : > { %v4430_v21 = vcombine.low %v4421_v47, %v4429_v29  ;;  %v4431_v53 = vcombine.high %v4421_v47, %v4429_v29  ;;  %v3583_v34 = vrot.slane %v3569_v59, %v8243_v18  ;;  %v3610_v32 = vrot.slane %v3060_v30, %v8239_v14 }
 0x2d3   : > { %v4479_v28 = vrot.slane %v4472_v60, %v8243_v18  ;;  %v3617_v33 = vrot.slane %v3603_v15, %v8239_v14  ;;  %v4482_v19 = vcombine.low %v3560_v38, %v3567_v63  ;;  %v7350_v50 = vcombine.high %v3560_v38, %v3567_v63  ;;  %v2993_v63 = vpop.permute.xlu1 %2992 }
 0x2d4   : > { %v5018_v1 = vshrl.u32 %v4430_v21, 16  ;;  %v5026_v13 = vshrl.u32 %v4431_v53, 16  ;;  %v3618_v39 = vcombine.low %v9067_v17, %v3610_v32  ;;  %v3619_v58 = vcombine.high %v9067_v17, %v3610_v32 }
 0x2d5   : > { %v4480_v49 = vcombine.low %v4471_v48, %v4479_v28  ;;  %v4481_v25 = vcombine.high %v4471_v48, %v4479_v28  ;;  %v3634_v62 = vcombine.low %v9070_v54, %v3617_v33  ;;  %v3635_v9 = vcombine.high %v9070_v54, %v3617_v33 }
 0x2d6   : > { %v3626_v30 = vrot.slane %v3618_v39, %v8243_v18  ;;  %v3633_v40 = vrot.slane %v3619_v58, %v8243_v18  ;;  %v4489_v8 = vrot.slane %v4482_v19, %v8239_v14  ;;  %v4497_v5 = vrot.slane %v7350_v50, %v8239_v14 }
 0x2d7   : > { %v5016_v0 = vpack.i.b16 %v4480_v49, %v4430_v21  ;;  %v5019_v16 = vshrl.u32 %v4480_v49, 16  ;;  %v5024_v6 = vpack.i.b16 %v4481_v25, %v4431_v53  ;;  %v5027_v57 = vshrl.u32 %v4481_v25, 16 }
 0x2d8   : > { %v3642_v17 = vrot.slane %v3634_v62, %v8243_v18  ;;  %v3649_v51 = vrot.slane %v3635_v9, %v8243_v18  ;;  %v4498_v22 = vcombine.low %v3576_v46, %v3583_v34  ;;  %v7351_v61 = vcombine.high %v3576_v46, %v3583_v34 }
 0x2d9   : > { %v5020_v54 = vpack.i.b16 %v5019_v16, %v5018_v1  ;;  %v5028_v41 = vpack.i.b16 %v5027_v57, %v5026_v13  ;;  %5112 = vst.msk [vmem:[#allocation3 + $0x10] sm:$0xff] %vm2901_vm2, %v5016_v0  ;;  %5128 = vst.msk [vmem:[#allocation3 + $0x90] sm:$0xff] %vm2901_vm2, %v5024_v6  ;;  %v4514_v55 = vcombine.low %v4489_v8, %v4497_v5  ;;  %v3083_v12 = vshrl.u32 %v2961_v3, 16  ;;  %v2959_v0 = vpop.permute.xlu0 %2958 }
 0x2da   : > { %v4532_v35 = vcombine.low %v3626_v30, %v3633_v40  ;;  %v4505_v52 = vrot.slane %v4498_v22, %v8239_v14  ;;  %v4513_v45 = vrot.slane %v7351_v61, %v8239_v14  ;;  %v7352_v23 = vcombine.high %v3626_v30, %v3633_v40 }
 0x2db   : > { %v4548_v20 = vcombine.low %v3642_v17, %v3649_v51  ;;  %5120 = vst.msk [vmem:[#allocation3 + $0x50] sm:$0xff] %vm2901_vm2, %v5020_v54  ;;  %5136 = vst.msk [vmem:[#allocation3 + $0xd0] sm:$0xff] %vm2901_vm2, %v5028_v41  ;;  %v4521_v10 = vrot.slane %v4514_v55, %v8243_v18  ;;  %v7353_v47 = vcombine.high %v3642_v17, %v3649_v51  ;;  %v3090_v38 = vshrl.u32 %v2977_v27, 16 }
 0x2dc   : > { %v4539_v44 = vrot.slane %v4532_v35, %v8239_v14  ;;  %v3080_v42 = vpack.i.b16 %v2961_v3, %v8831_v31  ;;  %v4522_v2 = vcombine.low %v4505_v52, %v4513_v45  ;;  %v4547_v56 = vrot.slane %v7352_v23, %v8239_v14 }
 0x2dd   : > { %v4555_v24 = vrot.slane %v4548_v20, %v8239_v14  ;;  %v4563_v43 = vrot.slane %v7353_v47, %v8239_v14  ;;  %v3066_v59 = vshrl.u32 %v8836_v36, 16  ;;  %v3084_v46 = vpack.i.b16 %v3083_v12, %v3082_v7 }
 0x2de   : > { %v3786_v29 = vcombine.high %v3080_v42, %v8237_v11  ;;  %v4529_v48 = vrot.slane %v4522_v2, %v8243_v18  ;;  %v4564_v60 = vcombine.low %v4539_v44, %v4547_v56  ;;  %v3088_v15 = vpack.i.b16 %v2993_v63, %v2977_v27 }
 0x2df   : > { %v4572_v21 = vcombine.low %v4555_v24, %v4563_v43  ;;  %v3793_v53 = vrot.slane %v3080_v42, %v8239_v14  ;;  %v3091_v32 = vshrl.u32 %v2993_v63, 16  ;;  %v3852_v50 = vcombine.high %v3084_v46, %v8237_v11 }
 0x2e0   : > { %v3800_v34 = vrot.slane %v3786_v29, %v8239_v14  ;;  %v4530_v28 = vcombine.low %v4521_v10, %v4529_v48  ;;  %v4531_v33 = vcombine.high %v4521_v10, %v4529_v48  ;;  %v4571_v19 = vrot.slane %v4564_v60, %v8243_v18  ;;  %v5811_v1 = vld [vmem:[#allocation3 + $0x10] sm:$0xff] }
 0x2e1   : > { %v4579_v13 = vrot.slane %v4572_v21, %v8243_v18  ;;  %v3859_v39 = vrot.slane %v3084_v46, %v8239_v14  ;;  %v3092_v31 = vpack.i.b16 %v3091_v32, %v3090_v38  ;;  %v3801_v7 = vcombine.high %v3088_v15, %v8237_v11  ;;  %7648 = vmatprep.subr.bf16.mxu1 %v5811_v1 }
 0x2e2   : > { %v5034_v58 = vshrl.u32 %v4530_v28, 16  ;;  %v5042_v49 = vshrl.u32 %v4531_v33, 16  ;;  %v3866_v25 = vrot.slane %v3852_v50, %v8239_v14  ;;  %v3808_v62 = vrot.slane %v3088_v15, %v8239_v14  ;;  %7649 = vmatpush3.bf16.msra.mxu1 %v5811_v1  ;;  %v5819_v9 = vld [vmem:[#allocation3 + $0x50] sm:$0xff] }
 0x2e3   : > { %v4580_v30 = vcombine.low %v4571_v19, %v4579_v13  ;;  %v4581_v40 = vcombine.high %v4571_v19, %v4579_v13  ;;  %v3815_v8 = vrot.slane %v3801_v7, %v8239_v14  ;;  %v3867_v5 = vcombine.high %v3092_v31, %v8237_v11  ;;  %7668 = vmatprep.subr.bf16.mxu0 %v5819_v9 }
 0x2e4   : > { %v3816_v16 = vcombine.low %v3793_v53, %v3808_v62  ;;  %v3817_v6 = vcombine.high %v3793_v53, %v3808_v62  ;;  %v3874_v57 = vrot.slane %v3092_v31, %v8239_v14  ;;  %v3067_v3 = vshrl.u32 %v2959_v0, 16  ;;  %7669 = vmatpush3.bf16.msra.mxu0 %v5819_v9  ;;  %v2991_v31 = vpop.permute.xlu0 %2990 }
 0x2e5   : > { %v5032_v17 = vpack.i.b16 %v4580_v30, %v4530_v28  ;;  %v5035_v51 = vshrl.u32 %v4580_v30, 16  ;;  %v5040_v22 = vpack.i.b16 %v4581_v40, %v4531_v33  ;;  %v5043_v61 = vshrl.u32 %v4581_v40, 16 }
 0x2e6   : > { %v3824_v54 = vrot.slane %v3816_v16, %v8243_v18  ;;  %v3831_v41 = vrot.slane %v3817_v6, %v8243_v18  ;;  %v3832_v55 = vcombine.low %v3800_v34, %v3815_v8  ;;  %v3833_v35 = vcombine.high %v3800_v34, %v3815_v8 }
 0x2e7   : > { %v5036_v52 = vpack.i.b16 %v5035_v51, %v5034_v58  ;;  %v5044_v45 = vpack.i.b16 %v5043_v61, %v5042_v49  ;;  %5113 = vst.msk [vmem:[#allocation3 + $0x18] sm:$0xff] %vm2901_vm2, %v5032_v17  ;;  %5129 = vst.msk [vmem:[#allocation3 + $0x98] sm:$0xff] %vm2901_vm2, %v5040_v22  ;;  %v3881_v23 = vrot.slane %v3867_v5, %v8239_v14 }
 0x2e8   : > { %v3882_v20 = vcombine.low %v3859_v39, %v3874_v57  ;;  %v3840_v10 = vrot.slane %v3832_v55, %v8243_v18  ;;  %v3847_v44 = vrot.slane %v3833_v35, %v8243_v18  ;;  %v3883_v47 = vcombine.high %v3859_v39, %v3874_v57  ;;  %v2975_v39 = vpop.permute.xlu1 %2974 }
 0x2e9   : > { %v4682_v42 = vcombine.low %v3824_v54, %v3831_v41  ;;  %5121 = vst.msk [vmem:[#allocation3 + $0x58] sm:$0xff] %vm2901_vm2, %v5036_v52  ;;  %5137 = vst.msk [vmem:[#allocation3 + $0xd8] sm:$0xff] %vm2901_vm2, %v5044_v45  ;;  %v3898_v56 = vcombine.low %v3866_v25, %v3881_v23  ;;  %v3899_v24 = vcombine.high %v3866_v25, %v3881_v23  ;;  %v3074_v8 = vshrl.u32 %v2975_v39, 16 }
 0x2ea   : > { %v3890_v2 = vrot.slane %v3882_v20, %v8243_v18  ;;  %v7358_v12 = vcombine.high %v3824_v54, %v3831_v41  ;;  %v3897_v27 = vrot.slane %v3883_v47, %v8243_v18  ;;  %v4698_v29 = vcombine.low %v3840_v10, %v3847_v44 }
 0x2eb   : > { %v4689_v43 = vrot.slane %v4682_v42, %v8239_v14  ;;  %v7359_v38 = vcombine.high %v3840_v10, %v3847_v44  ;;  %v3906_v63 = vrot.slane %v3898_v56, %v8243_v18  ;;  %v3913_v48 = vrot.slane %v3899_v24, %v8243_v18 }
 0x2ec   : > { %v4697_v60 = vrot.slane %v7358_v12, %v8239_v14  ;;  %v3064_v46 = vpack.i.b16 %v2959_v0, %v8836_v36  ;;  %v4705_v15 = vrot.slane %v4698_v29, %v8239_v14  ;;  %v4732_v53 = vcombine.low %v3890_v2, %v3897_v27 }
 0x2ed   : > { %v4713_v21 = vrot.slane %v7359_v38, %v8239_v14  ;;  %v7360_v34 = vcombine.high %v3890_v2, %v3897_v27  ;;  %v4748_v28 = vcombine.low %v3906_v63, %v3913_v48  ;;  %v7361_v33 = vcombine.high %v3906_v63, %v3913_v48 }
 0x2ee   : > { %v4714_v32 = vcombine.low %v4689_v43, %v4697_v60  ;;  %v4739_v50 = vrot.slane %v4732_v53, %v8239_v14  ;;  %v3068_v13 = vpack.i.b16 %v3067_v3, %v3066_v59  ;;  %v5812_v7 = vld [vmem:[#allocation3 + $0x18] sm:$0xff]  ;;  %v3654_v30 = vcombine.high %v3064_v46, %v8237_v11 }
 0x2ef   : > { %v4722_v19 = vcombine.low %v4705_v15, %v4713_v21  ;;  %v4747_v1 = vrot.slane %v7360_v34, %v8239_v14  ;;  %v4755_v49 = vrot.slane %v4748_v28, %v8239_v14  ;;  %v4763_v25 = vrot.slane %v7361_v33, %v8239_v14  ;;  %7650 = vmatprep.subr.bf16.mxu1 %v5812_v7 }
 0x2f0   : > { %v4721_v58 = vrot.slane %v4714_v32, %v8243_v18  ;;  %v3661_v40 = vrot.slane %v3064_v46, %v8239_v14  ;;  %7651 = vmatpush3.bf16.msra.mxu1 %v5812_v7  ;;  %v5820_v36 = vld [vmem:[#allocation3 + $0x58] sm:$0xff]  ;;  %v3072_v5 = vpack.i.b16 %v2991_v31, %v2975_v39  ;;  %v3075_v0 = vshrl.u32 %v2991_v31, 16 }
 0x2f1   : > { %v4729_v62 = vrot.slane %v4722_v19, %v8243_v18  ;;  %v4764_v9 = vcombine.low %v4739_v50, %v4747_v1  ;;  %v4772_v59 = vcombine.low %v4755_v49, %v4763_v25  ;;  %7670 = vmatprep.subr.bf16.mxu0 %v5820_v36  ;;  %v3720_v3 = vcombine.high %v3068_v13, %v8237_v11 }
 0x2f2   : > { %7671 = vmatpush3.bf16.msra.mxu0 %v5820_v36  ;;  %v3076_v51 = vpack.i.b16 %v3075_v0, %v3074_v8  ;;  %v3669_v22 = vcombine.high %v3072_v5, %v8237_v11  ;;  %v3676_v61 = vrot.slane %v3072_v5, %v8239_v14  ;;  %v3668_v55 = vrot.slane %v3654_v30, %v8239_v14 }
 0x2f3   : > { %v4730_v16 = vcombine.low %v4721_v58, %v4729_v62  ;;  %v4731_v6 = vcombine.high %v4721_v58, %v4729_v62  ;;  %v4771_v57 = vrot.slane %v4764_v9, %v8243_v18  ;;  %v4779_v17 = vrot.slane %v4772_v59, %v8243_v18 }
 0x2f4   : > { %v3727_v35 = vrot.slane %v3068_v13, %v8239_v14  ;;  %v3683_v23 = vrot.slane %v3669_v22, %v8239_v14  ;;  %v3684_v20 = vcombine.low %v3661_v40, %v3676_v61  ;;  %v3734_v10 = vrot.slane %v3720_v3, %v8239_v14 }
 0x2f5   : > { %v5066_v54 = vshrl.u32 %v4730_v16, 16  ;;  %v5074_v41 = vshrl.u32 %v4731_v6, 16  ;;  %v4780_v52 = vcombine.low %v4771_v57, %v4779_v17  ;;  %v4781_v45 = vcombine.high %v4771_v57, %v4779_v17 }
 0x2f6   : > { %v3685_v44 = vcombine.high %v3661_v40, %v3676_v61  ;;  %v3735_v47 = vcombine.high %v3076_v51, %v8237_v11  ;;  %v3742_v42 = vrot.slane %v3076_v51, %v8239_v14  ;;  %v3692_v27 = vrot.slane %v3684_v20, %v8243_v18 }
 0x2f7   : > { %v5064_v2 = vpack.i.b16 %v4780_v52, %v4730_v16  ;;  %v5067_v56 = vshrl.u32 %v4780_v52, 16  ;;  %v5072_v24 = vpack.i.b16 %v4781_v45, %v4731_v6  ;;  %v5075_v12 = vshrl.u32 %v4781_v45, 16 }
 0x2f8   : > { %v3699_v43 = vrot.slane %v3685_v44, %v8243_v18  ;;  %v3700_v29 = vcombine.low %v3668_v55, %v3683_v23  ;;  %v3701_v38 = vcombine.high %v3668_v55, %v3683_v23  ;;  %v3749_v60 = vrot.slane %v3735_v47, %v8239_v14 }
 0x2f9   : > { %v5068_v63 = vpack.i.b16 %v5067_v56, %v5066_v54  ;;  %v5076_v48 = vpack.i.b16 %v5075_v12, %v5074_v41  ;;  %5115 = vst.msk [vmem:[#allocation3 + $0x28] sm:$0xff] %vm2901_vm2, %v5064_v2  ;;  %5131 = vst.msk [vmem:[#allocation3 + $0xa8] sm:$0xff] %vm2901_vm2, %v5072_v24  ;;  %v3750_v46 = vcombine.low %v3727_v35, %v3742_v42  ;;  %v9216_v49 = vand.u32 127, %v921_v4 }
 0x2fa   : > { %v3708_v15 = vrot.slane %v3700_v29, %v8243_v18  ;;  %v3715_v21 = vrot.slane %v3701_v38, %v8243_v18  ;;  %v3751_v53 = vcombine.high %v3727_v35, %v3742_v42  ;;  %v4582_v34 = vcombine.low %v3692_v27, %v3699_v43 }
 0x2fb   : > { %5123 = vst.msk [vmem:[#allocation3 + $0x68] sm:$0xff] %vm2901_vm2, %v5068_v63  ;;  %5139 = vst.msk [vmem:[#allocation3 + $0xe8] sm:$0xff] %vm2901_vm2, %v5076_v48  ;;  %v3758_v32 = vrot.slane %v3750_v46, %v8243_v18  ;;  %v3766_v28 = vcombine.low %v3734_v10, %v3749_v60  ;;  %v3767_v33 = vcombine.high %v3734_v10, %v3749_v60  ;;  %vm6160_vm3 = vcmp.lt.s32.totalorder %v9216_v49, 8 }
 0x2fc   : > { %v7354_v19 = vcombine.high %v3692_v27, %v3699_v43  ;;  %v3765_v50 = vrot.slane %v3751_v53, %v8243_v18  ;;  %v4589_v1 = vrot.slane %v4582_v34, %v8239_v14  ;;  %v4598_v13 = vcombine.low %v3708_v15, %v3715_v21 }
 0x2fd   : > { %v7355_v39 = vcombine.high %v3708_v15, %v3715_v21  ;;  %v3774_v31 = vrot.slane %v3766_v28, %v8243_v18  ;;  %v3781_v7 = vrot.slane %v3767_v33, %v8243_v18 }
 0x2fe   : > { %v4597_v58 = vrot.slane %v7354_v19, %v8239_v14  ;;  %v4605_v25 = vrot.slane %v4598_v13, %v8239_v14  ;;  %v4632_v9 = vcombine.low %v3758_v32, %v3765_v50  ;;  %v7356_v30 = vcombine.high %v3758_v32, %v3765_v50 }
 0x2ff   : > { %v4613_v62 = vrot.slane %v7355_v39, %v8239_v14  ;;  %v4648_v36 = vcombine.low %v3774_v31, %v3781_v7  ;;  %v7357_v59 = vcombine.high %v3774_v31, %v3781_v7 }
 0x300   : > { %v4614_v40 = vcombine.low %v4589_v1, %v4597_v58  ;;  %v4639_v5 = vrot.slane %v4632_v9, %v8239_v14  ;;  %v4647_v0 = vrot.slane %v7356_v30, %v8239_v14  ;;  %v5814_v53 = vld [vmem:[#allocation3 + $0x28] sm:$0xff] }
 0x301   : > { %v4622_v8 = vcombine.low %v4605_v25, %v4613_v62  ;;  %v4655_v6 = vrot.slane %v4648_v36, %v8239_v14  ;;  %v4663_v4 = vrot.slane %v7357_v59, %v8239_v14 }
 0x302   : > { %v4621_v16 = vrot.slane %v4614_v40, %v8243_v18  ;;  %v4664_v3 = vcombine.low %v4639_v5, %v4647_v0  ;;  %v5822_v28 = vld [vmem:[#allocation3 + $0x68] sm:$0xff]  ;;  %v2979_v5 = vpop.permute.xlu1 %2978  ;;  %v2963_v0 = vpop.permute.xlu0 %2962 }
 0x303   : > { %v4629_v57 = vrot.slane %v4622_v8, %v8243_v18  ;;  %v4672_v17 = vcombine.low %v4655_v6, %v4663_v4 }
 0x304   : > { %v4671_v61 = vrot.slane %v4664_v3, %v8243_v18 }
 0x305   : > { %v4630_v51 = vcombine.low %v4621_v16, %v4629_v57  ;;  %v4631_v22 = vcombine.high %v4621_v16, %v4629_v57  ;;  %v4679_v41 = vrot.slane %v4672_v17, %v8243_v18 }
 0x306   : > { %v7582_v54 = vpop.f32.mrb[20].mxu1 }
 0x307   : > { %v5906_v55 = vpop.f32.mrb[21].mxu1  ;;  %v9231_v35 = vsel %vm6160_vm3, %v7582_v54, -1e+30  ;;  %v4680_v20 = vcombine.low %v4671_v61, %v4679_v41  ;;  %v4681_v10 = vcombine.high %v4671_v61, %v4679_v41  ;;  %v5050_v44 = vshrl.u32 %v4630_v51, 16 }
 0x308   : > { %v7602_v52 = vpop.f32.mrb[16].mxu0  ;;  %6181 = vmax.xlane.f32.xlu1 %v9231_v35  ;;  %v7583_v45 = vpop.f32.mrb[22].mxu1  ;;  %v9236_v23 = vsel %vm6160_vm3, %v5906_v55, -1e+30  ;;  %v5058_v47 = vshrl.u32 %v4631_v22, 16 }
 0x309   : > { %v5985_v42 = vpop.f32.mrb[17].mxu0  ;;  %6177 = vmax.xlane.f32.xlu0 %v9236_v23  ;;  %v5909_v2 = vpop.f32.mrb[23].mxu1  ;;  %v9241_v24 = vsel %vm6160_vm3, %v7602_v52, -1e+30  ;;  %v5048_v12 = vpack.i.b16 %v4680_v20, %v4630_v51  ;;  %v5051_v27 = vshrl.u32 %v4680_v20, 16  ;;  %v5056_v43 = vpack.i.b16 %v4681_v10, %v4631_v22 }
 0x30a   : > { %v7603_v56 = vpop.f32.mrb[18].mxu0  ;;  %v5059_v29 = vshrl.u32 %v4681_v10, 16  ;;  %v9246_v63 = vsel %vm6160_vm3, %v7583_v45, -1e+30  ;;  %v9255_v46 = vsel %vm6160_vm3, %v5909_v2, -1e+30  ;;  %v3096_v2 = vpack.i.b16 %v2963_v0, %v8852_v26 }
 0x30b   : > { %v5988_v38 = vpop.f32.mrb[19].mxu0  ;;  %v5052_v48 = vpack.i.b16 %v5051_v27, %v5050_v44  ;;  %5114 = vst.msk [vmem:[#allocation3 + $0x20] sm:$0xff] %vm2901_vm2, %v5048_v12  ;;  %5130 = vst.msk [vmem:[#allocation3 + $0xa0] sm:$0xff] %vm2901_vm2, %v5056_v43  ;;  %v9260_v15 = vsel %vm6160_vm3, %v5985_v42, -1e+30  ;;  %v3098_v42 = vshrl.u32 %v8852_v26, 16 }
 0x30c   : > { %6189 = vmax.xlane.f32.xlu1 %v9241_v24  ;;  %v5060_v60 = vpack.i.b16 %v5059_v29, %v5058_v47  ;;  %v9265_v34 = vsel %vm6160_vm3, %v7603_v56, -1e+30  ;;  %v9270_v33 = vsel %vm6160_vm3, %v5988_v38, -1e+30  ;;  %v3099_v56 = vshrl.u32 %v2963_v0, 16 }
 0x30d   : > { %6183 = vmax.xlane.f32.xlu0 %v9246_v63  ;;  %5122 = vst.msk [vmem:[#allocation3 + $0x60] sm:$0xff] %vm2901_vm2, %v5052_v48 }
 0x30e   : > { %5138 = vst.msk [vmem:[#allocation3 + $0xe0] sm:$0xff] %vm2901_vm2, %v5060_v60  ;;  %v3100_v38 = vpack.i.b16 %v3099_v56, %v3098_v42 }
 0x310   : > { %6179 = vmax.xlane.f32.xlu1 %v9255_v46 }
 0x311   : > { %6185 = vmax.xlane.f32.xlu0 %v9260_v15 }
 0x312   : > { %v5813_v21 = vld [vmem:[#allocation3 + $0x20] sm:$0xff] }
 0x313   : > { %7652 = vmatprep.subr.bf16.mxu1 %v5813_v21 }
 0x314   : > { %7653 = vmatpush3.bf16.msra.mxu1 %v5813_v21  ;;  %v5821_v32 = vld [vmem:[#allocation3 + $0x60] sm:$0xff] }
 0x315   : > { %6191 = vmax.xlane.f32.xlu0 %v9265_v34  ;;  %7672 = vmatprep.subr.bf16.mxu0 %v5821_v32 }
 0x316   : > { %7654 = vmatprep.subr.bf16.mxu1 %v5814_v53  ;;  %7673 = vmatpush3.bf16.msra.mxu0 %v5821_v32 }
 0x317   : > { %7674 = vmatprep.subr.bf16.mxu0 %v5822_v28 }
 0x318   : > { %7655 = vmatpush3.bf16.msra.mxu1 %v5814_v53 }
 0x319   : > { %6187 = vmax.xlane.f32.xlu0 %v9270_v33 }
 0x31a   : > { %7675 = vmatpush3.bf16.msra.mxu0 %v5822_v28 }
 0x321   : > { %2964 = vrot.lane.b32.xlu1 %v8850_v37, %s7992_s27  ;;  %s7997_s27 = smov 16  }
 0x32f   : > { %2994 = vrot.lane.b32.xlu0 %v8852_v26, %s7991_s24  ;;  %v3106_v26 = vshrl.u32 %v2979_v5, 16 }
 0x346   : > { %v7622_v19 = vpop.f32.mrb[24].mxu1 }
 0x347   : > { %v6064_v50 = vpop.f32.mrb[25].mxu1  ;;  %v9279_v1 = vsel %vm6160_vm3, %v7622_v19, -1e+30 }
 0x348   : > { %v7642_v13 = vpop.f32.mrb[20].mxu0  ;;  %6197 = vmax.xlane.f32.xlu1 %v9279_v1  ;;  %v7623_v39 = vpop.f32.mrb[26].mxu1  ;;  %v9284_v62 = vsel %vm6160_vm3, %v6064_v50, -1e+30  ;;  %v3984_v50 = vcombine.high %v3100_v38, %v8237_v11 }
 0x349   : > { %v6067_v31 = vpop.f32.mrb[27].mxu1  ;;  %v6143_v7 = vpop.f32.mrb[21].mxu0  ;;  %v9289_v9 = vsel %vm6160_vm3, %v7623_v39, -1e+30  ;;  %v9294_v30 = vsel %vm6160_vm3, %v7642_v13, -1e+30 }
 0x34a   : > { %v7643_v58 = vpop.f32.mrb[22].mxu0  ;;  %v9299_v40 = vsel %vm6160_vm3, %v6067_v31, -1e+30  ;;  %v9304_v36 = vsel %vm6160_vm3, %v6143_v7, -1e+30 }
 0x34b   : > { %v6146_v25 = vpop.f32.mrb[23].mxu0  ;;  %v9309_v59 = vsel %vm6160_vm3, %v7643_v58, -1e+30 }
 0x34c   : > { %6193 = vmax.xlane.f32.xlu1 %v9284_v62  ;;  %v9314_v8 = vsel %vm6160_vm3, %v6146_v25, -1e+30  ;;  %v3991_v25 = vrot.slane %v3100_v38, %v8239_v14 }
 0x34e   : > { %6199 = vmax.xlane.f32.xlu0 %v9289_v9 }
 0x350   : > { %6205 = vmax.xlane.f32.xlu1 %v9294_v30 }
 0x352   : > { %6195 = vmax.xlane.f32.xlu0 %v9299_v40 }
 0x354   : > { %6201 = vmax.xlane.f32.xlu1 %v9304_v36 }
 0x356   : > { %6207 = vmax.xlane.f32.xlu0 %v9309_v59 }
 0x35a   : > { %6203 = vmax.xlane.f32.xlu0 %v9314_v8 }
 0x365   : > { %2996 = vrot.lane.b32.xlu1 %v8850_v37, %s7991_s24  ;;  %s7413_s24 = sshll.u32 %s7981_s16, 9  ;;  %s9571_s16 = scalar_lea.sflag [#allocation5], %s390_s30 }
 0x366   : > { %s9567_s12 = scalar_lea.hbm %s9628_s10, %s7413_s24 }
 0x370   : > { %2980 = vrot.lane.b32.xlu0 %v8850_v37, %s7993_s28  ;;  %s9629_s28 = smov 8  }
 0x395   : > { %v6182_v16 = vpop.xlane.xlu1 %6181 }
 0x396   : > { %v6211_v6 = vsub.f32 %v9231_v35, %v6182_v16  ;;  %v6178_v4 = vpop.xlane.xlu0 %6177 }
 0x397   : > { %v6209_v57 = vsub.f32 %v9236_v23, %v6178_v4 }
 0x398   : > { %v6229_v3 = vmul.f32 1.442695, %v6211_v6 }
 0x399   : > { %v6225_v49 = vmul.f32 1.442695, %v6209_v57  ;;  %v6190_v17 = vpop.xlane.xlu1 %6189  ;;  %v3998_v57 = vrot.slane %v3984_v50, %v8239_v14 }
 0x39a   : > { %7847 = vpow2.f32 %v6229_v3  ;;  %v6184_v51 = vpop.xlane.xlu0 %6183  ;;  %v6215_v41 = vsub.f32 %v9241_v24, %v6190_v17 }
 0x39b   : > { %7849 = vpow2.f32 %v6225_v49  ;;  %v6212_v22 = vsub.f32 %v9246_v63, %v6184_v51  ;;  %v3918_v63 = vcombine.high %v3096_v2, %v8237_v11 }
 0x39c   : > { %v6237_v20 = vmul.f32 1.442695, %v6215_v41 }
 0x39d   : > { %v6231_v61 = vmul.f32 1.442695, %v6212_v22  ;;  %v6180_v54 = vpop.xlane.xlu1 %6179  ;;  %v3932_v19 = vrot.slane %v3918_v63, %v8239_v14 }
 0x39e   : > { %v6210_v55 = vsub.f32 %v9255_v46, %v6180_v54  ;;  %v6186_v52 = vpop.xlane.xlu0 %6185 }
 0x39f   : > { %7851 = vpow2.f32 %v6231_v61  ;;  %v6213_v35 = vsub.f32 %v9260_v15, %v6186_v52 }
 0x3a0   : > { %v6227_v45 = vmul.f32 1.442695, %v6210_v55 }
 0x3a1   : > { %v6233_v23 = vmul.f32 1.442695, %v6213_v35 }
 0x3a2   : > { %7853 = vpow2.f32 %v6227_v45  ;;  %v6192_v10 = vpop.xlane.xlu0 %6191 }
 0x3a3   : > { %7855 = vpow2.f32 %v6233_v23  ;;  %v6216_v24 = vsub.f32 %v9265_v34, %v6192_v10  ;;  %v3925_v34 = vrot.slane %v3096_v2, %v8239_v14 }
 0x3a4   : > { %v9327_v44 = vpop.eup %7847  ;;  %7857 = vpow2.f32 %v6237_v20 }
 0x3a5   : > { %v9329_v47 = vpop.eup %7849  ;;  %6261 = vadd.xlane.f32.xlu1 %v9327_v44  ;;  %v6239_v48 = vmul.f32 1.442695, %v6216_v24 }
 0x3a6   : > { %v6188_v12 = vpop.xlane.xlu0 %6187  ;;  %6257 = vadd.xlane.f32.xlu0 %v9329_v47 }
 0x3a7   : > { %v6214_v27 = vsub.f32 %v9270_v33, %v6188_v12 }
 0x3a9   : > { %v9337_v43 = vpop.eup %7851  ;;  %v6235_v29 = vmul.f32 1.442695, %v6214_v27 }
 0x3aa   : > { %v2995_v60 = vpop.permute.xlu0 %2994  ;;  %6263 = vadd.xlane.f32.xlu0 %v9337_v43 }
 0x3ab   : > { %7859 = vpow2.f32 %v6235_v29  ;;  %v3104_v46 = vpack.i.b16 %v2995_v60, %v2979_v5  ;;  %v3107_v15 = vshrl.u32 %v2995_v60, 16 }
 0x3ac   : > { %v9341_v21 = vpop.eup %7853  ;;  %7861 = vpow2.f32 %v6239_v48 }
 0x3ad   : > { %v9343_v53 = vpop.eup %7855  ;;  %v3108_v32 = vpack.i.b16 %v3107_v15, %v3106_v26  ;;  %v3933_v28 = vcombine.high %v3104_v46, %v8237_v11  ;;  %v3940_v33 = vrot.slane %v3104_v46, %v8239_v14  ;;  %6259 = vadd.xlane.f32.xlu1 %v9341_v21 }
 0x3ae   : > { %6265 = vadd.xlane.f32.xlu0 %v9343_v53  ;;  %v9354_v58 = vpop.eup %7857 }
 0x3af   : > { %v3947_v13 = vrot.slane %v3933_v28, %v8239_v14  ;;  %v3948_v39 = vcombine.low %v3925_v34, %v3940_v33  ;;  %v3949_v31 = vcombine.high %v3925_v34, %v3940_v33  ;;  %v3999_v7 = vcombine.high %v3108_v32, %v8237_v11 }
 0x3b0   : > { %v4006_v5 = vrot.slane %v3108_v32, %v8239_v14 }
 0x3b1   : > { %v3956_v0 = vrot.slane %v3948_v39, %v8243_v18  ;;  %v3963_v16 = vrot.slane %v3949_v31, %v8243_v18  ;;  %v3964_v6 = vcombine.low %v3932_v19, %v3947_v13  ;;  %v3965_v4 = vcombine.high %v3932_v19, %v3947_v13  ;;  %6269 = vadd.xlane.f32.xlu1 %v9354_v58 }
 0x3b2   : > { %v4013_v3 = vrot.slane %v3999_v7, %v8239_v14  ;;  %v4014_v49 = vcombine.low %v3991_v25, %v4006_v5  ;;  %v4015_v17 = vcombine.high %v3991_v25, %v4006_v5 }
 0x3b3   : > { %v3972_v51 = vrot.slane %v3964_v6, %v8243_v18  ;;  %v3979_v22 = vrot.slane %v3965_v4, %v8243_v18  ;;  %v4782_v61 = vcombine.low %v3956_v0, %v3963_v16  ;;  %v7362_v54 = vcombine.high %v3956_v0, %v3963_v16 }
 0x3b4   : > { %v4022_v41 = vrot.slane %v4014_v49, %v8243_v18  ;;  %v4029_v55 = vrot.slane %v4015_v17, %v8243_v18  ;;  %v4030_v52 = vcombine.low %v3998_v57, %v4013_v3  ;;  %v4031_v35 = vcombine.high %v3998_v57, %v4013_v3 }
 0x3b5   : > { %v9367_v45 = vpop.eup %7859  ;;  %v4789_v23 = vrot.slane %v4782_v61, %v8239_v14  ;;  %v4797_v20 = vrot.slane %v7362_v54, %v8239_v14  ;;  %v4798_v10 = vcombine.low %v3972_v51, %v3979_v22  ;;  %v7363_v42 = vcombine.high %v3972_v51, %v3979_v22  ;;  %v2965_v61 = vpop.permute.xlu1 %2964 }
 0x3b6   : > { %v4038_v2 = vrot.slane %v4030_v52, %v8243_v18  ;;  %v4045_v56 = vrot.slane %v4031_v35, %v8243_v18  ;;  %v4832_v24 = vcombine.low %v4022_v41, %v4029_v55  ;;  %v7364_v12 = vcombine.high %v4022_v41, %v4029_v55  ;;  %6267 = vadd.xlane.f32.xlu0 %v9367_v45  ;;  %v9376_v63 = vpop.eup %7861 }
 0x3b7   : > { %v4805_v27 = vrot.slane %v4798_v10, %v8239_v14  ;;  %v4813_v29 = vrot.slane %v7363_v42, %v8239_v14  ;;  %v4814_v38 = vcombine.low %v4789_v23, %v4797_v20 }
 0x3b8   : > { %v4839_v48 = vrot.slane %v4832_v24, %v8239_v14  ;;  %v4847_v60 = vrot.slane %v7364_v12, %v8239_v14  ;;  %v4848_v26 = vcombine.low %v4038_v2, %v4045_v56  ;;  %v7365_v46 = vcombine.high %v4038_v2, %v4045_v56 }
 0x3b9   : > { %v4822_v15 = vcombine.low %v4805_v27, %v4813_v29  ;;  %v4821_v33 = vrot.slane %v4814_v38, %v8243_v18 }
 0x3ba   : > { %v4855_v34 = vrot.slane %v4848_v26, %v8239_v14  ;;  %v4863_v32 = vrot.slane %v7365_v46, %v8239_v14  ;;  %v4864_v28 = vcombine.low %v4839_v48, %v4847_v60  ;;  %6271 = vadd.xlane.f32.xlu0 %v9376_v63  ;;  %v3112_v60 = vpack.i.b16 %v2965_v61, %v8850_v37 }
 0x3bb   : > { %v4829_v19 = vrot.slane %v4822_v15, %v8243_v18  ;;  %v3115_v26 = vshrl.u32 %v2965_v61, 16 }
 0x3bc   : > { %v4872_v50 = vcombine.low %v4855_v34, %v4863_v32  ;;  %v4871_v31 = vrot.slane %v4864_v28, %v8243_v18 }
 0x3bd   : > { %v4830_v13 = vcombine.low %v4821_v33, %v4829_v19  ;;  %v4831_v39 = vcombine.high %v4821_v33, %v4829_v19  ;;  %v4050_v19 = vcombine.high %v3112_v60, %v8237_v11 }
 0x3be   : > { %v4879_v7 = vrot.slane %v4872_v50, %v8243_v18 }
 0x3bf   : > { %v5082_v0 = vshrl.u32 %v4830_v13, 16  ;;  %v5090_v16 = vshrl.u32 %v4831_v39, 16 }
 0x3c0   : > { %v4880_v25 = vcombine.low %v4871_v31, %v4879_v7  ;;  %v4881_v5 = vcombine.high %v4871_v31, %v4879_v7 }
 0x3c2   : > { %v5080_v6 = vpack.i.b16 %v4880_v25, %v4830_v13  ;;  %v5083_v4 = vshrl.u32 %v4880_v25, 16  ;;  %v5088_v57 = vpack.i.b16 %v4881_v5, %v4831_v39  ;;  %v5091_v3 = vshrl.u32 %v4881_v5, 16 }
 0x3c4   : > { %v5084_v49 = vpack.i.b16 %v5083_v4, %v5082_v0  ;;  %v5092_v17 = vpack.i.b16 %v5091_v3, %v5090_v16  ;;  %5116 = vst.msk [vmem:[#allocation3 + $0x30] sm:$0xff] %vm2901_vm2, %v5080_v6  ;;  %5132 = vst.msk [vmem:[#allocation3 + $0xb0] sm:$0xff] %vm2901_vm2, %v5088_v57  ;;  %v4064_v0 = vrot.slane %v4050_v19, %v8239_v14 }
 0x3c6   : > { %5124 = vst.msk [vmem:[#allocation3 + $0x70] sm:$0xff] %vm2901_vm2, %v5084_v49  ;;  %5140 = vst.msk [vmem:[#allocation3 + $0xf0] sm:$0xff] %vm2901_vm2, %v5092_v17 }
 0x3cb   : > { %v5815_v51 = vld [vmem:[#allocation3 + $0x30] sm:$0xff] }
 0x3cc   : > { %7656 = vmatprep.subr.bf16.mxu1 %v5815_v51 }
 0x3cd   : > { %7657 = vmatpush3.bf16.msra.mxu1 %v5815_v51  ;;  %v5823_v22 = vld [vmem:[#allocation3 + $0x70] sm:$0xff] }
 0x3ce   : > { %7676 = vmatprep.subr.bf16.mxu0 %v5823_v22 }
 0x3cf   : > { %7677 = vmatpush3.bf16.msra.mxu0 %v5823_v22 }
 0x3d5   : > { %v6198_v54 = vpop.xlane.xlu1 %6197 }
 0x3d6   : > { %v6219_v41 = vsub.f32 %v9279_v1, %v6198_v54 }
 0x3d8   : > { %v6245_v55 = vmul.f32 1.442695, %v6219_v41 }
 0x3d9   : > { %v6194_v52 = vpop.xlane.xlu1 %6193 }
 0x3da   : > { %7863 = vpow2.f32 %v6245_v55  ;;  %v6217_v35 = vsub.f32 %v9284_v62, %v6194_v52 }
 0x3db   : > { %v6200_v23 = vpop.xlane.xlu0 %6199 }
 0x3dc   : > { %v6241_v20 = vmul.f32 1.442695, %v6217_v35  ;;  %v6220_v10 = vsub.f32 %v9289_v9, %v6200_v23 }
 0x3dd   : > { %v6206_v42 = vpop.xlane.xlu1 %6205 }
 0x3de   : > { %7865 = vpow2.f32 %v6241_v20  ;;  %v6247_v2 = vmul.f32 1.442695, %v6220_v10  ;;  %v6223_v27 = vsub.f32 %v9294_v30, %v6206_v42 }
 0x3df   : > { %v6196_v56 = vpop.xlane.xlu0 %6195 }
 0x3e0   : > { %7867 = vpow2.f32 %v6247_v2  ;;  %v6218_v24 = vsub.f32 %v9299_v40, %v6196_v56  ;;  %v6253_v9 = vmul.f32 1.442695, %v6223_v27 }
 0x3e1   : > { %v6202_v12 = vpop.xlane.xlu1 %6201 }
 0x3e2   : > { %v6243_v1 = vmul.f32 1.442695, %v6218_v24  ;;  %v6221_v29 = vsub.f32 %v9304_v36, %v6202_v12  ;;  %v3114_v36 = vshrl.u32 %v8850_v37, 16  ;;  %v4057_v37 = vrot.slane %v3112_v60, %v8239_v14 }
 0x3e3   : > { %v6208_v38 = vpop.xlane.xlu0 %6207 }
 0x3e4   : > { %v9397_v48 = vpop.eup %7863  ;;  %7869 = vpow2.f32 %v6243_v1  ;;  %v6249_v62 = vmul.f32 1.442695, %v6221_v29  ;;  %v6224_v40 = vsub.f32 %v9309_v59, %v6208_v38  ;;  %v3116_v33 = vpack.i.b16 %v3115_v26, %v3114_v36 }
 0x3e5   : > { %6277 = vadd.xlane.f32.xlu1 %v9397_v48  ;;  %v2997_v34 = vpop.permute.xlu1 %2996 }
 0x3e6   : > { %7871 = vpow2.f32 %v6249_v62  ;;  %v6255_v50 = vmul.f32 1.442695, %v6224_v40  ;;  %v3123_v13 = vshrl.u32 %v2997_v34, 16  ;;  %v4116_v16 = vcombine.high %v3116_v33, %v8237_v11 }
 0x3e7   : > { %v6204_v46 = vpop.xlane.xlu0 %6203  ;;  %7873 = vpow2.f32 %v6253_v9  ;;  %v4123_v17 = vrot.slane %v3116_v33, %v8239_v14 }
 0x3e8   : > { %v9402_v15 = vpop.eup %7865  ;;  %v6222_v30 = vsub.f32 %v9314_v8, %v6204_v46  ;;  %v4130_v55 = vrot.slane %v4116_v16, %v8239_v14 }
 0x3e9   : > { %6273 = vadd.xlane.f32.xlu1 %v9402_v15 }
 0x3ea   : > { %v9407_v32 = vpop.eup %7867  ;;  %v6251_v28 = vmul.f32 1.442695, %v6222_v30 }
 0x3eb   : > { %6279 = vadd.xlane.f32.xlu0 %v9407_v32  ;;  %v2981_v59 = vpop.permute.xlu0 %2980 }
 0x3ec   : > { %7875 = vpow2.f32 %v6251_v28  ;;  %v3120_v39 = vpack.i.b16 %v2997_v34, %v2981_v59  ;;  %v3122_v8 = vshrl.u32 %v2981_v59, 16 }
 0x3ed   : > { %7877 = vpow2.f32 %v6255_v50 }
 0x3ee   : > { %v9411_v31 = vpop.eup %7869  ;;  %v3124_v7 = vpack.i.b16 %v3123_v13, %v3122_v8  ;;  %v4065_v25 = vcombine.high %v3120_v39, %v8237_v11  ;;  %v4072_v5 = vrot.slane %v3120_v39, %v8239_v14 }
 0x3ef   : > { %6275 = vadd.xlane.f32.xlu0 %v9411_v31 }
 0x3f0   : > { %v9419_v6 = vpop.eup %7871  ;;  %v4079_v4 = vrot.slane %v4065_v25, %v8239_v14  ;;  %v4080_v57 = vcombine.low %v4057_v37, %v4072_v5  ;;  %v4081_v3 = vcombine.high %v4057_v37, %v4072_v5  ;;  %v4131_v49 = vcombine.high %v3124_v7, %v8237_v11 }
 0x3f1   : > { %v4138_v51 = vrot.slane %v3124_v7, %v8239_v14  ;;  %6281 = vadd.xlane.f32.xlu1 %v9419_v6  ;;  %v9430_v20 = vpop.eup %7873 }
 0x3f2   : > { %v4088_v22 = vrot.slane %v4080_v57, %v8243_v18  ;;  %v4095_v61 = vrot.slane %v4081_v3, %v8243_v18  ;;  %v4096_v54 = vcombine.low %v4064_v0, %v4079_v4  ;;  %v4097_v41 = vcombine.high %v4064_v0, %v4079_v4 }
 0x3f3   : > { %v4145_v52 = vrot.slane %v4131_v49, %v8239_v14  ;;  %v4146_v35 = vcombine.low %v4123_v17, %v4138_v51  ;;  %v4147_v23 = vcombine.high %v4123_v17, %v4138_v51 }
 0x3f4   : > { %v4104_v10 = vrot.slane %v4096_v54, %v8243_v18  ;;  %v4111_v42 = vrot.slane %v4097_v41, %v8243_v18  ;;  %v4882_v2 = vcombine.low %v4088_v22, %v4095_v61  ;;  %v7366_v56 = vcombine.high %v4088_v22, %v4095_v61 }
 0x3f5   : > { %v4154_v24 = vrot.slane %v4146_v35, %v8243_v18  ;;  %v4161_v12 = vrot.slane %v4147_v23, %v8243_v18  ;;  %v4162_v27 = vcombine.low %v4130_v55, %v4145_v52  ;;  %v4163_v1 = vcombine.high %v4130_v55, %v4145_v52  ;;  %6285 = vadd.xlane.f32.xlu1 %v9430_v20 }
 0x3f6   : > { %v9437_v29 = vpop.eup %7875  ;;  %v4889_v38 = vrot.slane %v4882_v2, %v8239_v14  ;;  %v4897_v62 = vrot.slane %v7366_v56, %v8239_v14  ;;  %v4898_v9 = vcombine.low %v4104_v10, %v4111_v42  ;;  %v7367_v60 = vcombine.high %v4104_v10, %v4111_v42  ;;  %v5825_v42 = vld [vmem:[#allocation3 + $0x80] sm:$0xff] }
 0x3f7   : > { %v4170_v26 = vrot.slane %v4162_v27, %v8243_v18  ;;  %v4177_v40 = vrot.slane %v4163_v1, %v8243_v18  ;;  %v4932_v46 = vcombine.low %v4154_v24, %v4161_v12  ;;  %v7368_v30 = vcombine.high %v4154_v24, %v4161_v12  ;;  %6283 = vadd.xlane.f32.xlu0 %v9437_v29  ;;  %v9446_v33 = vpop.eup %7877  ;;  %v5833_v2 = vld [vmem:[#allocation3 + $0xc0] sm:$0xff] }
 0x3f8   : > { %v4905_v36 = vrot.slane %v4898_v9, %v8239_v14  ;;  %v4913_v34 = vrot.slane %v7367_v60, %v8239_v14  ;;  %v4914_v28 = vcombine.low %v4889_v38, %v4897_v62 }
 0x3f9   : > { %v4939_v19 = vrot.slane %v4932_v46, %v8239_v14  ;;  %v4947_v50 = vrot.slane %v7368_v30, %v8239_v14  ;;  %v4948_v59 = vcombine.low %v4170_v26, %v4177_v40  ;;  %v7369_v13 = vcombine.high %v4170_v26, %v4177_v40 }
 0x3fa   : > { %v4922_v39 = vcombine.low %v4905_v36, %v4913_v34  ;;  %v4921_v25 = vrot.slane %v4914_v28, %v8243_v18 }
 0x3fb   : > { %v4955_v8 = vrot.slane %v4948_v59, %v8239_v14  ;;  %v4963_v37 = vrot.slane %v7369_v13, %v8239_v14  ;;  %v4964_v7 = vcombine.low %v4939_v19, %v4947_v50  ;;  %6287 = vadd.xlane.f32.xlu0 %v9446_v33  ;;  %v5826_v13 = vld [vmem:[#allocation3 + $0x88] sm:$0xff] }
 0x3fc   : > { %v4929_v5 = vrot.slane %v4922_v39, %v8243_v18 }
 0x3fd   : > { %v4972_v0 = vcombine.low %v4955_v8, %v4963_v37  ;;  %v4971_v57 = vrot.slane %v4964_v7, %v8243_v18 }
 0x3fe   : > { %v4930_v16 = vcombine.low %v4921_v25, %v4929_v5  ;;  %v4931_v4 = vcombine.high %v4921_v25, %v4929_v5  ;;  %v5828_v5 = vld [vmem:[#allocation3 + $0x98] sm:$0xff] }
 0x3ff   : > { %v4979_v3 = vrot.slane %v4972_v0, %v8243_v18 }
 0x400   : > { %v5098_v51 = vshrl.u32 %v4930_v16, 16  ;;  %v5106_v22 = vshrl.u32 %v4931_v4, 16 }
 0x401   : > { %v4980_v49 = vcombine.low %v4971_v57, %v4979_v3  ;;  %v4981_v17 = vcombine.high %v4971_v57, %v4979_v3  ;;  %v5837_v3 = vld [vmem:[#allocation3 + $0xe0] sm:$0xff] }
 0x403   : > { %v5096_v61 = vpack.i.b16 %v4980_v49, %v4930_v16  ;;  %v5099_v54 = vshrl.u32 %v4980_v49, 16  ;;  %v5104_v41 = vpack.i.b16 %v4981_v17, %v4931_v4  ;;  %v5107_v55 = vshrl.u32 %v4981_v17, 16  ;;  %v5830_v16 = vld [vmem:[#allocation3 + $0xa8] sm:$0xff]  ;;  %v5835_v4 = vld [vmem:[#allocation3 + $0xd0] sm:$0xff] }
 0x404   : > { %v5838_v49 = vld [vmem:[#allocation3 + $0xe8] sm:$0xff]  ;;  %v5839_v17 = vld [vmem:[#allocation3 + $0xf0] sm:$0xff] }
 0x405   : > { %v5100_v52 = vpack.i.b16 %v5099_v54, %v5098_v51  ;;  %v5108_v35 = vpack.i.b16 %v5107_v55, %v5106_v22  ;;  %5117 = vst.msk [vmem:[#allocation3 + $0x38] sm:$0xff] %vm2901_vm2, %v5096_v61  ;;  %5133 = vst.msk [vmem:[#allocation3 + $0xb8] sm:$0xff] %vm2901_vm2, %v5104_v41 }
 0x407   : > { %5125 = vst.msk [vmem:[#allocation3 + $0x78] sm:$0xff] %vm2901_vm2, %v5100_v52  ;;  %5141 = vst.msk [vmem:[#allocation3 + $0xf8] sm:$0xff] %vm2901_vm2, %v5108_v35 }
 0x40c   : > { %v5816_v23 = vld [vmem:[#allocation3 + $0x38] sm:$0xff] }
 0x40d   : > { %7658 = vmatprep.subr.bf16.mxu1 %v5816_v23  ;;  %v5832_v57 = vld [vmem:[#allocation3 + $0xb8] sm:$0xff] }
 0x40e   : > { %7659 = vmatpush3.bf16.msra.mxu1 %v5816_v23  ;;  %v5824_v10 = vld [vmem:[#allocation3 + $0x78] sm:$0xff] }
 0x40f   : > { %7678 = vmatprep.subr.bf16.mxu0 %v5824_v10  ;;  %7684 = vmatprep.subr.bf16.mxu1 %v5825_v42  ;;  %v5840_v51 = vld [vmem:[#allocation3 + $0xf8] sm:$0xff] }
 0x410   : > { %7679 = vmatpush3.bf16.msra.mxu0 %v5824_v10 }
 0x411   : > { %7704 = vmatprep.subr.bf16.mxu0 %v5833_v2 }
 0x432   : > { %v6262_v24 = vpop.xlane.xlu1 %6261 }
 0x433   : > { %v6258_v56 = vpop.xlane.xlu0 %6257 }
 0x437   : > { %v6264_v12 = vpop.xlane.xlu0 %6263 }
 0x438   : > { %7879 = vrcp.f32 %v6264_v12 }
 0x439   : > { %7881 = vrcp.f32 %v6258_v56 }
 0x43a   : > { %7883 = vrcp.f32 %v6262_v24  ;;  %v6260_v27 = vpop.xlane.xlu1 %6259 }
 0x43b   : > { %7885 = vrcp.f32 %v6260_v27  ;;  %v6266_v1 = vpop.xlane.xlu0 %6265 }
 0x43c   : > { %7887 = vrcp.f32 %v6266_v1 }
 0x43e   : > { %v6270_v9 = vpop.xlane.xlu1 %6269 }
 0x442   : > { %v7880_v38 = vpop.eup %7879 }
 0x443   : > { %v7882_v62 = vpop.eup %7881  ;;  %v6268_v60 = vpop.xlane.xlu0 %6267  ;;  %v6308_v46 = vmul.f32 %v7880_v38, %v9337_v43 }
 0x444   : > { %v7884_v26 = vpop.eup %7883  ;;  %7889 = vrcp.f32 %v6268_v60  ;;  %v6305_v30 = vmul.f32 %v7882_v62, %v9329_v47 }
 0x445   : > { %v7886_v40 = vpop.eup %7885  ;;  %7891 = vrcp.f32 %v6270_v9  ;;  %v6307_v28 = vmul.f32 %v7884_v26, %v9327_v44 }
 0x446   : > { %v6306_v36 = vmul.f32 %v7886_v40, %v9341_v21  ;;  %v7888_v59 = vpop.eup %7887  ;;  %v5827_v21 = vld [vmem:[#allocation3 + $0x90] sm:$0xff] }
 0x447   : > { %v6272_v34 = vpop.xlane.xlu0 %6271  ;;  %v6322_v50 = vpack.c.bf16 %v6308_v46, %v6307_v28  ;;  %v6309_v43 = vmul.f32 %v7888_v59, %v9343_v53  ;;  %v5829_v53 = vld [vmem:[#allocation3 + $0xa0] sm:$0xff] }
 0x448   : > { %7893 = vrcp.f32 %v6272_v34  ;;  %v6321_v19 = vpack.c.bf16 %v6306_v36, %v6305_v30 }
 0x44a   : > { %7660 = vmatprep.mubr.bf16.mxu1 %v6321_v19 }
 0x44b   : > { %7661 = vmatmul.mubr.bf16.vlgmr.msra.gmra.mrb[28].mxu1 %v6322_v50 }
 0x44c   : > { %7685 = vmatpush3.bf16.msra.mxu1 %v5825_v42 }
 0x44d   : > { %7686 = vmatprep.subr.bf16.mxu1 %v5826_v13 }
 0x44e   : > { %v7890_v39 = vpop.eup %7889 }
 0x44f   : > { %v6310_v8 = vmul.f32 %v7890_v39, %v9367_v45  ;;  %v7892_v47 = vpop.eup %7891  ;;  %v5834_v45 = vld [vmem:[#allocation3 + $0xc8] sm:$0xff] }
 0x450   : > { %7687 = vmatpush3.bf16.msra.mxu1 %v5826_v13  ;;  %v6311_v7 = vmul.f32 %v7892_v47, %v9354_v58  ;;  %v5831_v58 = vld [vmem:[#allocation3 + $0xb0] sm:$0xff] }
 0x451   : > { %7688 = vmatprep.subr.bf16.mxu1 %v5827_v21  ;;  %v6323_v37 = vpack.c.bf16 %v6310_v8, %v6309_v43 }
 0x452   : > { %v7894_v44 = vpop.eup %7893 }
 0x453   : > { %7680 = vmatprep.mubr.bf16.mxu0 %v6323_v37  ;;  %v6312_v25 = vmul.f32 %v7894_v44, %v9376_v63  ;;  %v5836_v63 = vld [vmem:[#allocation3 + $0xd8] sm:$0xff] }
 0x454   : > { %7689 = vmatpush3.bf16.msra.mxu1 %v5827_v21 }
 0x455   : > { %7690 = vmatprep.subr.bf16.mxu1 %v5828_v5  ;;  %v6324_v0 = vpack.c.bf16 %v6312_v25, %v6311_v7 }
 0x457   : > { %7681 = vmatmul.mubr.bf16.vlgmr.msra.gmra.mrb[24].mxu0 %v6324_v0 }
 0x458   : > { %7691 = vmatpush3.bf16.msra.mxu1 %v5828_v5  ;;  %7705 = vmatpush3.bf16.msra.mxu0 %v5833_v2 }
 0x459   : > { %7692 = vmatprep.subr.bf16.mxu1 %v5829_v53  ;;  %7706 = vmatprep.subr.bf16.mxu0 %v5834_v45 }
 0x45c   : > { %7693 = vmatpush3.bf16.msra.mxu1 %v5829_v53  ;;  %7707 = vmatpush3.bf16.msra.mxu0 %v5834_v45 }
 0x45d   : > { %7694 = vmatprep.subr.bf16.mxu1 %v5830_v16  ;;  %7708 = vmatprep.subr.bf16.mxu0 %v5835_v4 }
 0x460   : > { %7695 = vmatpush3.bf16.msra.mxu1 %v5830_v16  ;;  %7709 = vmatpush3.bf16.msra.mxu0 %v5835_v4 }
 0x461   : > { %7696 = vmatprep.subr.bf16.mxu1 %v5831_v58  ;;  %7710 = vmatprep.subr.bf16.mxu0 %v5836_v63 }
 0x464   : > { %7697 = vmatpush3.bf16.msra.mxu1 %v5831_v58  ;;  %7711 = vmatpush3.bf16.msra.mxu0 %v5836_v63 }
 0x465   : > { %7698 = vmatprep.subr.bf16.mxu1 %v5832_v57  ;;  %7712 = vmatprep.subr.bf16.mxu0 %v5837_v3 }
 0x468   : > { %7699 = vmatpush3.bf16.msra.mxu1 %v5832_v57  ;;  %7713 = vmatpush3.bf16.msra.mxu0 %v5837_v3 }
 0x469   : > { %7714 = vmatprep.subr.bf16.mxu0 %v5838_v49 }
 0x46c   : > { %7715 = vmatpush3.bf16.msra.mxu0 %v5838_v49 }
 0x46d   : > { %7716 = vmatprep.subr.bf16.mxu0 %v5839_v17 }
 0x470   : > { %7717 = vmatpush3.bf16.msra.mxu0 %v5839_v17 }
 0x471   : > { %7718 = vmatprep.subr.bf16.mxu0 %v5840_v51 }
 0x472   : > { %v6278_v22 = vpop.xlane.xlu1 %6277 }
 0x474   : > { %7719 = vmatpush3.bf16.msra.mxu0 %v5840_v51 }
 0x476   : > { %v6274_v61 = vpop.xlane.xlu1 %6273 }
 0x478   : > { %v6280_v54 = vpop.xlane.xlu0 %6279 }
 0x479   : > { %7895 = vrcp.f32 %v6280_v54 }
 0x47a   : > { %7897 = vrcp.f32 %v6274_v61 }
 0x47b   : > { %7899 = vrcp.f32 %v6278_v22 }
 0x47c   : > { %v6276_v41 = vpop.xlane.xlu0 %6275 }
 0x47d   : > { %7901 = vrcp.f32 %v6276_v41 }
 0x47e   : > { %v6282_v55 = vpop.xlane.xlu1 %6281 }
 0x47f   : > { %7903 = vrcp.f32 %v6282_v55 }
 0x482   : > { %v6286_v35 = vpop.xlane.xlu1 %6285 }
 0x483   : > { %v7896_v52 = vpop.eup %7895 }
 0x484   : > { %v6284_v23 = vpop.xlane.xlu0 %6283  ;;  %v7898_v10 = vpop.eup %7897  ;;  %v6316_v56 = vmul.f32 %v7896_v52, %v9407_v32 }
 0x485   : > { %7905 = vrcp.f32 %v6284_v23  ;;  %v7900_v42 = vpop.eup %7899  ;;  %v6313_v12 = vmul.f32 %v7898_v10, %v9402_v15 }
 0x486   : > { %7907 = vrcp.f32 %v6286_v35  ;;  %v6315_v1 = vmul.f32 %v7900_v42, %v9397_v48 }
 0x487   : > { %v7902_v2 = vpop.eup %7901 }
 0x488   : > { %v6288_v24 = vpop.xlane.xlu0 %6287  ;;  %v6314_v27 = vmul.f32 %v7902_v2, %v9411_v31  ;;  %v6326_v62 = vpack.c.bf16 %v6316_v56, %v6315_v1 }
 0x489   : > { %7909 = vrcp.f32 %v6288_v24  ;;  %v7904_v9 = vpop.eup %7903 }
 0x48a   : > { %v6325_v38 = vpack.c.bf16 %v6314_v27, %v6313_v12  ;;  %v6317_v26 = vmul.f32 %v7904_v9, %v9419_v6 }
 0x48c   : > { %7700 = vmatprep.mubr.bf16.mxu1 %v6325_v38 }
 0x48d   : > { %7701 = vmatmul.mubr.bf16.vlgmr.msra.gmra.mrb[32].mxu1 %v6326_v62 }
 0x48f   : > { %v7906_v60 = vpop.eup %7905 }
 0x490   : > { %v6318_v40 = vmul.f32 %v7906_v60, %v9437_v29  ;;  %v7908_v46 = vpop.eup %7907 }
 0x491   : > { %v6319_v15 = vmul.f32 %v7908_v46, %v9430_v20 }
 0x492   : > { %v6327_v32 = vpack.c.bf16 %v6318_v40, %v6317_v26 }
 0x493   : > { %v7910_v30 = vpop.eup %7909 }
 0x494   : > { %7720 = vmatprep.mubr.bf16.mxu0 %v6327_v32  ;;  %v6320_v31 = vmul.f32 %v7910_v30, %v9446_v33 }
 0x496   : > { %v6328_v36 = vpack.c.bf16 %v6320_v31, %v6319_v15 }
 0x498   : > { %7721 = vmatmul.mubr.bf16.vlgmr.msra.gmra.mrb[28].mxu0 %v6328_v36 }
 0x51e   : > { %v7662_v48 = vpop.f32.mrb[28].mxu1 }
 0x51f   : > { %v6363_v34 = vpop.f32.mrb[29].mxu1 }
 0x520   : > { %v7663_v28 = vpop.f32.mrb[30].mxu1 }
 0x521   : > { %v6526_v19 = vpack.c.bf16 %v7663_v28, %v7662_v48  ;;  %v6366_v50 = vpop.f32.mrb[31].mxu1 }
 0x522   : > { %v6525_v59 = vpack.c.bf16 %v6366_v50, %v6363_v34 }
 0x523   : > { %v6553_v47 = vshrl.u32 %v6526_v19, 16 }
 0x524   : > { %v6537_v20 = vshrl.u32 %v6525_v59, 16 }
 0x52a   : > { %v7682_v13 = vpop.f32.mrb[24].mxu0 }
 0x52b   : > { %v6412_v6 = vpop.f32.mrb[25].mxu0 }
 0x52c   : > { %v7683_v39 = vpop.f32.mrb[26].mxu0 }
 0x52d   : > { %v6528_v29 = vpack.c.bf16 %v7683_v39, %v7682_v13  ;;  %v6415_v43 = vpop.f32.mrb[27].mxu0 }
 0x52e   : > { %v6527_v8 = vpack.c.bf16 %v6415_v43, %v6412_v6 }
 0x52f   : > { %v6551_v21 = vpack.i.b16 %v6528_v29, %v6526_v19  ;;  %v6554_v37 = vshrl.u32 %v6528_v29, 16 }
 0x530   : > { %v6535_v44 = vpack.i.b16 %v6527_v8, %v6525_v59  ;;  %v6538_v33 = vshrl.u32 %v6527_v8, 16 }
 0x531   : > { %v6555_v7 = vpack.i.b16 %v6554_v37, %v6553_v47  ;;  %v6697_v58 = vcombine.high %v6551_v21, %v8237_v11  ;;  %v6704_v17 = vrot.slane %v6551_v21, %v8239_v14 }
 0x532   : > { %v6539_v25 = vpack.i.b16 %v6538_v33, %v6537_v20  ;;  %v6565_v57 = vcombine.high %v6535_v44, %v8237_v11  ;;  %v6572_v22 = vrot.slane %v6535_v44, %v8239_v14 }
 0x533   : > { %v6763_v51 = vcombine.high %v6555_v7, %v8237_v11  ;;  %v6711_v41 = vrot.slane %v6697_v58, %v8239_v14  ;;  %v6770_v55 = vrot.slane %v6555_v7, %v8239_v14 }
 0x534   : > { %v6631_v52 = vcombine.high %v6539_v25, %v8237_v11  ;;  %v6579_v23 = vrot.slane %v6565_v57, %v8239_v14  ;;  %v6638_v56 = vrot.slane %v6539_v25, %v8239_v14 }
 0x535   : > { %v6777_v1 = vrot.slane %v6763_v51, %v8239_v14 }
 0x536   : > { %v6645_v60 = vrot.slane %v6631_v52, %v8239_v14 }
 0x560   : > { %v7702_v5 = vpop.f32.mrb[32].mxu1 }
 0x561   : > { %v6461_v0 = vpop.f32.mrb[33].mxu1 }
 0x562   : > { %v7703_v53 = vpop.f32.mrb[34].mxu1 }
 0x563   : > { %v6530_v45 = vpack.c.bf16 %v7703_v53, %v7702_v5  ;;  %v6464_v16 = vpop.f32.mrb[35].mxu1 }
 0x564   : > { %v6529_v4 = vpack.c.bf16 %v6464_v16, %v6461_v0 }
 0x565   : > { %v6561_v10 = vshrl.u32 %v6530_v45, 16 }
 0x566   : > { %v6545_v24 = vshrl.u32 %v6529_v4, 16 }
 0x56b   : > { %v7722_v63 = vpop.f32.mrb[28].mxu0 }
 0x56c   : > { %v6510_v3 = vpop.f32.mrb[29].mxu0 }
 0x56d   : > { %v7723_v49 = vpop.f32.mrb[30].mxu0 }
 0x56e   : > { %v6532_v61 = vpack.c.bf16 %v7723_v49, %v7722_v63  ;;  %v6513_v54 = vpop.f32.mrb[31].mxu0 }
 0x56f   : > { %v6531_v35 = vpack.c.bf16 %v6513_v54, %v6510_v3 }
 0x570   : > { %v6559_v42 = vpack.i.b16 %v6532_v61, %v6530_v45  ;;  %v6562_v2 = vshrl.u32 %v6532_v61, 16 }
 0x571   : > { %v6543_v12 = vpack.i.b16 %v6531_v35, %v6529_v4  ;;  %v6546_v27 = vshrl.u32 %v6531_v35, 16 }
 0x572   : > { %v6563_v38 = vpack.i.b16 %v6562_v2, %v6561_v10  ;;  %v6712_v62 = vcombine.high %v6559_v42, %v8237_v11  ;;  %v6719_v9 = vrot.slane %v6559_v42, %v8239_v14 }
 0x573   : > { %v6547_v26 = vpack.i.b16 %v6546_v27, %v6545_v24  ;;  %v6580_v40 = vcombine.high %v6543_v12, %v8237_v11  ;;  %v6587_v46 = vrot.slane %v6543_v12, %v8239_v14 }
 0x574   : > { %v6726_v32 = vrot.slane %v6712_v62, %v8239_v14  ;;  %v6727_v30 = vcombine.low %v6704_v17, %v6719_v9  ;;  %v6728_v15 = vcombine.high %v6704_v17, %v6719_v9  ;;  %v6778_v31 = vcombine.high %v6563_v38, %v8237_v11 }
 0x575   : > { %v6785_v36 = vrot.slane %v6563_v38, %v8239_v14  ;;  %v6594_v48 = vrot.slane %v6580_v40, %v8239_v14  ;;  %v6595_v34 = vcombine.low %v6572_v22, %v6587_v46  ;;  %v6596_v28 = vcombine.high %v6572_v22, %v6587_v46 }
 0x576   : > { %v6735_v19 = vrot.slane %v6727_v30, %v8243_v18  ;;  %v6742_v50 = vrot.slane %v6728_v15, %v8243_v18  ;;  %v6743_v59 = vcombine.low %v6711_v41, %v6726_v32  ;;  %v6744_v13 = vcombine.high %v6711_v41, %v6726_v32 }
 0x577   : > { %v6792_v6 = vrot.slane %v6778_v31, %v8239_v14  ;;  %v6793_v39 = vcombine.low %v6770_v55, %v6785_v36  ;;  %v6794_v29 = vcombine.high %v6770_v55, %v6785_v36  ;;  %v6603_v43 = vrot.slane %v6595_v34, %v8243_v18 }
 0x578   : > { %v6751_v8 = vrot.slane %v6743_v59, %v8243_v18  ;;  %v6758_v47 = vrot.slane %v6744_v13, %v8243_v18  ;;  %v6929_v21 = vcombine.low %v6735_v19, %v6742_v50  ;;  %v7397_v37 = vcombine.high %v6735_v19, %v6742_v50 }
 0x579   : > { %v6801_v20 = vrot.slane %v6793_v39, %v8243_v18  ;;  %v6808_v44 = vrot.slane %v6794_v29, %v8243_v18  ;;  %v6809_v33 = vcombine.low %v6777_v1, %v6792_v6  ;;  %v6810_v7 = vcombine.high %v6777_v1, %v6792_v6  ;;  %v7845_v29 = vld [vmem:[%s9626_s8] sm:$0xff]  }
 0x57a   : > { %v6945_v25 = vcombine.low %v6751_v8, %v6758_v47  ;;  %v7398_v5 = vcombine.high %v6751_v8, %v6758_v47  ;;  %v6610_v0 = vrot.slane %v6596_v28, %v8243_v18  ;;  %v6611_v53 = vcombine.low %v6579_v23, %v6594_v48  ;;  %7724 = vmatprep.subr.bf16.mxu1 %v7845_v29 }
 0x57b   : > { %v6817_v45 = vrot.slane %v6809_v33, %v8243_v18  ;;  %v6824_v16 = vrot.slane %v6810_v7, %v8243_v18  ;;  %v6979_v4 = vcombine.low %v6801_v20, %v6808_v44  ;;  %v7399_v58 = vcombine.high %v6801_v20, %v6808_v44  ;;  %7725 = vmatpush3.bf16.msra.mxu1 %v7845_v29 }
 0x57c   : > { %v6612_v63 = vcombine.high %v6579_v23, %v6594_v48  ;;  %v6619_v57 = vrot.slane %v6611_v53, %v8243_v18  ;;  %v6646_v3 = vcombine.high %v6547_v26, %v8237_v11  ;;  %v6653_v49 = vrot.slane %v6547_v26, %v8239_v14 }
 0x57d   : > { %v6829_v17 = vcombine.low %v6603_v43, %v6610_v0  ;;  %v7393_v51 = vcombine.high %v6603_v43, %v6610_v0  ;;  %v6936_v22 = vrot.slane %v6929_v21, %v8239_v14  ;;  %v6944_v61 = vrot.slane %v7397_v37, %v8239_v14 }
 0x57e   : > { %v6626_v54 = vrot.slane %v6612_v63, %v8243_v18  ;;  %v6660_v41 = vrot.slane %v6646_v3, %v8239_v14  ;;  %v6661_v55 = vcombine.low %v6638_v56, %v6653_v49  ;;  %v6662_v52 = vcombine.high %v6638_v56, %v6653_v49 }
 0x57f   : > { %v6952_v35 = vrot.slane %v6945_v25, %v8239_v14  ;;  %v6960_v23 = vrot.slane %v7398_v5, %v8239_v14  ;;  %v6961_v10 = vcombine.low %v6936_v22, %v6944_v61  ;;  %v6986_v11 = vrot.slane %v6979_v4, %v8239_v14 }
 0x580   : > { %v6669_v42 = vrot.slane %v6661_v55, %v8243_v18  ;;  %v6676_v2 = vrot.slane %v6662_v52, %v8243_v18  ;;  %v6677_v24 = vcombine.low %v6645_v60, %v6660_v41  ;;  %v6678_v12 = vcombine.high %v6645_v60, %v6660_v41 }
 0x581   : > { %v6845_v27 = vcombine.low %v6619_v57, %v6626_v54  ;;  %v7394_v1 = vcombine.high %v6619_v57, %v6626_v54  ;;  %v6968_v38 = vrot.slane %v6961_v10, %v8243_v18  ;;  %v6969_v62 = vcombine.low %v6952_v35, %v6960_v23  ;;  %v7846_v57 = vld [vmem:[%s9626_s8 + $0x8] sm:$0xff]  }
 0x582   : > { %v6685_v56 = vrot.slane %v6677_v24, %v8243_v18  ;;  %v6692_v9 = vrot.slane %v6678_v12, %v8243_v18  ;;  %v6879_v26 = vcombine.low %v6669_v42, %v6676_v2  ;;  %v7395_v40 = vcombine.high %v6669_v42, %v6676_v2  ;;  %7726 = vmatprep.subr.bf16.mxu1 %v7846_v57 }
 0x583   : > { %v6976_v46 = vrot.slane %v6969_v62, %v8243_v18  ;;  %v6994_v32 = vrot.slane %v7399_v58, %v8239_v14  ;;  %v6995_v30 = vcombine.low %v6817_v45, %v6824_v16  ;;  %v7400_v15 = vcombine.high %v6817_v45, %v6824_v16  ;;  %7727 = vmatpush3.bf16.msra.mxu1 %v7846_v57 }
 0x584   : > { %v6836_v31 = vrot.slane %v6829_v17, %v8239_v14  ;;  %v6844_v60 = vrot.slane %v7393_v51, %v8239_v14  ;;  %v6852_v36 = vrot.slane %v6845_v27, %v8239_v14  ;;  %v6860_v48 = vrot.slane %v7394_v1, %v8239_v14 }
 0x585   : > { %v6978_v34 = vcombine.high %v6968_v38, %v6976_v46  ;;  %v7002_v28 = vrot.slane %v6995_v30, %v8239_v14  ;;  %v7010_v19 = vrot.slane %v7400_v15, %v8239_v14  ;;  %v7011_v50 = vcombine.low %v6986_v11, %v6994_v32  ;;  %v7401_v30 = vld [vmem:[%s9627_s9] ss:$0 sm:$0xff] }
 0x586   : > { %v6977_v59 = vcombine.low %v6968_v38, %v6976_v46  ;;  %v6861_v13 = vcombine.low %v6836_v31, %v6844_v60  ;;  %v6869_v6 = vcombine.low %v6852_v36, %v6860_v48  ;;  %v6886_v39 = vrot.slane %v6879_v26, %v8239_v14 }
 0x587   : > { %v7019_v43 = vcombine.low %v7002_v28, %v7010_v19  ;;  %v6894_v8 = vrot.slane %v7395_v40, %v8239_v14  ;;  %v6895_v47 = vcombine.low %v6685_v56, %v6692_v9  ;;  %v7396_v20 = vcombine.high %v6685_v56, %v6692_v9 }
 0x588   : > { %v6868_v21 = vrot.slane %v6861_v13, %v8243_v18  ;;  %v6876_v37 = vrot.slane %v6869_v6, %v8243_v18  ;;  %v7018_v44 = vrot.slane %v7011_v50, %v8243_v18  ;;  %v7044_v4 = vshrl.u32 %v6977_v59, 16 }
 0x589   : > { %v7026_v33 = vrot.slane %v7019_v43, %v8243_v18  ;;  %v6902_v7 = vrot.slane %v6895_v47, %v8239_v14  ;;  %v6911_v25 = vcombine.low %v6886_v39, %v6894_v8  ;;  %v6910_v0 = vrot.slane %v7396_v20, %v8239_v14 }
 0x58a   : > { %v6878_v5 = vcombine.high %v6868_v21, %v6876_v37  ;;  %v6877_v53 = vcombine.low %v6868_v21, %v6876_v37  ;;  %v7050_v63 = vshrl.u32 %v6978_v34, 16 }
 0x58b   : > { %v7028_v45 = vcombine.high %v7018_v44, %v7026_v33  ;;  %v7027_v16 = vcombine.low %v7018_v44, %v7026_v33  ;;  %v6919_v58 = vcombine.low %v6902_v7, %v6910_v0  ;;  %v6918_v22 = vrot.slane %v6911_v25, %v8243_v18 }
 0x58c   : > { %v7038_v52 = vshrl.u32 %v6878_v5, 16  ;;  %v7032_v35 = vshrl.u32 %v6877_v53, 16 }
 0x58d   : > { %v7049_v3 = vpack.i.b16 %v7028_v45, %v6978_v34  ;;  %v7045_v49 = vshrl.u32 %v7027_v16, 16  ;;  %v7051_v17 = vshrl.u32 %v7028_v45, 16  ;;  %v7043_v51 = vpack.i.b16 %v7027_v16, %v6977_v59 }
 0x58e   : > { %v6926_v61 = vrot.slane %v6919_v58, %v8243_v18 }
 0x58f   : > { %7059 = vrot.lane.b32.xlu1 %v7049_v3, %s7997_s27  ;;  %v7046_v14 = vpack.i.b16 %v7045_v49, %v7044_v4  ;;  %v7052_v54 = vpack.i.b16 %v7051_v17, %v7050_v63 }
 0x590   : > { %v6928_v41 = vcombine.high %v6918_v22, %v6926_v61  ;;  %v6927_v55 = vcombine.low %v6918_v22, %v6926_v61 }
 0x591   : > { %7055 = vrot.lane.b32.xlu0 %v7046_v14, %s9629_s28 }
 0x592   : > { %v7037_v23 = vpack.i.b16 %v6928_v41, %v6878_v5  ;;  %v7039_v10 = vshrl.u32 %v6928_v41, 16  ;;  %v7033_v11 = vshrl.u32 %v6927_v55, 16  ;;  %v7031_v42 = vpack.i.b16 %v6927_v55, %v6877_v53 }
 0x594   : > { %7057 = vrot.lane.b32.xlu1 %v7037_v23, %s7997_s27  ;;  %v7040_v2 = vpack.i.b16 %v7039_v10, %v7038_v52  ;;  %v7034_v18 = vpack.i.b16 %v7033_v11, %v7032_v35 }
 0x596   : > { %7061 = vrot.lane.b32.xlu0 %v7040_v2, %s7999_s29 }
 0x598   : > { %7053 = vrot.lane.b32.xlu1 %v7034_v18, %s9629_s28  ;;  %s7915_s28 = sshll.u32 %s8000_s19, 4  ;;  %s7916_s28 = int_to_ptr.vmem [resolvable:$false] %s7915_s28 }
 0x599   : > { %s7917_s0 = scalar_lea.vmem %s7916_s28, 1024  ;;  %p7918_p1 = scmp.lt.s32.totalorder %s9561_s22, %s7916_s28 }
 0x59a   : > { %p7919_p2 = scmp.lt.s32.totalorder %s7917_s0, %s7911_s11 }
 0x59c   : > { %7063 = vrot.lane.b32.xlu1 %v7052_v54, %s7999_s29  ;;  %p7920_p3 = por %p7919_p2, %p7918_p1 }
 0x59e   : > { %p7921_p5 = pnand %p7920_p3, %p7914_p0 }
 0x601   : > { %v7060_v24 = vpop.permute.xlu1 %7059 }
 0x603   : > { %v7056_v12 = vpop.permute.xlu0 %7055 }
 0x604   : > { %v7070_v38 = vsel %vm2901_vm2, %v7043_v51, %v7056_v12 }
 0x605   : > { %v7075_v40 = vsel %vm485_vm0, %v7070_v38, %v7060_v24 }
 0x606   : > { %v7058_v27 = vpop.permute.xlu1 %7057 }
 0x608   : > { %v7062_v56 = vpop.permute.xlu0 %7061 }
 0x60a   : > { %v7054_v1 = vpop.permute.xlu1 %7053 }
 0x60b   : > { %v7067_v62 = vsel %vm2901_vm2, %v7031_v42, %v7054_v1 }
 0x60c   : > { %v7073_v9 = vsel %vm485_vm0, %v7067_v62, %v7058_v27 }
 0x60d   : > { %v7078_v26 = vsel %vm7076_vm4, %v7073_v9, %v7062_v56 }
 0x60e   : > { %v7064_v46 = vpop.permute.xlu1 %7063  ;;  %7728 = vmatprep.mubr.msk.bf16.mxu1 %vm5179_vm1, %v7078_v26 }
 0x60f   : > { %v7080_v32 = vsel %vm7076_vm4, %v7075_v40, %v7064_v46 }
 0x610   : > { %7729 = vmatmul.mubr.msk.bf16.vlgmr.msra.gmra.mrb[36].mxu1 %vm5179_vm1, %v7080_v32 }
 0x6e3   : > { %v7730_v15 = vpop.f32.mrb[36].mxu1 }
 0x6e4   : > { %v7151_v31 = vadd.f32 %v7730_v15, %v7401_v30  ;;  %v7142_v60 = vpop.f32.mrb[37].mxu1 }
 0x6e5   : > { %v7143_v36 = vadd.f32 %v7401_v30, %v7142_v60  ;;  %v7731_v48 = vpop.f32.mrb[38].mxu1 }
 0x6e6   : > { %7159 = vst.msk [vmem:[%s392_s20 + $0x10] sm:$0xff] %vm5179_vm1, %v7151_v31  ;;  %v7154_v34 = vadd.f32 %v7731_v48, %v7401_v30  ;;  %v7145_v28 = vpop.f32.mrb[39].mxu1 }
 0x6e7   : > { %7157 = vst.msk [vmem:[%s392_s20] sm:$0xff] %vm5179_vm1, %v7143_v36  ;;  %v7146_v19 = vadd.f32 %v7401_v30, %v7145_v28 }
 0x6e8   : > { %7160 = vst.msk [vmem:[%s392_s20 + $0x18] sm:$0xff] %vm5179_vm1, %v7154_v34 }
 0x6e9   : > { %7158 = vst.msk [vmem:[%s392_s20 + $0x8] sm:$0xff] %vm5179_vm1, %v7146_v19 }
 0x6ea   : > { %7924 = shalt.err (!%p7921_p5)
}
 0x6eb   : > { %s7925_s30 = scalar_lea.hbm %s9567_s12, 512  ;;  %s7929_s27 = scalar_lea.hbm %s9628_s10, 1024 }
 0x6ec   : > { %p7926_p6 = scmp.ne.s32.totalorder %s9567_s12, %s7925_s30  ;;  %p7930_p10 = scmp.lt.u32.totalorder %s9567_s12, %s9628_s10 }
 0x6ed   : > { %p7931_p11 = scmp.lt.u32.totalorder %s7929_s27, %s7925_s30  ;;  %p7933_p13 = scmp.lt.u32.totalorder %s7925_s30, %s9567_s12 }
 0x6ee   : > { %p7927_p7 = pnand %p7926_p6, %p8097_p4 }
 0x6ef   : > { %p7932_p12 = por %p7931_p11, %p7930_p10 }
 0x6f0   : > { %p7928_p9 = pneg %p7927_p7 }
 0x6f1   : > { %p7934_p0 = por %p7933_p13, %p7932_p12 }
 0x6f3   : > { %p7935_p1 = pnand %p7934_p0, %p7928_p9 }
 0x6f5   : > { %7938 = shalt.err (!%p7935_p1)
}
 0x6f6   : > { %s8001_s0 = smov 128   ;;  %s9634_s11 = smov 8  }
 0x6f7   : > { %7766 = dma.vmem_to_hbm [thread:$0]  (%p8097_p4), %s9561_s22, 512, %s9567_s12, %s9571_s16, %s8001_s0, %s8001_s0, %s9634_s11  }
 0x6f8 PF: > { %p7772_p2 = scmp.ge.s32.totalorder %s7989_s18, 2  ;;  %s7192_s19 = sand.u32 1, %s7969_s13  }
 0x6f9   : > { %s7193_s30 = scalar_lea.sflag [#allocation5], %s7192_s19 }
 0x6fa   : > { %p7769_p3 = pnand %p7772_p2, %p8104_p8 }
 0x6fc   : > { %7964 = dma.done.wait (!%p7769_p3), %s7193_s30, 512  }
 0x6fd   : > { %7966 = vsyncadd (!%p7769_p3), %s7193_s30, 4294966784  ;;  %s23_s18 = sadd.s32 1, %s7989_s18   ;;  %s9635_s13 = smov %s7973_s14 }
 0x6fe   : > { %p20_p5 = scmp.ge.s32.totalorder %s23_s18, 4   ;;  %s9636_s14 = smov %s7977_s15 }
 0x6ff   : > { %s9637_s15 = smov %s8110_s26  ;;  %s9638_s16 = smov %s7985_s17 }
 0x700   : > { %s9639_s17 = smov %s9641_s21  ;;  %22 = sbr.rel (!%p20_p5) target bundleno = 6 (0x6), region = 102 }
 0x707   :  { %7198 = vsyncpa [#allocation5], 1 }
 0x708   :  { %7200 = vsyncpa [#allocation5 + $0x1], 1 }

</bundles_post_ra>
